<compile_context>
chip_gen: v7x
topology: tpu7x:2x2x1
jax: 0.10.0
libtpu: 0.0.40
codegen_flags: <defaults>
</compile_context>

<pallas_src>
import functools

import jax
import jax.numpy as jnp
from jax.experimental import pallas as pl
from jax.experimental.pallas import tpu as pltpu


# ----------------------------------------------------------------------------
# In-kernel helpers
# ----------------------------------------------------------------------------
def _tap_patch(x, masks, W, L):
    """im2col patch (9*Cin, L) from channel-major x:(Cin, L) via lane rolls.

    Tap t = ky*3 + kx reads input pixel (y+ky-1, x+kx-1).  The circular roll
    wraps across row / image boundaries, so every off-center tap is multiplied
    by its precomputed validity mask (zero where the tap would read padding or
    a neighbouring image in the lane-folded batch).
    """
    taps = []
    for ky in range(3):
        for kx in range(3):
            t = ky * 3 + kx
            s = (ky - 1) * W + (kx - 1)
            if s == 0:
                taps.append(x)                                   # center tap
            else:
                rolled = pltpu.roll(x, shift=(-s) % L, axis=1)   # XLU
                taps.append(rolled * masks[t:t + 1, :])
    return jnp.concatenate(taps, axis=0)                         # (9*Cin, L)


def _conv3x3_mxu(x, w_mat, scale, bias, masks, W, L):
    """3x3 same-padding conv + folded BN + ReLU as ONE bf16 MXU matmul.

    x     : (Cin, L) f32 channel-major activations.
    w_mat : (Cout, 9*Cin) bf16, tap-major (t = ky*3 + kx), channel minor.
    """
    patch = _tap_patch(x, masks, W, L).astype(jnp.bfloat16)      # (9*Cin, L)
    y = jnp.dot(w_mat, patch, preferred_element_type=jnp.float32)  # (Cout, L)
    return jnp.maximum(y * scale + bias, 0.0)                    # f32 epilogue


def _decoder_kernel(f1_ref, f2_ref, f3_ref, u1t_ref, u2t_ref, masks_ref,
                    w1_ref, s1_ref, b1_ref,
                    w234_ref, s234_ref, b234_ref,
                    w5_ref, b5_ref,
                    feat_ref, out_ref, *, W, L):
    masks = masks_ref[...]                                       # (9, L) f32

    # align_corners=True bilinear upsample, folded into one block-diagonal
    # bf16 matmul per feature map: up = x @ kron(I_bpb, kron(Ah, Aw))^T.
    f1u = jnp.dot(f1_ref[0], u1t_ref[...], preferred_element_type=jnp.float32)
    f2u = jnp.dot(f2_ref[0], u2t_ref[...], preferred_element_type=jnp.float32)
    x = jnp.concatenate([f1u, f2u, f3_ref[0].astype(jnp.float32)], axis=0)

    # conv1 .. conv4 (conv + folded BN + ReLU); activations stay on-core.
    x = _conv3x3_mxu(x, w1_ref[...], s1_ref[...], b1_ref[...], masks, W, L)
    for i in range(3):
        x = _conv3x3_mxu(x, w234_ref[i], s234_ref[i], b234_ref[i], masks, W, L)
    feat_ref[0] = x.astype(feat_ref.dtype)

    # conv5 (Cout=1, conv + bias, no BN / ReLU): VPU/XLU weighted tap-sum,
    # keeps the MXU free instead of paying a full pass for one output row.
    patch = _tap_patch(x, masks, W, L)                           # (9*C, L) f32
    out = jnp.sum(patch * w5_ref[...], axis=0, keepdims=True) + b5_ref[...]
    out_ref[0] = out.astype(out_ref.dtype)


# ----------------------------------------------------------------------------
# Host-side constant builders
# ----------------------------------------------------------------------------
def _interp_matrix(out_size, in_size):
    """1-D bilinear interpolation matrix, align_corners=True (PyTorch)."""
    idx = jnp.arange(out_size, dtype=jnp.float32)
    if out_size == 1:
        src = jnp.zeros((out_size,), jnp.float32)
    else:
        src = idx * (in_size - 1) / (out_size - 1)
    lo = jnp.clip(jnp.floor(src).astype(jnp.int32), 0, in_size - 1)
    hi = jnp.clip(lo + 1, 0, in_size - 1)
    frac = src - lo.astype(jnp.float32)
    rows = jnp.arange(out_size)
    m = jnp.zeros((out_size, in_size), jnp.float32)
    m = m.at[rows, lo].add(1.0 - frac)
    m = m.at[rows, hi].add(frac)
    return m


def _upsample_matrix_flat(out_hw, in_hw):
    """(Hout*Wout, Hin*Win) matrix implementing 2-D bilinear upsample."""
    Ah = _interp_matrix(out_hw[0], in_hw[0])
    Aw = _interp_matrix(out_hw[1], in_hw[1])
    return jnp.kron(Ah, Aw)


def _tap_masks(H, W):
    """(9, H*W) f32 masks: 1 where tap (ky,kx) reads a real pixel, else 0."""
    y = jnp.arange(H)[:, None]
    x = jnp.arange(W)[None, :]
    ms = []
    for ky in range(3):
        for kx in range(3):
            dy, dx = ky - 1, kx - 1
            valid = (y + dy >= 0) & (y + dy < H) & (x + dx >= 0) & (x + dx < W)
            ms.append(valid.reshape(-1))
    return jnp.stack(ms).astype(jnp.float32)


def _w_mat(w):
    """(3,3,Cin,Cout) HWIO weights -> (Cout, 9*Cin), tap-major order."""
    cout = w.shape[-1]
    return jnp.transpose(w, (3, 0, 1, 2)).reshape(cout, -1)


# ----------------------------------------------------------------------------
# Parameter construction (deterministic, synthetic; BN folded at init).
# ----------------------------------------------------------------------------
def _init_conv_params(key, cin, cout, bn):
    kw, kg, kb, km, kv, kbias = jax.random.split(key, 6)
    w = jax.random.normal(kw, (3, 3, cin, cout), jnp.float32) / jnp.sqrt(9.0 * cin)
    if bn:
        gamma = 1.0 + 0.1 * jax.random.normal(kg, (cout,), jnp.float32)
        beta = 0.1 * jax.random.normal(kb, (cout,), jnp.float32)
        mean = 0.1 * jax.random.normal(km, (cout,), jnp.float32)
        var = jnp.abs(jax.random.normal(kv, (cout,), jnp.float32)) + 0.5
        scale = gamma / jnp.sqrt(var + 1e-5)
        bias = beta - mean * scale
    else:
        scale = jnp.ones((cout,), jnp.float32)               # no BN -> scale 1
        bias = 0.1 * jax.random.normal(kbias, (cout,), jnp.float32)  # conv bias
    return {"w": w, "scale": scale, "bias": bias, "relu": bool(bn)}


def init_simple_decoder_params(key, channel):
    keys = jax.random.split(key, 5)
    return {
        "conv1": _init_conv_params(keys[0], channel * 3, channel, bn=True),
        "conv2": _init_conv_params(keys[1], channel, channel, bn=True),
        "conv3": _init_conv_params(keys[2], channel, channel, bn=True),
        "conv4": _init_conv_params(keys[3], channel, channel, bn=True),
        "conv5": _init_conv_params(keys[4], channel, 1, bn=False),
    }


# ----------------------------------------------------------------------------
# Forward pass (NCHW in / NCHW out, matching PyTorch).
# ----------------------------------------------------------------------------
def simple_decoder_forward(params, f1, f2, f3):
    f1 = f1.astype(jnp.float32)
    f2 = f2.astype(jnp.float32)
    f3 = f3.astype(jnp.float32)

    B, C, H1, W1 = f1.shape
    _, _, H2, W2 = f2.shape
    _, _, H, W = f3.shape
    P = H * W
    channel = params["conv1"]["w"].shape[-1]

    # Batch folding: each grid step processes `bpb` images folded into the
    # lane axis.  Keep >=2 grid steps when the batch allows so both v7x
    # TensorCores get work; otherwise fold everything into one fat step.
    G = 2 if (B >= 4 and B % 2 == 0) else 1
    bpb = B // G
    L = bpb * P

    def fold(x, q):   # (B, C, q) -> (G, C, bpb*q), lane = local_b*q + pixel
        return (x.reshape(G, bpb, C, q).transpose(0, 2, 1, 3)
                 .reshape(G, C, bpb * q))

    f1_flat = fold(f1.reshape(B, C, H1 * W1), H1 * W1).astype(jnp.bfloat16)
    f2_flat = fold(f2.reshape(B, C, H2 * W2), H2 * W2).astype(jnp.bfloat16)
    f3_flat = fold(f3.reshape(B, C, P), P).astype(jnp.bfloat16)

    # Constants (folded at trace/compile time).  Block-diagonal so the
    # upsample of the lane-folded batch stays a single matmul per feature map.
    eye = jnp.eye(bpb, dtype=jnp.float32)
    u1t = jnp.kron(eye, _upsample_matrix_flat((H, W), (H1, W1)).T
                   ).astype(jnp.bfloat16)                        # (bpb*H1W1, L)
    u2t = jnp.kron(eye, _upsample_matrix_flat((H, W), (H2, W2)).T
                   ).astype(jnp.bfloat16)                        # (bpb*H2W2, L)
    masks = jnp.tile(_tap_masks(H, W), (1, bpb))                 # (9, L) f32

    p1, p5 = params["conv1"], params["conv5"]
    w1 = _w_mat(p1["w"]).astype(jnp.bfloat16)                    # (ch, 27*ch)
    s1 = p1["scale"].reshape(-1, 1)
    b1 = p1["bias"].reshape(-1, 1)
    w234 = jnp.stack([_w_mat(params[n]["w"])
                      for n in ("conv2", "conv3", "conv4")]).astype(jnp.bfloat16)
    s234 = jnp.stack([params[n]["scale"].reshape(-1, 1)
                      for n in ("conv2", "conv3", "conv4")])
    b234 = jnp.stack([params[n]["bias"].reshape(-1, 1)
                      for n in ("conv2", "conv3", "conv4")])
    w5 = _w_mat(p5["w"]).T.astype(jnp.float32)                   # (9*ch, 1) VPU
    b5 = p5["bias"].reshape(1, 1)

    flops = 2 * B * P * (C * (H1 * W1 + H2 * W2)
                         + channel * 9 * (3 * channel)
                         + 3 * channel * 9 * channel
                         + 9 * channel)
    bytes_accessed = ((f1_flat.size + f2_flat.size + f3_flat.size) * 2
                      + (B * channel * P + B * P) * 4
                      + (w1.size + w234.size + u1t.size + u2t.size) * 2
                      + (masks.size + s1.size + b1.size + s234.size
                         + b234.size + w5.size + b5.size) * 4)

    kernel = functools.partial(_decoder_kernel, W=W, L=L)
    feat_flat, out_flat = pl.pallas_call(
        kernel,
        out_shape=(jax.ShapeDtypeStruct((G, channel, L), jnp.float32),
                   jax.ShapeDtypeStruct((G, 1, L), jnp.float32)),
        grid=(G,),
        in_specs=[
            pl.BlockSpec((1,) + f1_flat.shape[1:], lambda g: (g, 0, 0)),
            pl.BlockSpec((1,) + f2_flat.shape[1:], lambda g: (g, 0, 0)),
            pl.BlockSpec((1,) + f3_flat.shape[1:], lambda g: (g, 0, 0)),
            pl.BlockSpec(u1t.shape, lambda g: (0, 0)),
            pl.BlockSpec(u2t.shape, lambda g: (0, 0)),
            pl.BlockSpec(masks.shape, lambda g: (0, 0)),
            pl.BlockSpec(w1.shape, lambda g: (0, 0)),
            pl.BlockSpec(s1.shape, lambda g: (0, 0)),
            pl.BlockSpec(b1.shape, lambda g: (0, 0)),
            pl.BlockSpec(w234.shape, lambda g: (0, 0, 0)),
            pl.BlockSpec(s234.shape, lambda g: (0, 0, 0)),
            pl.BlockSpec(b234.shape, lambda g: (0, 0, 0)),
            pl.BlockSpec(w5.shape, lambda g: (0, 0)),
            pl.BlockSpec(b5.shape, lambda g: (0, 0)),
        ],
        out_specs=(pl.BlockSpec((1, channel, L), lambda g: (g, 0, 0)),
                   pl.BlockSpec((1, 1, L), lambda g: (g, 0, 0))),
        compiler_params=pltpu.CompilerParams(
            dimension_semantics=("parallel",)),
        cost_estimate=pl.CostEstimate(flops=int(flops), transcendentals=0,
                                      bytes_accessed=int(bytes_accessed)),
    )(f1_flat, f2_flat, f3_flat, u1t, u2t, masks,
      w1, s1, b1, w234, s234, b234, w5, b5)

    def unfold(y, cout):   # (G, cout, bpb*P) -> (B, cout, H, W)
        return (y.reshape(G, cout, bpb, P).transpose(0, 2, 1, 3)
                 .reshape(B, cout, H, W))

    return unfold(feat_flat, channel), unfold(out_flat, 1)


# ----------------------------------------------------------------------------
# Pure-JAX reference (lax conv, NCHW, f32) for a correctness check.
# ----------------------------------------------------------------------------
def _ref_upsample(x_nchw, out_hw):
    _, _, Hin, Win = x_nchw.shape
    Ah = _interp_matrix(out_hw[0], Hin)
    Aw = _interp_matrix(out_hw[1], Win)
    return jnp.einsum("oh,bchw,pw->bcop", Ah, x_nchw, Aw)


def _ref_conv3x3(x_nchw, w, scale, bias, relu):
    y = jax.lax.conv_general_dilated(
        x_nchw, w, window_strides=(1, 1), padding="SAME",
        dimension_numbers=("NCHW", "HWIO", "NCHW"))
    y = y * scale.reshape(1, -1, 1, 1) + bias.reshape(1, -1, 1, 1)
    return jnp.maximum(y, 0.0) if relu else y


def simple_decoder_forward_ref(params, f1, f2, f3):
    f1 = f1.astype(jnp.float32)
    f2 = f2.astype(jnp.float32)
    f3 = f3.astype(jnp.float32)
    out_hw = f3.shape[-2:]
    f1 = _ref_upsample(f1, out_hw)
    f2 = _ref_upsample(f2, out_hw)
    x = jnp.concatenate([f1, f2, f3], axis=1)
    for name in ("conv1", "conv2", "conv3", "conv4"):
        p = params[name]
        x = _ref_conv3x3(x, p["w"], p["scale"], p["bias"], p["relu"])
    p = params["conv5"]
    out = _ref_conv3x3(x, p["w"], p["scale"], p["bias"], p["relu"])
    return x, out


if __name__ == "__main__":
    key = jax.random.PRNGKey(0)
    k1, k2, k3, kp = jax.random.split(key, 4)

    channel = 4
    B = 2
    f1 = jax.random.normal(k1, (B, channel, 4, 4), jnp.float32)    # deepest feature
    f2 = jax.random.normal(k2, (B, channel, 8, 8), jnp.float32)
    f3 = jax.random.normal(k3, (B, channel, 16, 16), jnp.float32)  # target size

    params = init_simple_decoder_params(kp, channel)

    fwd = jax.jit(functools.partial(simple_decoder_forward, params))
    feat, out = fwd(f1, f2, f3)
    jax.block_until_ready((feat, out))

    feat_ref, out_ref = simple_decoder_forward_ref(params, f1, f2, f3)
    assert feat.shape == (B, channel, 16, 16) and out.shape == (B, 1, 16, 16)
    # bf16 MXU operands -> looser tolerance than a pure-f32 kernel.
    assert jnp.allclose(feat, feat_ref, atol=5e-2, rtol=5e-2), float(
        jnp.max(jnp.abs(feat - feat_ref)))
    assert jnp.allclose(out, out_ref, atol=5e-2, rtol=5e-2), float(
        jnp.max(jnp.abs(out - out_ref)))

    print("KERNEL_OK")
</pallas_src>

<mosaic_0001>
module attributes {stable_mosaic.version = 11 : i64} {
  func.func private @main(%arg0: i32) attributes {dimension_semantics = [#tpu.dimension_semantics<core_parallel>], iteration_bounds = array<i64: 2>, tpu.core_type = #tpu.core_type<sc_scalar_subcore>, window_params = []} {
    return
  }
}

module attributes {stable_mosaic.version = 11 : i64} {
  func.func private @main(%arg0: i32) attributes {dimension_semantics = [#tpu.dimension_semantics<core_parallel>], iteration_bounds = array<i64: 2>, tpu.core_type = #tpu.core_type<sc_scalar_subcore>, window_params = []} {
    return
  }
}

module attributes {stable_mosaic.version = 11 : i64} {
  func.func @_decoder_kernel(%arg0: i32, %arg1: memref<1x4x32xbf16, #tpu.memory_space<vmem>>, %arg2: memref<1x4x128xbf16, #tpu.memory_space<vmem>>, %arg3: memref<1x4x512xbf16, #tpu.memory_space<vmem>>, %arg4: memref<32x512xbf16, #tpu.memory_space<vmem>>, %arg5: memref<128x512xbf16, #tpu.memory_space<vmem>>, %arg6: memref<9x512xf32, #tpu.memory_space<vmem>>, %arg7: memref<4x108xbf16, #tpu.memory_space<vmem>>, %arg8: memref<4x1xf32, #tpu.memory_space<vmem>>, %arg9: memref<4x1xf32, #tpu.memory_space<vmem>>, %arg10: memref<3x4x36xbf16, #tpu.memory_space<vmem>>, %arg11: memref<3x4x1xf32, #tpu.memory_space<vmem>>, %arg12: memref<3x4x1xf32, #tpu.memory_space<vmem>>, %arg13: memref<36x1xf32, #tpu.memory_space<vmem>>, %arg14: memref<1x1xf32, #tpu.memory_space<vmem>>, %arg15: memref<1x4x512xf32, #tpu.memory_space<vmem>>, %arg16: memref<1x1x512xf32, #tpu.memory_space<vmem>>) attributes {dimension_semantics = [#tpu.dimension_semantics<parallel>], iteration_bounds = array<i64: 1>, scalar_prefetch = 0 : i64, scratch_operands = 0 : i64, tpu.core_type = #tpu.core_type<tc>, window_params = [{transform_indices = @transform_0, window_bounds = array<i64: 1, 4, 32>}, {transform_indices = @transform_1, window_bounds = array<i64: 1, 4, 128>}, {transform_indices = @transform_2, window_bounds = array<i64: 1, 4, 512>}, {pipeline_mode = #tpu.pipeline_mode<synchronous>, transform_indices = @transform_3, window_bounds = array<i64: 32, 512>}, {pipeline_mode = #tpu.pipeline_mode<synchronous>, transform_indices = @transform_4, window_bounds = array<i64: 128, 512>}, {pipeline_mode = #tpu.pipeline_mode<synchronous>, transform_indices = @transform_5, window_bounds = array<i64: 9, 512>}, {pipeline_mode = #tpu.pipeline_mode<synchronous>, transform_indices = @transform_6, window_bounds = array<i64: 4, 108>}, {pipeline_mode = #tpu.pipeline_mode<synchronous>, transform_indices = @transform_7, window_bounds = array<i64: 4, 1>}, {pipeline_mode = #tpu.pipeline_mode<synchronous>, transform_indices = @transform_8, window_bounds = array<i64: 4, 1>}, {pipeline_mode = #tpu.pipeline_mode<synchronous>, transform_indices = @transform_9, window_bounds = array<i64: 3, 4, 36>}, {pipeline_mode = #tpu.pipeline_mode<synchronous>, transform_indices = @transform_10, window_bounds = array<i64: 3, 4, 1>}, {pipeline_mode = #tpu.pipeline_mode<synchronous>, transform_indices = @transform_11, window_bounds = array<i64: 3, 4, 1>}, {pipeline_mode = #tpu.pipeline_mode<synchronous>, transform_indices = @transform_12, window_bounds = array<i64: 36, 1>}, {pipeline_mode = #tpu.pipeline_mode<synchronous>, transform_indices = @transform_13, window_bounds = array<i64: 1, 1>}, {transform_indices = @transform_14, window_bounds = array<i64: 1, 4, 512>}, {transform_indices = @transform_15, window_bounds = array<i64: 1, 1, 512>}]} {
    %c0 = arith.constant 0 : index
    %c0_0 = arith.constant 0 : index
    %0 = vector.load %arg6[%c0, %c0_0] : memref<9x512xf32, #tpu.memory_space<vmem>>, vector<9x512xf32>
    %c0_1 = arith.constant 0 : index
    %c0_2 = arith.constant 0 : index
    %c0_3 = arith.constant 0 : index
    %1 = vector.load %arg1[%c0_1, %c0_2, %c0_3] : memref<1x4x32xbf16, #tpu.memory_space<vmem>>, vector<1x4x32xbf16>
    %2 = vector.shape_cast %1 : vector<1x4x32xbf16> to vector<4x32xbf16>
    %c0_4 = arith.constant 0 : index
    %c0_5 = arith.constant 0 : index
    %3 = vector.load %arg4[%c0_4, %c0_5] : memref<32x512xbf16, #tpu.memory_space<vmem>>, vector<32x512xbf16>
    %cst = arith.constant dense<0.000000e+00> : vector<4x512xf32>
    %4 = tpu.matmul %2, %3, %cst {dimension_numbers = #tpu.dot_dimension_numbers<[1], [0], [0], [1], [0, 0, 1, 1], [], []>} : vector<4x32xbf16>, vector<32x512xbf16>, vector<4x512xf32> -> vector<4x512xf32>
    %c0_6 = arith.constant 0 : index
    %c0_7 = arith.constant 0 : index
    %c0_8 = arith.constant 0 : index
    %5 = vector.load %arg2[%c0_6, %c0_7, %c0_8] : memref<1x4x128xbf16, #tpu.memory_space<vmem>>, vector<1x4x128xbf16>
    %6 = vector.shape_cast %5 : vector<1x4x128xbf16> to vector<4x128xbf16>
    %c0_9 = arith.constant 0 : index
    %c0_10 = arith.constant 0 : index
    %7 = vector.load %arg5[%c0_9, %c0_10] : memref<128x512xbf16, #tpu.memory_space<vmem>>, vector<128x512xbf16>
    %cst_11 = arith.constant dense<0.000000e+00> : vector<4x512xf32>
    %8 = tpu.matmul %6, %7, %cst_11 {dimension_numbers = #tpu.dot_dimension_numbers<[1], [0], [0], [1], [0, 0, 1, 1], [], []>} : vector<4x128xbf16>, vector<128x512xbf16>, vector<4x512xf32> -> vector<4x512xf32>
    %c0_12 = arith.constant 0 : index
    %c0_13 = arith.constant 0 : index
    %c0_14 = arith.constant 0 : index
    %9 = vector.load %arg3[%c0_12, %c0_13, %c0_14] : memref<1x4x512xbf16, #tpu.memory_space<vmem>>, vector<1x4x512xbf16>
    %10 = vector.shape_cast %9 : vector<1x4x512xbf16> to vector<4x512xbf16>
    %11 = arith.extf %10 : vector<4x512xbf16> to vector<4x512xf32>
    %12 = tpu.concatenate %4, %8, %11 in 0 : vector<4x512xf32>, vector<4x512xf32>, vector<4x512xf32> -> vector<12x512xf32>
    %c0_15 = arith.constant 0 : index
    %c0_16 = arith.constant 0 : index
    %13 = vector.load %arg7[%c0_15, %c0_16] : memref<4x108xbf16, #tpu.memory_space<vmem>>, vector<4x108xbf16>
    %c0_17 = arith.constant 0 : index
    %c0_18 = arith.constant 0 : index
    %14 = vector.load %arg8[%c0_17, %c0_18] : memref<4x1xf32, #tpu.memory_space<vmem>>, vector<4x1xf32>
    %c0_19 = arith.constant 0 : index
    %c0_20 = arith.constant 0 : index
    %15 = vector.load %arg9[%c0_19, %c0_20] : memref<4x1xf32, #tpu.memory_space<vmem>>, vector<4x1xf32>
    %c17_i32 = arith.constant 17 : i32
    %16 = tpu.dynamic_rotate %12 by %c17_i32 dim 1 : vector<12x512xf32>, i32 -> vector<12x512xf32>
    %17 = vector.extract_strided_slice %0 {offsets = [0, 0], sizes = [1, 512], strides = [1, 1]} : vector<9x512xf32> to vector<1x512xf32>
    %18 = vector.broadcast %17 : vector<1x512xf32> to vector<12x512xf32>
    %19 = arith.mulf %16, %18 : vector<12x512xf32>
    %c16_i32 = arith.constant 16 : i32
    %20 = tpu.dynamic_rotate %12 by %c16_i32 dim 1 : vector<12x512xf32>, i32 -> vector<12x512xf32>
    %21 = vector.extract_strided_slice %0 {offsets = [1, 0], sizes = [1, 512], strides = [1, 1]} : vector<9x512xf32> to vector<1x512xf32>
    %22 = vector.broadcast %21 : vector<1x512xf32> to vector<12x512xf32>
    %23 = arith.mulf %20, %22 : vector<12x512xf32>
    %c15_i32 = arith.constant 15 : i32
    %24 = tpu.dynamic_rotate %12 by %c15_i32 dim 1 : vector<12x512xf32>, i32 -> vector<12x512xf32>
    %25 = vector.extract_strided_slice %0 {offsets = [2, 0], sizes = [1, 512], strides = [1, 1]} : vector<9x512xf32> to vector<1x512xf32>
    %26 = vector.broadcast %25 : vector<1x512xf32> to vector<12x512xf32>
    %27 = arith.mulf %24, %26 : vector<12x512xf32>
    %c1_i32 = arith.constant 1 : i32
    %28 = tpu.dynamic_rotate %12 by %c1_i32 dim 1 : vector<12x512xf32>, i32 -> vector<12x512xf32>
    %29 = vector.extract_strided_slice %0 {offsets = [3, 0], sizes = [1, 512], strides = [1, 1]} : vector<9x512xf32> to vector<1x512xf32>
    %30 = vector.broadcast %29 : vector<1x512xf32> to vector<12x512xf32>
    %31 = arith.mulf %28, %30 : vector<12x512xf32>
    %c511_i32 = arith.constant 511 : i32
    %32 = tpu.dynamic_rotate %12 by %c511_i32 dim 1 : vector<12x512xf32>, i32 -> vector<12x512xf32>
    %33 = vector.extract_strided_slice %0 {offsets = [5, 0], sizes = [1, 512], strides = [1, 1]} : vector<9x512xf32> to vector<1x512xf32>
    %34 = vector.broadcast %33 : vector<1x512xf32> to vector<12x512xf32>
    %35 = arith.mulf %32, %34 : vector<12x512xf32>
    %c497_i32 = arith.constant 497 : i32
    %36 = tpu.dynamic_rotate %12 by %c497_i32 dim 1 : vector<12x512xf32>, i32 -> vector<12x512xf32>
    %37 = vector.extract_strided_slice %0 {offsets = [6, 0], sizes = [1, 512], strides = [1, 1]} : vector<9x512xf32> to vector<1x512xf32>
    %38 = vector.broadcast %37 : vector<1x512xf32> to vector<12x512xf32>
    %39 = arith.mulf %36, %38 : vector<12x512xf32>
    %c496_i32 = arith.constant 496 : i32
    %40 = tpu.dynamic_rotate %12 by %c496_i32 dim 1 : vector<12x512xf32>, i32 -> vector<12x512xf32>
    %41 = vector.extract_strided_slice %0 {offsets = [7, 0], sizes = [1, 512], strides = [1, 1]} : vector<9x512xf32> to vector<1x512xf32>
    %42 = vector.broadcast %41 : vector<1x512xf32> to vector<12x512xf32>
    %43 = arith.mulf %40, %42 : vector<12x512xf32>
    %c495_i32 = arith.constant 495 : i32
    %44 = tpu.dynamic_rotate %12 by %c495_i32 dim 1 : vector<12x512xf32>, i32 -> vector<12x512xf32>
    %45 = vector.extract_strided_slice %0 {offsets = [8, 0], sizes = [1, 512], strides = [1, 1]} : vector<9x512xf32> to vector<1x512xf32>
    %46 = vector.broadcast %45 : vector<1x512xf32> to vector<12x512xf32>
    %47 = arith.mulf %44, %46 : vector<12x512xf32>
    %48 = tpu.concatenate %19, %23, %27, %31, %12, %35, %39, %43, %47 in 0 : vector<12x512xf32>, vector<12x512xf32>, vector<12x512xf32>, vector<12x512xf32>, vector<12x512xf32>, vector<12x512xf32>, vector<12x512xf32>, vector<12x512xf32>, vector<12x512xf32> -> vector<108x512xf32>
    %49 = arith.truncf %48 : vector<108x512xf32> to vector<108x512xbf16>
    %cst_21 = arith.constant dense<0.000000e+00> : vector<4x512xf32>
    %50 = tpu.matmul %13, %49, %cst_21 {dimension_numbers = #tpu.dot_dimension_numbers<[1], [0], [0], [1], [0, 0, 1, 1], [], []>} : vector<4x108xbf16>, vector<108x512xbf16>, vector<4x512xf32> -> vector<4x512xf32>
    %51 = vector.broadcast %14 : vector<4x1xf32> to vector<4x512xf32>
    %52 = arith.mulf %50, %51 : vector<4x512xf32>
    %53 = vector.broadcast %15 : vector<4x1xf32> to vector<4x512xf32>
    %54 = arith.addf %52, %53 : vector<4x512xf32>
    %cst_22 = arith.constant 0.000000e+00 : f32
    %55 = vector.broadcast %cst_22 : f32 to vector<4x512xf32>
    %56 = arith.maximumf %54, %55 : vector<4x512xf32>
    %c0_23 = arith.constant 0 : index
    %c0_24 = arith.constant 0 : index
    %c0_25 = arith.constant 0 : index
    %57 = vector.load %arg10[%c0_23, %c0_24, %c0_25] : memref<3x4x36xbf16, #tpu.memory_space<vmem>>, vector<1x4x36xbf16>
    %58 = vector.shape_cast %57 : vector<1x4x36xbf16> to vector<4x36xbf16>
    %c0_26 = arith.constant 0 : index
    %c0_27 = arith.constant 0 : index
    %c0_28 = arith.constant 0 : index
    %59 = vector.load %arg11[%c0_26, %c0_27, %c0_28] : memref<3x4x1xf32, #tpu.memory_space<vmem>>, vector<1x4x1xf32>
    %60 = vector.shape_cast %59 : vector<1x4x1xf32> to vector<4x1xf32>
    %c0_29 = arith.constant 0 : index
    %c0_30 = arith.constant 0 : index
    %c0_31 = arith.constant 0 : index
    %61 = vector.load %arg12[%c0_29, %c0_30, %c0_31] : memref<3x4x1xf32, #tpu.memory_space<vmem>>, vector<1x4x1xf32>
    %62 = vector.shape_cast %61 : vector<1x4x1xf32> to vector<4x1xf32>
    %c17_i32_32 = arith.constant 17 : i32
    %63 = tpu.dynamic_rotate %56 by %c17_i32_32 dim 1 : vector<4x512xf32>, i32 -> vector<4x512xf32>
    %64 = vector.extract_strided_slice %0 {offsets = [0, 0], sizes = [1, 512], strides = [1, 1]} : vector<9x512xf32> to vector<1x512xf32>
    %65 = vector.broadcast %64 : vector<1x512xf32> to vector<4x512xf32>
    %66 = arith.mulf %63, %65 : vector<4x512xf32>
    %c16_i32_33 = arith.constant 16 : i32
    %67 = tpu.dynamic_rotate %56 by %c16_i32_33 dim 1 : vector<4x512xf32>, i32 -> vector<4x512xf32>
    %68 = vector.extract_strided_slice %0 {offsets = [1, 0], sizes = [1, 512], strides = [1, 1]} : vector<9x512xf32> to vector<1x512xf32>
    %69 = vector.broadcast %68 : vector<1x512xf32> to vector<4x512xf32>
    %70 = arith.mulf %67, %69 : vector<4x512xf32>
    %c15_i32_34 = arith.constant 15 : i32
    %71 = tpu.dynamic_rotate %56 by %c15_i32_34 dim 1 : vector<4x512xf32>, i32 -> vector<4x512xf32>
    %72 = vector.extract_strided_slice %0 {offsets = [2, 0], sizes = [1, 512], strides = [1, 1]} : vector<9x512xf32> to vector<1x512xf32>
    %73 = vector.broadcast %72 : vector<1x512xf32> to vector<4x512xf32>
    %74 = arith.mulf %71, %73 : vector<4x512xf32>
    %c1_i32_35 = arith.constant 1 : i32
    %75 = tpu.dynamic_rotate %56 by %c1_i32_35 dim 1 : vector<4x512xf32>, i32 -> vector<4x512xf32>
    %76 = vector.extract_strided_slice %0 {offsets = [3, 0], sizes = [1, 512], strides = [1, 1]} : vector<9x512xf32> to vector<1x512xf32>
    %77 = vector.broadcast %76 : vector<1x512xf32> to vector<4x512xf32>
    %78 = arith.mulf %75, %77 : vector<4x512xf32>
    %c511_i32_36 = arith.constant 511 : i32
    %79 = tpu.dynamic_rotate %56 by %c511_i32_36 dim 1 : vector<4x512xf32>, i32 -> vector<4x512xf32>
    %80 = vector.extract_strided_slice %0 {offsets = [5, 0], sizes = [1, 512], strides = [1, 1]} : vector<9x512xf32> to vector<1x512xf32>
    %81 = vector.broadcast %80 : vector<1x512xf32> to vector<4x512xf32>
    %82 = arith.mulf %79, %81 : vector<4x512xf32>
    %c497_i32_37 = arith.constant 497 : i32
    %83 = tpu.dynamic_rotate %56 by %c497_i32_37 dim 1 : vector<4x512xf32>, i32 -> vector<4x512xf32>
    %84 = vector.extract_strided_slice %0 {offsets = [6, 0], sizes = [1, 512], strides = [1, 1]} : vector<9x512xf32> to vector<1x512xf32>
    %85 = vector.broadcast %84 : vector<1x512xf32> to vector<4x512xf32>
    %86 = arith.mulf %83, %85 : vector<4x512xf32>
    %c496_i32_38 = arith.constant 496 : i32
    %87 = tpu.dynamic_rotate %56 by %c496_i32_38 dim 1 : vector<4x512xf32>, i32 -> vector<4x512xf32>
    %88 = vector.extract_strided_slice %0 {offsets = [7, 0], sizes = [1, 512], strides = [1, 1]} : vector<9x512xf32> to vector<1x512xf32>
    %89 = vector.broadcast %88 : vector<1x512xf32> to vector<4x512xf32>
    %90 = arith.mulf %87, %89 : vector<4x512xf32>
    %c495_i32_39 = arith.constant 495 : i32
    %91 = tpu.dynamic_rotate %56 by %c495_i32_39 dim 1 : vector<4x512xf32>, i32 -> vector<4x512xf32>
    %92 = vector.extract_strided_slice %0 {offsets = [8, 0], sizes = [1, 512], strides = [1, 1]} : vector<9x512xf32> to vector<1x512xf32>
    %93 = vector.broadcast %92 : vector<1x512xf32> to vector<4x512xf32>
    %94 = arith.mulf %91, %93 : vector<4x512xf32>
    %95 = tpu.concatenate %66, %70, %74, %78, %56, %82, %86, %90, %94 in 0 : vector<4x512xf32>, vector<4x512xf32>, vector<4x512xf32>, vector<4x512xf32>, vector<4x512xf32>, vector<4x512xf32>, vector<4x512xf32>, vector<4x512xf32>, vector<4x512xf32> -> vector<36x512xf32>
    %96 = arith.truncf %95 : vector<36x512xf32> to vector<36x512xbf16>
    %cst_40 = arith.constant dense<0.000000e+00> : vector<4x512xf32>
    %97 = tpu.matmul %58, %96, %cst_40 {dimension_numbers = #tpu.dot_dimension_numbers<[1], [0], [0], [1], [0, 0, 1, 1], [], []>} : vector<4x36xbf16>, vector<36x512xbf16>, vector<4x512xf32> -> vector<4x512xf32>
    %98 = vector.broadcast %60 : vector<4x1xf32> to vector<4x512xf32>
    %99 = arith.mulf %97, %98 : vector<4x512xf32>
    %100 = vector.broadcast %62 : vector<4x1xf32> to vector<4x512xf32>
    %101 = arith.addf %99, %100 : vector<4x512xf32>
    %cst_41 = arith.constant 0.000000e+00 : f32
    %102 = vector.broadcast %cst_41 : f32 to vector<4x512xf32>
    %103 = arith.maximumf %101, %102 : vector<4x512xf32>
    %c1 = arith.constant 1 : index
    %c0_42 = arith.constant 0 : index
    %c0_43 = arith.constant 0 : index
    %104 = vector.load %arg10[%c1, %c0_42, %c0_43] : memref<3x4x36xbf16, #tpu.memory_space<vmem>>, vector<1x4x36xbf16>
    %105 = vector.shape_cast %104 : vector<1x4x36xbf16> to vector<4x36xbf16>
    %c1_44 = arith.constant 1 : index
    %c0_45 = arith.constant 0 : index
    %c0_46 = arith.constant 0 : index
    %106 = vector.load %arg11[%c1_44, %c0_45, %c0_46] : memref<3x4x1xf32, #tpu.memory_space<vmem>>, vector<1x4x1xf32>
    %107 = vector.shape_cast %106 : vector<1x4x1xf32> to vector<4x1xf32>
    %c1_47 = arith.constant 1 : index
    %c0_48 = arith.constant 0 : index
    %c0_49 = arith.constant 0 : index
    %108 = vector.load %arg12[%c1_47, %c0_48, %c0_49] : memref<3x4x1xf32, #tpu.memory_space<vmem>>, vector<1x4x1xf32>
    %109 = vector.shape_cast %108 : vector<1x4x1xf32> to vector<4x1xf32>
    %c17_i32_50 = arith.constant 17 : i32
    %110 = tpu.dynamic_rotate %103 by %c17_i32_50 dim 1 : vector<4x512xf32>, i32 -> vector<4x512xf32>
    %111 = vector.extract_strided_slice %0 {offsets = [0, 0], sizes = [1, 512], strides = [1, 1]} : vector<9x512xf32> to vector<1x512xf32>
    %112 = vector.broadcast %111 : vector<1x512xf32> to vector<4x512xf32>
    %113 = arith.mulf %110, %112 : vector<4x512xf32>
    %c16_i32_51 = arith.constant 16 : i32
    %114 = tpu.dynamic_rotate %103 by %c16_i32_51 dim 1 : vector<4x512xf32>, i32 -> vector<4x512xf32>
    %115 = vector.extract_strided_slice %0 {offsets = [1, 0], sizes = [1, 512], strides = [1, 1]} : vector<9x512xf32> to vector<1x512xf32>
    %116 = vector.broadcast %115 : vector<1x512xf32> to vector<4x512xf32>
    %117 = arith.mulf %114, %116 : vector<4x512xf32>
    %c15_i32_52 = arith.constant 15 : i32
    %118 = tpu.dynamic_rotate %103 by %c15_i32_52 dim 1 : vector<4x512xf32>, i32 -> vector<4x512xf32>
    %119 = vector.extract_strided_slice %0 {offsets = [2, 0], sizes = [1, 512], strides = [1, 1]} : vector<9x512xf32> to vector<1x512xf32>
    %120 = vector.broadcast %119 : vector<1x512xf32> to vector<4x512xf32>
    %121 = arith.mulf %118, %120 : vector<4x512xf32>
    %c1_i32_53 = arith.constant 1 : i32
    %122 = tpu.dynamic_rotate %103 by %c1_i32_53 dim 1 : vector<4x512xf32>, i32 -> vector<4x512xf32>
    %123 = vector.extract_strided_slice %0 {offsets = [3, 0], sizes = [1, 512], strides = [1, 1]} : vector<9x512xf32> to vector<1x512xf32>
    %124 = vector.broadcast %123 : vector<1x512xf32> to vector<4x512xf32>
    %125 = arith.mulf %122, %124 : vector<4x512xf32>
    %c511_i32_54 = arith.constant 511 : i32
    %126 = tpu.dynamic_rotate %103 by %c511_i32_54 dim 1 : vector<4x512xf32>, i32 -> vector<4x512xf32>
    %127 = vector.extract_strided_slice %0 {offsets = [5, 0], sizes = [1, 512], strides = [1, 1]} : vector<9x512xf32> to vector<1x512xf32>
    %128 = vector.broadcast %127 : vector<1x512xf32> to vector<4x512xf32>
    %129 = arith.mulf %126, %128 : vector<4x512xf32>
    %c497_i32_55 = arith.constant 497 : i32
    %130 = tpu.dynamic_rotate %103 by %c497_i32_55 dim 1 : vector<4x512xf32>, i32 -> vector<4x512xf32>
    %131 = vector.extract_strided_slice %0 {offsets = [6, 0], sizes = [1, 512], strides = [1, 1]} : vector<9x512xf32> to vector<1x512xf32>
    %132 = vector.broadcast %131 : vector<1x512xf32> to vector<4x512xf32>
    %133 = arith.mulf %130, %132 : vector<4x512xf32>
    %c496_i32_56 = arith.constant 496 : i32
    %134 = tpu.dynamic_rotate %103 by %c496_i32_56 dim 1 : vector<4x512xf32>, i32 -> vector<4x512xf32>
    %135 = vector.extract_strided_slice %0 {offsets = [7, 0], sizes = [1, 512], strides = [1, 1]} : vector<9x512xf32> to vector<1x512xf32>
    %136 = vector.broadcast %135 : vector<1x512xf32> to vector<4x512xf32>
    %137 = arith.mulf %134, %136 : vector<4x512xf32>
    %c495_i32_57 = arith.constant 495 : i32
    %138 = tpu.dynamic_rotate %103 by %c495_i32_57 dim 1 : vector<4x512xf32>, i32 -> vector<4x512xf32>
    %139 = vector.extract_strided_slice %0 {offsets = [8, 0], sizes = [1, 512], strides = [1, 1]} : vector<9x512xf32> to vector<1x512xf32>
    %140 = vector.broadcast %139 : vector<1x512xf32> to vector<4x512xf32>
    %141 = arith.mulf %138, %140 : vector<4x512xf32>
    %142 = tpu.concatenate %113, %117, %121, %125, %103, %129, %133, %137, %141 in 0 : vector<4x512xf32>, vector<4x512xf32>, vector<4x512xf32>, vector<4x512xf32>, vector<4x512xf32>, vector<4x512xf32>, vector<4x512xf32>, vector<4x512xf32>, vector<4x512xf32> -> vector<36x512xf32>
    %143 = arith.truncf %142 : vector<36x512xf32> to vector<36x512xbf16>
    %cst_58 = arith.constant dense<0.000000e+00> : vector<4x512xf32>
    %144 = tpu.matmul %105, %143, %cst_58 {dimension_numbers = #tpu.dot_dimension_numbers<[1], [0], [0], [1], [0, 0, 1, 1], [], []>} : vector<4x36xbf16>, vector<36x512xbf16>, vector<4x512xf32> -> vector<4x512xf32>
    %145 = vector.broadcast %107 : vector<4x1xf32> to vector<4x512xf32>
    %146 = arith.mulf %144, %145 : vector<4x512xf32>
    %147 = vector.broadcast %109 : vector<4x1xf32> to vector<4x512xf32>
    %148 = arith.addf %146, %147 : vector<4x512xf32>
    %cst_59 = arith.constant 0.000000e+00 : f32
    %149 = vector.broadcast %cst_59 : f32 to vector<4x512xf32>
    %150 = arith.maximumf %148, %149 : vector<4x512xf32>
    %c2 = arith.constant 2 : index
    %c0_60 = arith.constant 0 : index
    %c0_61 = arith.constant 0 : index
    %151 = vector.load %arg10[%c2, %c0_60, %c0_61] : memref<3x4x36xbf16, #tpu.memory_space<vmem>>, vector<1x4x36xbf16>
    %152 = vector.shape_cast %151 : vector<1x4x36xbf16> to vector<4x36xbf16>
    %c2_62 = arith.constant 2 : index
    %c0_63 = arith.constant 0 : index
    %c0_64 = arith.constant 0 : index
    %153 = vector.load %arg11[%c2_62, %c0_63, %c0_64] : memref<3x4x1xf32, #tpu.memory_space<vmem>>, vector<1x4x1xf32>
    %154 = vector.shape_cast %153 : vector<1x4x1xf32> to vector<4x1xf32>
    %c2_65 = arith.constant 2 : index
    %c0_66 = arith.constant 0 : index
    %c0_67 = arith.constant 0 : index
    %155 = vector.load %arg12[%c2_65, %c0_66, %c0_67] : memref<3x4x1xf32, #tpu.memory_space<vmem>>, vector<1x4x1xf32>
    %156 = vector.shape_cast %155 : vector<1x4x1xf32> to vector<4x1xf32>
    %c17_i32_68 = arith.constant 17 : i32
    %157 = tpu.dynamic_rotate %150 by %c17_i32_68 dim 1 : vector<4x512xf32>, i32 -> vector<4x512xf32>
    %158 = vector.extract_strided_slice %0 {offsets = [0, 0], sizes = [1, 512], strides = [1, 1]} : vector<9x512xf32> to vector<1x512xf32>
    %159 = vector.broadcast %158 : vector<1x512xf32> to vector<4x512xf32>
    %160 = arith.mulf %157, %159 : vector<4x512xf32>
    %c16_i32_69 = arith.constant 16 : i32
    %161 = tpu.dynamic_rotate %150 by %c16_i32_69 dim 1 : vector<4x512xf32>, i32 -> vector<4x512xf32>
    %162 = vector.extract_strided_slice %0 {offsets = [1, 0], sizes = [1, 512], strides = [1, 1]} : vector<9x512xf32> to vector<1x512xf32>
    %163 = vector.broadcast %162 : vector<1x512xf32> to vector<4x512xf32>
    %164 = arith.mulf %161, %163 : vector<4x512xf32>
    %c15_i32_70 = arith.constant 15 : i32
    %165 = tpu.dynamic_rotate %150 by %c15_i32_70 dim 1 : vector<4x512xf32>, i32 -> vector<4x512xf32>
    %166 = vector.extract_strided_slice %0 {offsets = [2, 0], sizes = [1, 512], strides = [1, 1]} : vector<9x512xf32> to vector<1x512xf32>
    %167 = vector.broadcast %166 : vector<1x512xf32> to vector<4x512xf32>
    %168 = arith.mulf %165, %167 : vector<4x512xf32>
    %c1_i32_71 = arith.constant 1 : i32
    %169 = tpu.dynamic_rotate %150 by %c1_i32_71 dim 1 : vector<4x512xf32>, i32 -> vector<4x512xf32>
    %170 = vector.extract_strided_slice %0 {offsets = [3, 0], sizes = [1, 512], strides = [1, 1]} : vector<9x512xf32> to vector<1x512xf32>
    %171 = vector.broadcast %170 : vector<1x512xf32> to vector<4x512xf32>
    %172 = arith.mulf %169, %171 : vector<4x512xf32>
    %c511_i32_72 = arith.constant 511 : i32
    %173 = tpu.dynamic_rotate %150 by %c511_i32_72 dim 1 : vector<4x512xf32>, i32 -> vector<4x512xf32>
    %174 = vector.extract_strided_slice %0 {offsets = [5, 0], sizes = [1, 512], strides = [1, 1]} : vector<9x512xf32> to vector<1x512xf32>
    %175 = vector.broadcast %174 : vector<1x512xf32> to vector<4x512xf32>
    %176 = arith.mulf %173, %175 : vector<4x512xf32>
    %c497_i32_73 = arith.constant 497 : i32
    %177 = tpu.dynamic_rotate %150 by %c497_i32_73 dim 1 : vector<4x512xf32>, i32 -> vector<4x512xf32>
    %178 = vector.extract_strided_slice %0 {offsets = [6, 0], sizes = [1, 512], strides = [1, 1]} : vector<9x512xf32> to vector<1x512xf32>
    %179 = vector.broadcast %178 : vector<1x512xf32> to vector<4x512xf32>
    %180 = arith.mulf %177, %179 : vector<4x512xf32>
    %c496_i32_74 = arith.constant 496 : i32
    %181 = tpu.dynamic_rotate %150 by %c496_i32_74 dim 1 : vector<4x512xf32>, i32 -> vector<4x512xf32>
    %182 = vector.extract_strided_slice %0 {offsets = [7, 0], sizes = [1, 512], strides = [1, 1]} : vector<9x512xf32> to vector<1x512xf32>
    %183 = vector.broadcast %182 : vector<1x512xf32> to vector<4x512xf32>
    %184 = arith.mulf %181, %183 : vector<4x512xf32>
    %c495_i32_75 = arith.constant 495 : i32
    %185 = tpu.dynamic_rotate %150 by %c495_i32_75 dim 1 : vector<4x512xf32>, i32 -> vector<4x512xf32>
    %186 = vector.extract_strided_slice %0 {offsets = [8, 0], sizes = [1, 512], strides = [1, 1]} : vector<9x512xf32> to vector<1x512xf32>
    %187 = vector.broadcast %186 : vector<1x512xf32> to vector<4x512xf32>
    %188 = arith.mulf %185, %187 : vector<4x512xf32>
    %189 = tpu.concatenate %160, %164, %168, %172, %150, %176, %180, %184, %188 in 0 : vector<4x512xf32>, vector<4x512xf32>, vector<4x512xf32>, vector<4x512xf32>, vector<4x512xf32>, vector<4x512xf32>, vector<4x512xf32>, vector<4x512xf32>, vector<4x512xf32> -> vector<36x512xf32>
    %190 = arith.truncf %189 : vector<36x512xf32> to vector<36x512xbf16>
    %cst_76 = arith.constant dense<0.000000e+00> : vector<4x512xf32>
    %191 = tpu.matmul %152, %190, %cst_76 {dimension_numbers = #tpu.dot_dimension_numbers<[1], [0], [0], [1], [0, 0, 1, 1], [], []>} : vector<4x36xbf16>, vector<36x512xbf16>, vector<4x512xf32> -> vector<4x512xf32>
    %192 = vector.broadcast %154 : vector<4x1xf32> to vector<4x512xf32>
    %193 = arith.mulf %191, %192 : vector<4x512xf32>
    %194 = vector.broadcast %156 : vector<4x1xf32> to vector<4x512xf32>
    %195 = arith.addf %193, %194 : vector<4x512xf32>
    %cst_77 = arith.constant 0.000000e+00 : f32
    %196 = vector.broadcast %cst_77 : f32 to vector<4x512xf32>
    %197 = arith.maximumf %195, %196 : vector<4x512xf32>
    %c0_78 = arith.constant 0 : index
    %c0_79 = arith.constant 0 : index
    %c0_80 = arith.constant 0 : index
    %198 = vector.load %arg15[%c0_78, %c0_79, %c0_80] : memref<1x4x512xf32, #tpu.memory_space<vmem>>, vector<1x4x512xf32>
    %199 = vector.shape_cast %198 : vector<1x4x512xf32> to vector<4x512xf32>
    %200 = vector.shape_cast %197 : vector<4x512xf32> to vector<1x4x512xf32>
    tpu.vector_store %arg15[%c0_78, %c0_79, %c0_80], %200 {strides = array<i32>} : memref<1x4x512xf32, #tpu.memory_space<vmem>>, vector<1x4x512xf32>,
    %c17_i32_81 = arith.constant 17 : i32
    %201 = tpu.dynamic_rotate %197 by %c17_i32_81 dim 1 : vector<4x512xf32>, i32 -> vector<4x512xf32>
    %202 = vector.extract_strided_slice %0 {offsets = [0, 0], sizes = [1, 512], strides = [1, 1]} : vector<9x512xf32> to vector<1x512xf32>
    %203 = vector.broadcast %202 : vector<1x512xf32> to vector<4x512xf32>
    %204 = arith.mulf %201, %203 : vector<4x512xf32>
    %c16_i32_82 = arith.constant 16 : i32
    %205 = tpu.dynamic_rotate %197 by %c16_i32_82 dim 1 : vector<4x512xf32>, i32 -> vector<4x512xf32>
    %206 = vector.extract_strided_slice %0 {offsets = [1, 0], sizes = [1, 512], strides = [1, 1]} : vector<9x512xf32> to vector<1x512xf32>
    %207 = vector.broadcast %206 : vector<1x512xf32> to vector<4x512xf32>
    %208 = arith.mulf %205, %207 : vector<4x512xf32>
    %c15_i32_83 = arith.constant 15 : i32
    %209 = tpu.dynamic_rotate %197 by %c15_i32_83 dim 1 : vector<4x512xf32>, i32 -> vector<4x512xf32>
    %210 = vector.extract_strided_slice %0 {offsets = [2, 0], sizes = [1, 512], strides = [1, 1]} : vector<9x512xf32> to vector<1x512xf32>
    %211 = vector.broadcast %210 : vector<1x512xf32> to vector<4x512xf32>
    %212 = arith.mulf %209, %211 : vector<4x512xf32>
    %c1_i32_84 = arith.constant 1 : i32
    %213 = tpu.dynamic_rotate %197 by %c1_i32_84 dim 1 : vector<4x512xf32>, i32 -> vector<4x512xf32>
    %214 = vector.extract_strided_slice %0 {offsets = [3, 0], sizes = [1, 512], strides = [1, 1]} : vector<9x512xf32> to vector<1x512xf32>
    %215 = vector.broadcast %214 : vector<1x512xf32> to vector<4x512xf32>
    %216 = arith.mulf %213, %215 : vector<4x512xf32>
    %c511_i32_85 = arith.constant 511 : i32
    %217 = tpu.dynamic_rotate %197 by %c511_i32_85 dim 1 : vector<4x512xf32>, i32 -> vector<4x512xf32>
    %218 = vector.extract_strided_slice %0 {offsets = [5, 0], sizes = [1, 512], strides = [1, 1]} : vector<9x512xf32> to vector<1x512xf32>
    %219 = vector.broadcast %218 : vector<1x512xf32> to vector<4x512xf32>
    %220 = arith.mulf %217, %219 : vector<4x512xf32>
    %c497_i32_86 = arith.constant 497 : i32
    %221 = tpu.dynamic_rotate %197 by %c497_i32_86 dim 1 : vector<4x512xf32>, i32 -> vector<4x512xf32>
    %222 = vector.extract_strided_slice %0 {offsets = [6, 0], sizes = [1, 512], strides = [1, 1]} : vector<9x512xf32> to vector<1x512xf32>
    %223 = vector.broadcast %222 : vector<1x512xf32> to vector<4x512xf32>
    %224 = arith.mulf %221, %223 : vector<4x512xf32>
    %c496_i32_87 = arith.constant 496 : i32
    %225 = tpu.dynamic_rotate %197 by %c496_i32_87 dim 1 : vector<4x512xf32>, i32 -> vector<4x512xf32>
    %226 = vector.extract_strided_slice %0 {offsets = [7, 0], sizes = [1, 512], strides = [1, 1]} : vector<9x512xf32> to vector<1x512xf32>
    %227 = vector.broadcast %226 : vector<1x512xf32> to vector<4x512xf32>
    %228 = arith.mulf %225, %227 : vector<4x512xf32>
    %c495_i32_88 = arith.constant 495 : i32
    %229 = tpu.dynamic_rotate %197 by %c495_i32_88 dim 1 : vector<4x512xf32>, i32 -> vector<4x512xf32>
    %230 = vector.extract_strided_slice %0 {offsets = [8, 0], sizes = [1, 512], strides = [1, 1]} : vector<9x512xf32> to vector<1x512xf32>
    %231 = vector.broadcast %230 : vector<1x512xf32> to vector<4x512xf32>
    %232 = arith.mulf %229, %231 : vector<4x512xf32>
    %233 = tpu.concatenate %204, %208, %212, %216, %197, %220, %224, %228, %232 in 0 : vector<4x512xf32>, vector<4x512xf32>, vector<4x512xf32>, vector<4x512xf32>, vector<4x512xf32>, vector<4x512xf32>, vector<4x512xf32>, vector<4x512xf32>, vector<4x512xf32> -> vector<36x512xf32>
    %c0_89 = arith.constant 0 : index
    %c0_90 = arith.constant 0 : index
    %234 = vector.load %arg13[%c0_89, %c0_90] : memref<36x1xf32, #tpu.memory_space<vmem>>, vector<36x1xf32>
    %235 = vector.broadcast %234 : vector<36x1xf32> to vector<36x512xf32>
    %236 = arith.mulf %233, %235 : vector<36x512xf32>
    %cst_91 = arith.constant dense<0.000000e+00> : vector<512xf32>
    %237 = vector.multi_reduction <add>, %236, %cst_91 [0] : vector<36x512xf32> to vector<512xf32>
    %238 = vector.shape_cast %237 : vector<512xf32> to vector<1x512xf32>
    %c0_92 = arith.constant 0 : index
    %c0_93 = arith.constant 0 : index
    %239 = vector.load %arg14[%c0_92, %c0_93] : memref<1x1xf32, #tpu.memory_space<vmem>>, vector<1x1xf32>
    %240 = vector.broadcast %239 : vector<1x1xf32> to vector<1x512xf32>
    %241 = arith.addf %238, %240 : vector<1x512xf32>
    %c0_94 = arith.constant 0 : index
    %c0_95 = arith.constant 0 : index
    %c0_96 = arith.constant 0 : index
    %242 = vector.load %arg16[%c0_94, %c0_95, %c0_96] : memref<1x1x512xf32, #tpu.memory_space<vmem>>, vector<1x1x512xf32>
    %243 = vector.shape_cast %242 : vector<1x1x512xf32> to vector<1x512xf32>
    %244 = vector.shape_cast %241 : vector<1x512xf32> to vector<1x1x512xf32>
    tpu.vector_store %arg16[%c0_94, %c0_95, %c0_96], %244 {strides = array<i32>} : memref<1x1x512xf32, #tpu.memory_space<vmem>>, vector<1x1x512xf32>,
    return
  }
  func.func @transform_0(%arg0: i32) -> (i32, i32, i32) {
    %c0_i32 = arith.constant 0 : i32
    %c0_i32_0 = arith.constant 0 : i32
    %c0_i32_1 = arith.constant 0 : i32
    return %arg0, %c0_i32, %c0_i32_0 : i32, i32, i32
  }
  func.func @transform_1(%arg0: i32) -> (i32, i32, i32) {
    %c0_i32 = arith.constant 0 : i32
    %c0_i32_0 = arith.constant 0 : i32
    %c0_i32_1 = arith.constant 0 : i32
    return %arg0, %c0_i32, %c0_i32_0 : i32, i32, i32
  }
  func.func @transform_2(%arg0: i32) -> (i32, i32, i32) {
    %c0_i32 = arith.constant 0 : i32
    %c0_i32_0 = arith.constant 0 : i32
    %c0_i32_1 = arith.constant 0 : i32
    return %arg0, %c0_i32, %c0_i32_0 : i32, i32, i32
  }
  func.func @transform_3(%arg0: i32) -> (i32, i32) {
    %c0_i32 = arith.constant 0 : i32
    %c0_i32_0 = arith.constant 0 : i32
    %c0_i32_1 = arith.constant 0 : i32
    return %c0_i32, %c0_i32_0 : i32, i32
  }
  func.func @transform_4(%arg0: i32) -> (i32, i32) {
    %c0_i32 = arith.constant 0 : i32
    %c0_i32_0 = arith.constant 0 : i32
    %c0_i32_1 = arith.constant 0 : i32
    return %c0_i32, %c0_i32_0 : i32, i32
  }
  func.func @transform_5(%arg0: i32) -> (i32, i32) {
    %c0_i32 = arith.constant 0 : i32
    %c0_i32_0 = arith.constant 0 : i32
    %c0_i32_1 = arith.constant 0 : i32
    return %c0_i32, %c0_i32_0 : i32, i32
  }
  func.func @transform_6(%arg0: i32) -> (i32, i32) {
    %c0_i32 = arith.constant 0 : i32
    %c0_i32_0 = arith.constant 0 : i32
    %c0_i32_1 = arith.constant 0 : i32
    return %c0_i32, %c0_i32_0 : i32, i32
  }
  func.func @transform_7(%arg0: i32) -> (i32, i32) {
    %c0_i32 = arith.constant 0 : i32
    %c0_i32_0 = arith.constant 0 : i32
    %c0_i32_1 = arith.constant 0 : i32
    return %c0_i32, %c0_i32_0 : i32, i32
  }
  func.func @transform_8(%arg0: i32) -> (i32, i32) {
    %c0_i32 = arith.constant 0 : i32
    %c0_i32_0 = arith.constant 0 : i32
    %c0_i32_1 = arith.constant 0 : i32
    return %c0_i32, %c0_i32_0 : i32, i32
  }
  func.func @transform_9(%arg0: i32) -> (i32, i32, i32) {
    %c0_i32 = arith.constant 0 : i32
    %c0_i32_0 = arith.constant 0 : i32
    %c0_i32_1 = arith.constant 0 : i32
    %c0_i32_2 = arith.constant 0 : i32
    return %c0_i32, %c0_i32_0, %c0_i32_1 : i32, i32, i32
  }
  func.func @transform_10(%arg0: i32) -> (i32, i32, i32) {
    %c0_i32 = arith.constant 0 : i32
    %c0_i32_0 = arith.constant 0 : i32
    %c0_i32_1 = arith.constant 0 : i32
    %c0_i32_2 = arith.constant 0 : i32
    return %c0_i32, %c0_i32_0, %c0_i32_1 : i32, i32, i32
  }
  func.func @transform_11(%arg0: i32) -> (i32, i32, i32) {
    %c0_i32 = arith.constant 0 : i32
    %c0_i32_0 = arith.constant 0 : i32
    %c0_i32_1 = arith.constant 0 : i32
    %c0_i32_2 = arith.constant 0 : i32
    return %c0_i32, %c0_i32_0, %c0_i32_1 : i32, i32, i32
  }
  func.func @transform_12(%arg0: i32) -> (i32, i32) {
    %c0_i32 = arith.constant 0 : i32
    %c0_i32_0 = arith.constant 0 : i32
    %c0_i32_1 = arith.constant 0 : i32
    return %c0_i32, %c0_i32_0 : i32, i32
  }
  func.func @transform_13(%arg0: i32) -> (i32, i32) {
    %c0_i32 = arith.constant 0 : i32
    %c0_i32_0 = arith.constant 0 : i32
    %c0_i32_1 = arith.constant 0 : i32
    return %c0_i32, %c0_i32_0 : i32, i32
  }
  func.func @transform_14(%arg0: i32) -> (i32, i32, i32) {
    %c0_i32 = arith.constant 0 : i32
    %c0_i32_0 = arith.constant 0 : i32
    %c0_i32_1 = arith.constant 0 : i32
    return %arg0, %c0_i32, %c0_i32_0 : i32, i32, i32
  }
  func.func @transform_15(%arg0: i32) -> (i32, i32, i32) {
    %c0_i32 = arith.constant 0 : i32
    %c0_i32_0 = arith.constant 0 : i32
    %c0_i32_1 = arith.constant 0 : i32
    return %arg0, %c0_i32, %c0_i32_0 : i32, i32, i32
  }
}

</mosaic_0001>

<bundles_post_ra>
// kernel: simple_decoder_forward.1
= control target key start
LH: loop header
LB: loop body
LE: loop exit
PB: predicated region body
PF: predicated region fallthrough
CT: control target
= control target key end

     0   :  { %v4781_v1 = vmov 0   ;;  %vm109_vm0 = vcmask 261120   ;;  %s2736_s21 = smov 15   ;;  %s2737_s22 = smov 127   ;;  %vm491_vm1 = vcmask 1043456   ;;  %vm1053_vm10 = vcmask 1045504   ;;  %s4764_s3 = inlined_call_operand.vmem [shape: bf16[32,512], index: 3, kind: input, shape index: {}]   ;;  %s4765_s0 = inlined_call_operand.vmem [shape: bf16[1,4,32], index: 0, kind: input, shape index: {}]   ;;  %s4766_s4 = inlined_call_operand.vmem [shape: bf16[128,512], index: 4, kind: input, shape index: {}]   ;;  %s4767_s1 = inlined_call_operand.vmem [shape: bf16[1,4,128], index: 1, kind: input, shape index: {}]   ;;  %s4768_s2 = inlined_call_operand.vmem [shape: bf16[1,4,512], index: 2, kind: input, shape index: {}]   ;;  %s4769_s7 = inlined_call_operand.vmem [shape: f32[4,1], index: 7, kind: input, shape index: {}]   ;;  %s4770_s8 = inlined_call_operand.vmem [shape: f32[4,1], index: 8, kind: input, shape index: {}]   ;;  %s4771_s5 = inlined_call_operand.vmem [shape: f32[9,512], index: 5, kind: input, shape index: {}]   ;;  %s4772_s6 = inlined_call_operand.vmem [shape: bf16[4,108], index: 6, kind: input, shape index: {}]   ;;  %s4773_s10 = inlined_call_operand.vmem [shape: f32[3,4,1], index: 10, kind: input, shape index: {}]   ;;  %s4774_s11 = inlined_call_operand.vmem [shape: f32[3,4,1], index: 11, kind: input, shape index: {}]   ;;  %s4775_s9 = inlined_call_operand.vmem [shape: bf16[3,4,36], index: 9, kind: input, shape index: {}]   ;;  %s4776_s12 = inlined_call_operand.vmem [shape: f32[36,1], index: 12, kind: input, shape index: {}]   ;;  %s4777_s13 = inlined_call_operand.<no memory space> [shape: f32[1,1], index: 13, kind: input, shape index: {}]   ;;  %s4778_s14 = inlined_call_operand.vmem [shape: f32[1,4,512], index: 14, kind: output, shape index: {0}]   ;;  %s4779_s15 = inlined_call_operand.vmem [shape: f32[1,1,512], index: 15, kind: output, shape index: {1}]  }
   0x1   :  { %v2668_v0 = vld [vmem:[%s4764_s3 + $0x4] ss:$16 sps:$4 sm:$0xff]   ;;  %145 = vmatprep.mubr.bf16.mxu0 %v4781_v1  ;;  %186 = vmatprep.mubr.bf16.mxu1 %v4781_v1  ;;  %v2670_v2 = vld [vmem:[%s4764_s3 + $0xc] ss:$16 sps:$4 sm:$0xff]   ;;  %v2672_v3 = vld [vmem:[%s4764_s3] ss:$16 sps:$4 sm:$0xff]  }
   0x2   :  { %2666 = vset.pattern.permute.xlu0 %v4781_v1  ;;  %2667 = vset.pattern.permute.xlu1 %v4781_v1  ;;  %v2673_v4 = vld [vmem:[%s4764_s3 + $0x8] ss:$16 sps:$4 sm:$0xff]   ;;  %v2674_v5 = vld [vmem:[%s4764_s3 + $0x24] ss:$16 sps:$4 sm:$0xff]   ;;  %v2676_v6 = vld [vmem:[%s4764_s3 + $0x2c] ss:$16 sps:$4 sm:$0xff]  }
   0x3   :  { %113 = vmatprep.subr.bf16.mxu0 %v2668_v0  ;;  %154 = vmatprep.subr.bf16.mxu1 %v2670_v2  ;;  %v2678_v7 = vld [vmem:[%s4764_s3 + $0x20] ss:$16 sps:$4 sm:$0xff]   ;;  %v2679_v8 = vld [vmem:[%s4764_s3 + $0x28] ss:$16 sps:$4 sm:$0xff]   ;;  %v2682_v11 = vld [vmem:[%s4766_s4 + $0x4] ss:$16 sps:$4 sm:$0xff]  }
   0x4   :  { %114 = vmatpush1.bf16.msra.mxu0 %v2672_v3  ;;  %155 = vmatpush1.bf16.msra.mxu1 %v2673_v4  ;;  %v60_v9 = vld [vmem:[%s4765_s0] sm:$0x3]  ;;  %v2683_v12 = vld [vmem:[%s4766_s4 + $0x8] ss:$16 sps:$4 sm:$0xff]   ;;  %v2685_v13 = vld [vmem:[%s4766_s4 + $0xc] ss:$16 sps:$4 sm:$0xff]  }
   0x5   :  { %115 = vmatprep.subr.bf16.mxu0 %v2674_v5  ;;  %156 = vmatprep.subr.bf16.mxu1 %v2676_v6  ;;  %v2680_v10 = vld [vmem:[%s4766_s4] ss:$16 sps:$4 sm:$0xff]   ;;  %v2688_v14 = vld [vmem:[%s4766_s4 + $0x24] ss:$16 sps:$4 sm:$0xff]   ;;  %v2691_v15 = vld [vmem:[%s4766_s4 + $0x2c] ss:$16 sps:$4 sm:$0xff]  }
   0x6   :  { %v2686_v16 = vld [vmem:[%s4766_s4 + $0x20] ss:$16 sps:$4 sm:$0xff]   ;;  %v2689_v17 = vld [vmem:[%s4766_s4 + $0x28] ss:$16 sps:$4 sm:$0xff]   ;;  %v2694_v18 = vld [vmem:[%s4766_s4 + $0x44] ss:$16 sps:$4 sm:$0xff]  }
   0x7   :  { %v2697_v19 = vld [vmem:[%s4766_s4 + $0x4c] ss:$16 sps:$4 sm:$0xff]   ;;  %v2692_v20 = vld [vmem:[%s4766_s4 + $0x40] ss:$16 sps:$4 sm:$0xff]   ;;  %v2695_v21 = vld [vmem:[%s4766_s4 + $0x48] ss:$16 sps:$4 sm:$0xff]  }
   0x8   :  { %116 = vmatpush1.bf16.msra.mxu0 %v2678_v7  ;;  %157 = vmatpush1.bf16.msra.mxu1 %v2679_v8  ;;  %v2700_v22 = vld [vmem:[%s4766_s4 + $0x64] ss:$16 sps:$4 sm:$0xff]   ;;  %v2703_v23 = vld [vmem:[%s4766_s4 + $0x6c] ss:$16 sps:$4 sm:$0xff]   ;;  %v2698_v24 = vld [vmem:[%s4766_s4 + $0x60] ss:$16 sps:$4 sm:$0xff]  }
   0x9   :  { %388 = vmatprep.subr.bf16.mxu0 %v2682_v11  ;;  %429 = vmatprep.subr.bf16.mxu1 %v2685_v13  ;;  %v2701_v25 = vld [vmem:[%s4766_s4 + $0x68] ss:$16 sps:$4 sm:$0xff]   ;;  %v2706_v26 = vld [vmem:[%s4766_s4 + $0x84] ss:$16 sps:$4 sm:$0xff]   ;;  %v2709_v27 = vld [vmem:[%s4766_s4 + $0x8c] ss:$16 sps:$4 sm:$0xff]  }
   0xa   :  { %v2704_v28 = vld [vmem:[%s4766_s4 + $0x80] ss:$16 sps:$4 sm:$0xff]   ;;  %v2707_v29 = vld [vmem:[%s4766_s4 + $0x88] ss:$16 sps:$4 sm:$0xff]   ;;  %v2712_v30 = vld [vmem:[%s4766_s4 + $0xa4] ss:$16 sps:$4 sm:$0xff]  }
   0xb   :  { %2516 = vmatmul.mubr.msk.bf16.vlgmr.msra.gmra.mrb[0].mxu0 %vm109_vm0, %v60_v9  ;;  %2517 = vmatmul.mubr.msk.bf16.vlgmr.msra.gmra.mrb[0].mxu1 %vm109_vm0, %v60_v9  ;;  %v2715_v31 = vld [vmem:[%s4766_s4 + $0xac] ss:$16 sps:$4 sm:$0xff]   ;;  %v2710_v32 = vld [vmem:[%s4766_s4 + $0xa0] ss:$16 sps:$4 sm:$0xff]   ;;  %v2713_v33 = vld [vmem:[%s4766_s4 + $0xa8] ss:$16 sps:$4 sm:$0xff]  }
   0xc   :  { %389 = vmatpush1.bf16.msra.mxu0 %v2680_v10  ;;  %430 = vmatpush1.bf16.msra.mxu1 %v2683_v12  ;;  %v2718_v34 = vld [vmem:[%s4766_s4 + $0xc4] ss:$16 sps:$4 sm:$0xff]   ;;  %v2721_v35 = vld [vmem:[%s4766_s4 + $0xcc] ss:$16 sps:$4 sm:$0xff]   ;;  %v2716_v36 = vld [vmem:[%s4766_s4 + $0xc0] ss:$16 sps:$4 sm:$0xff]  }
   0xd   :  { %390 = vmatprep.subr.bf16.mxu0 %v2688_v14  ;;  %431 = vmatprep.subr.bf16.mxu1 %v2691_v15  ;;  %v2719_v37 = vld [vmem:[%s4766_s4 + $0xc8] ss:$16 sps:$4 sm:$0xff]   ;;  %v2724_v38 = vld [vmem:[%s4766_s4 + $0xe4] ss:$16 sps:$4 sm:$0xff]   ;;  %v2727_v39 = vld [vmem:[%s4766_s4 + $0xec] ss:$16 sps:$4 sm:$0xff]  }
   0xe   :  { %420 = vmatprep.mubr.bf16.mxu0 %v4781_v1  ;;  %461 = vmatprep.mubr.bf16.mxu1 %v4781_v1  ;;  %v2722_v40 = vld [vmem:[%s4766_s4 + $0xe0] ss:$16 sps:$4 sm:$0xff]   ;;  %v2725_v41 = vld [vmem:[%s4766_s4 + $0xe8] ss:$16 sps:$4 sm:$0xff]   ;;  %s2735_s4 = smov 1   ;;  %s2738_s23 = smov 112  }
   0xf   :  { %v195_v42 = vld [vmem:[%s4767_s1] sm:$0x3]  ;;  %s2733_s1 = smov 17   ;;  %s2739_s24 = smov 113   ;;  %vm1049_vm11 = vcmask 883712   ;;  %vm1381_vm12 = vcmask 1041408  }
  0x10   :  { %391 = vmatpush1.bf16.msra.mxu0 %v2686_v16  ;;  %432 = vmatpush1.bf16.msra.mxu1 %v2689_v17  ;;  %v470_v43 = vld [vmem:[%s4768_s2] sm:$0xff]  ;;  %s2734_s2 = smov 16   ;;  %s2740_s25 = smov 111   ;;  %vm1377_vm13 = vcmask 293888  }
  0x11   :  { %392 = vmatprep.subr.bf16.mxu0 %v2694_v18  ;;  %433 = vmatprep.subr.bf16.mxu1 %v2697_v19  ;;  %v2959_v44 = vunpack.c.h.bf16 %v470_v43  ;;  %v2961_v45 = vunpack.c.l.bf16 %v470_v43  ;;  %v497_v11 = vld [vmem:[%s4769_s7] sm:$0xf] }
  0x12   :  { %v498_v12 = vld [vmem:[%s4770_s8] sm:$0xf] }
  0x13   :  { %4844 = vst [vmem:[#allocation3_spill] sm:$0xff] %v2959_v44  ;;  %4845 = vst [vmem:[#allocation4_spill] sm:$0xff] %v2961_v45  ;;  %v2965_v46 = vcombine.high %v2959_v44, %v2959_v44  ;;  %v2969_v47 = vcombine.high %v2961_v45, %v2961_v45 }
  0x14   :  { %393 = vmatpush1.bf16.msra.mxu0 %v2692_v20  ;;  %434 = vmatpush1.bf16.msra.mxu1 %v2695_v21 }
  0x15   :  { %394 = vmatprep.subr.bf16.mxu0 %v2700_v22  ;;  %435 = vmatprep.subr.bf16.mxu1 %v2703_v23  ;;  %4846 = vst [vmem:[#allocation5_spill] sm:$0xff] %v2965_v46  ;;  %4847 = vst [vmem:[#allocation6_spill] sm:$0xff] %v2969_v47  ;;  %v2973_v48 = vpack.i.bf16 %v2965_v46, %v2959_v44  ;;  %v2977_v49 = vpack.i.bf16 %v2969_v47, %v2961_v45 }
  0x17   :  { %2592 = vrot.lane.b32.xlu1 %v2973_v48, %s2733_s1  ;;  %2587 = vrot.lane.b32.xlu0 %v2977_v49, %s2733_s1 }
  0x18   :  { %395 = vmatpush1.bf16.msra.mxu0 %v2698_v24  ;;  %436 = vmatpush1.bf16.msra.mxu1 %v2701_v25  ;;  %v4780_v24 = vlaneseq }
  0x19   :  { %396 = vmatprep.subr.bf16.mxu0 %v2706_v26  ;;  %437 = vmatprep.subr.bf16.mxu1 %v2709_v27 }
  0x1a   :  { %v3116_v25 = vshrl.u32 %v4780_v24, 7 }
  0x1b   :  { %2602 = vrot.lane.b32.xlu1 %v2973_v48, %s2734_s2  ;;  %2597 = vrot.lane.b32.xlu0 %v2977_v49, %s2734_s2 }
  0x1c   :  { %397 = vmatpush1.bf16.msra.mxu0 %v2704_v28  ;;  %438 = vmatpush1.bf16.msra.mxu1 %v2707_v29  ;;  %4852 = vst [vmem:[#allocation11_spill] sm:$0xff] %v3116_v25  ;;  %v3123_v28 = vand.u32 127, %v4780_v24  ;;  %v3128_v29 = vld [vmem:[%s4771_s5 + $0x18] sm:$0xff] }
  0x1d   :  { %398 = vmatprep.subr.bf16.mxu0 %v2712_v30  ;;  %439 = vmatprep.subr.bf16.mxu1 %v2715_v31  ;;  %v3131_v30 = vsub.s32 0, %v3116_v25 }
  0x1e   :  { %vm517_vm2 = vcmp.lt.s32.totalorder %v3123_v28, 17  ;;  %vm566_vm3 = vcmp.lt.s32.totalorder %v3123_v28, 16  ;;  %vm664_vm4 = vcmp.lt.s32.totalorder %v3123_v28, 1  ;;  %vm713_vm5 = vcmp.lt.s32.totalorder %v3123_v28, 127 }
  0x1f   :  { %2607 = vrot.lane.b32.xlu1 %v2977_v49, %s2735_s4  ;;  %2612 = vrot.lane.b32.xlu0 %v2973_v48, %s2735_s4  ;;  %4854 = vst [vmem:[#allocation13_spill] sm:$0xff] %v3131_v30  ;;  %vm811_vm6 = vcmp.lt.s32.totalorder %v3123_v28, 112  ;;  %vm615_vm7 = vcmp.lt.s32.totalorder %v3123_v28, 15  ;;  %vm762_vm8 = vcmp.lt.s32.totalorder %v3123_v28, 113  ;;  %vm860_vm9 = vcmp.lt.s32.totalorder %v3123_v28, 111 }
  0x20   :  { %399 = vmatpush1.bf16.msra.mxu0 %v2710_v32  ;;  %440 = vmatpush1.bf16.msra.mxu1 %v2713_v33  ;;  %v577_v33 = vsub.s32 1, %v3116_v25 }
  0x21   :  { %400 = vmatprep.subr.bf16.mxu0 %v2718_v34  ;;  %441 = vmatprep.subr.bf16.mxu1 %v2721_v35  ;;  %v3141_v34 = vld [vmem:[%s4771_s5] sm:$0xff]  ;;  %v3146_v35 = vld [vmem:[%s4771_s5 + $0x8] sm:$0xff] }
  0x23   :  { %2622 = vrot.lane.b32.xlu1 %v2973_v48, %s2736_s21  ;;  %2617 = vrot.lane.b32.xlu0 %v2977_v49, %s2736_s21 }
  0x24   :  { %401 = vmatpush1.bf16.msra.mxu0 %v2716_v36  ;;  %442 = vmatpush1.bf16.msra.mxu1 %v2719_v37  ;;  %v3151_v36 = vld [vmem:[%s4771_s5 + $0x10] sm:$0xff]  ;;  %v675_v37 = vsub.s32 3, %v3116_v25 }
  0x25   :  { %402 = vmatprep.subr.bf16.mxu0 %v2724_v38  ;;  %443 = vmatprep.subr.bf16.mxu1 %v2727_v39  ;;  %v3157_v38 = vrot.slane %v3128_v29, %v3131_v30  ;;  %v626_v39 = vsub.s32 2, %v3116_v25  ;;  %v3174_v43 = vrot.slane %v3151_v36, %v3131_v30 }
  0x27   :  { %2632 = vrot.lane.b32.xlu1 %v2973_v48, %s2737_s22  ;;  %2627 = vrot.lane.b32.xlu0 %v2977_v49, %s2737_s22  ;;  %4855 = vst [vmem:[#allocation14_spill] sm:$0xff] %v3157_v38  ;;  %4859 = vst [vmem:[#allocation18_spill] sm:$0xff] %v3174_v43 }
  0x28   :  { %403 = vmatpush1.bf16.msra.mxu0 %v2722_v40  ;;  %444 = vmatpush1.bf16.msra.mxu1 %v2725_v41  ;;  %v3162_v40 = vrot.slane %v3128_v29, %v577_v33  ;;  %v3166_v41 = vrot.slane %v3141_v34, %v3131_v30 }
  0x2a   :  { %4856 = vst [vmem:[#allocation15_spill] sm:$0xff] %v3162_v40  ;;  %4857 = vst [vmem:[#allocation16_spill] sm:$0xff] %v3166_v41 }
  0x2b   :  { %421 = vmatmul.mubr.bf16.vlgmr.msra.gmra.mrb[4].mxu0 %v195_v42  ;;  %462 = vmatmul.mubr.bf16.vlgmr.msra.gmra.mrb[4].mxu1 %v195_v42  ;;  %v3170_v42 = vrot.slane %v3146_v35, %v3131_v30 }
  0x2c   :  { %1098 = vmatprep.mubr.bf16.mxu0 %v4781_v1  ;;  %1139 = vmatprep.mubr.bf16.mxu1 %v4781_v1 }
  0x2d   :  { %2637 = vrot.lane.b32.xlu1 %v2977_v49, %s2738_s23  ;;  %4858 = vst [vmem:[#allocation17_spill] sm:$0xff] %v3170_v42 }
  0x89   :  { %v3093_v13 = vpop.permute.xlu1 %2592  ;;  %v3097_v15 = vpop.permute.xlu0 %2587 }
  0x8d   :  { %v3095_v14 = vpop.permute.xlu1 %2602  ;;  %v3101_v17 = vpop.permute.xlu0 %2597 }
  0x91   :  { %v3099_v16 = vpop.permute.xlu1 %2607  ;;  %v3105_v19 = vpop.permute.xlu0 %2612 }
  0x95   :  { %v3103_v18 = vpop.permute.xlu1 %2622  ;;  %v3109_v21 = vpop.permute.xlu0 %2617 }
  0x99   :  { %v3107_v20 = vpop.permute.xlu1 %2632  ;;  %v3113_v23 = vpop.permute.xlu0 %2627 }
  0x9f   :  { %v3111_v22 = vpop.permute.xlu1 %2637 }
  0xde   :  { %v147_v50 = vpop.f32.mrb[0].mxu0  ;;  %v188_v51 = vpop.f32.mrb[0].mxu1 }
  0xdf   :  { %v149_v52 = vpop.f32.mrb[1].mxu0  ;;  %v190_v53 = vpop.f32.mrb[1].mxu1 }
  0xe0   :  { %v151_v54 = vpop.f32.mrb[2].mxu0  ;;  %v192_v55 = vpop.f32.mrb[2].mxu1 }
  0xe1   :  { %v152_v56 = vpop.f32.mrb[3].mxu0  ;;  %v193_v57 = vpop.f32.mrb[3].mxu1  ;;  %v3194_v54 = vrot.slane %v3128_v29, %v626_v39  ;;  %v3197_v55 = vrot.slane %v3141_v34, %v675_v37 }
  0xe2   :  { %v3200_v56 = vrot.slane %v3151_v36, %v675_v37  ;;  %v724_v57 = vsub.s32 5, %v3116_v25 }
  0xe3   :  { %4864 = vst [vmem:[#allocation23_spill] sm:$0xff] %v3194_v54  ;;  %4865 = vst [vmem:[#allocation24_spill] sm:$0xff] %v3197_v55 }
  0xe4   :  { %v3247_v24 = vrot.slane %v3128_v29, %v724_v57 }
  0xfe   :  { %v422_v58 = vpop.f32.mrb[4].mxu0  ;;  %v463_v59 = vpop.f32.mrb[4].mxu1 }
  0xff   :  { %v477_v60 = vrot.slane %v422_v58, 4  ;;  %v479_v61 = vrot.slane %v463_v59, 4  ;;  %v424_v62 = vpop.f32.mrb[5].mxu0  ;;  %v465_v63 = vpop.f32.mrb[5].mxu1  ;;  %v2595_v58 = vunpack.i.h.bf16 %v3093_v13  ;;  %v3205_v59 = vrot.slane %v3128_v29, %v675_v37 }
 0x100   :  { %v478_v0 = vrot.slane %v424_v62, 4  ;;  %v480_v2 = vrot.slane %v465_v63, 4  ;;  %v426_v3 = vpop.f32.mrb[6].mxu0  ;;  %v467_v4 = vpop.f32.mrb[6].mxu1  ;;  %v2594_v62 = vunpack.i.l.bf16 %v3093_v13  ;;  %v2605_v63 = vunpack.i.h.bf16 %v3095_v14 }
 0x101   :  { %v3002_v5 = vsel %vm491_vm1, %v147_v50, %v477_v60  ;;  %v3005_v6 = vsel %vm491_vm1, %v188_v51, %v479_v61  ;;  %v427_v7 = vpop.f32.mrb[7].mxu0  ;;  %v468_v8 = vpop.f32.mrb[7].mxu1  ;;  %v3181_v50 = vrot.slane %v3146_v35, %v675_v37  ;;  %v3184_v51 = vrot.slane %v3141_v34, %v577_v33  ;;  %4866 = vst [vmem:[#allocation25_spill] sm:$0xff] %v3205_v59 }
 0x102   :  { %4848 = vst [vmem:[#allocation7_spill] sm:$0xff] %v3002_v5  ;;  %4849 = vst [vmem:[#allocation8_spill] sm:$0xff] %v3005_v6  ;;  %v3008_v9 = vsel %vm491_vm1, %v149_v52, %v478_v0  ;;  %v3011_v10 = vsel %vm491_vm1, %v190_v53, %v480_v2  ;;  %558 = vrot.lane.b32.xlu1 %v3005_v6, %s2734_s2  ;;  %550 = vrot.lane.b32.xlu0 %v3002_v5, %s2734_s2  ;;  %v2590_v0 = vunpack.i.h.bf16 %v3097_v15 }
 0x103   :  { %4850 = vst [vmem:[#allocation9_spill] sm:$0xff] %v3008_v9  ;;  %4851 = vst [vmem:[#allocation10_spill] sm:$0xff] %v3011_v10  ;;  %v3187_v52 = vrot.slane %v3146_v35, %v577_v33  ;;  %v3190_v53 = vrot.slane %v3151_v36, %v577_v33  ;;  %v3208_v60 = vrot.slane %v3141_v34, %v626_v39  ;;  %v2589_v2 = vunpack.i.l.bf16 %v3097_v15 }
 0x104   :  { %4861 = vst [vmem:[#allocation20_spill] sm:$0xff] %v3184_v51  ;;  %v3211_v61 = vrot.slane %v3146_v35, %v626_v39  ;;  %v2604_v7 = vunpack.i.l.bf16 %v3095_v14  ;;  %v2600_v8 = vunpack.i.h.bf16 %v3101_v17  ;;  %v3229_v13 = vrot.slane %v3151_v36, %v724_v57 }
 0x105   :  { %4862 = vst [vmem:[#allocation21_spill] sm:$0xff] %v3187_v52  ;;  %4863 = vst [vmem:[#allocation22_spill] sm:$0xff] %v3190_v53  ;;  %v3232_v15 = vrot.slane %v3151_v36, %v626_v39  ;;  %v3235_v33 = vsub.s32 7, %v3116_v25  ;;  %v3238_v14 = vrot.slane %v3141_v34, %v724_v57  ;;  %v3244_v37 = vrot.slane %v3146_v35, %v724_v57 }
 0x106   :  { %656 = vrot.lane.b32.xlu1 %v3005_v6, %s2735_s4  ;;  %499 = vrot.lane.b32.xlu0 %v3002_v5, %s2733_s1  ;;  %4867 = vst [vmem:[#allocation26_spill] sm:$0xff] %v3208_v60  ;;  %4868 = vst [vmem:[#allocation27_spill] sm:$0xff] %v3211_v61  ;;  %v568_v1 = vsel %vm566_vm3, %v2604_v7, %v2605_v63  ;;  %v521_v30 = vsel %vm517_vm2, %v2590_v0, %v2594_v62 }
 0x107   :  { %4869 = vst [vmem:[#allocation28_spill] sm:$0xff] %v3229_v13  ;;  %4870 = vst [vmem:[#allocation29_spill] sm:$0xff] %v3232_v15  ;;  %v570_v44 = vsel %vm566_vm3, %v2600_v8, %v2604_v7  ;;  %v3282_v7 = vmul.f32 %v3174_v43, %v521_v30 }
 0x108   :  { %4871 = vst [vmem:[#allocation30_spill] sm:$0xff] %v3244_v37 }
 0x109   :  { %4873 = vst [vmem:[#allocation32_spill] sm:$0xff] %v3282_v7  ;;  %v2625_v7 = vunpack.i.h.bf16 %v3103_v18 }
 0x10a   :  { %803 = vrot.lane.b32.xlu1 %v3005_v6, %s2738_s23  ;;  %507 = vrot.lane.b32.xlu0 %v3005_v6, %s2733_s1 }
 0x10e   :  { %562 = vrot.lane.b32.xlu1 %v3011_v10, %s2734_s2  ;;  %599 = vrot.lane.b32.xlu0 %v3002_v5, %s2736_s21 }
 0x112   :  { %607 = vrot.lane.b32.xlu0 %v3005_v6, %s2736_s21  ;;  %503 = vrot.lane.b32.xlu1 %v3008_v9, %s2733_s1 }
 0x116   :  { %648 = vrot.lane.b32.xlu0 %v3002_v5, %s2735_s4  ;;  %511 = vrot.lane.b32.xlu1 %v3011_v10, %s2733_s1 }
 0x11a   :  { %697 = vrot.lane.b32.xlu0 %v3002_v5, %s2737_s22  ;;  %603 = vrot.lane.b32.xlu1 %v3008_v9, %s2736_s21 }
 0x11e   :  { %705 = vrot.lane.b32.xlu0 %v3005_v6, %s2737_s22  ;;  %611 = vrot.lane.b32.xlu1 %v3011_v10, %s2736_s21 }
 0x122   :  { %746 = vrot.lane.b32.xlu0 %v3002_v5, %s2739_s24  ;;  %2652 = vrot.lane.b32.xlu1 %v2973_v48, %s2739_s24 }
 0x126   :  { %754 = vrot.lane.b32.xlu0 %v3005_v6, %s2739_s24  ;;  %2657 = vrot.lane.b32.xlu1 %v2977_v49, %s2740_s25 }
 0x12a   :  { %795 = vrot.lane.b32.xlu0 %v3002_v5, %s2738_s23  ;;  %660 = vrot.lane.b32.xlu1 %v3011_v10, %s2735_s4 }
 0x12e   :  { %701 = vrot.lane.b32.xlu1 %v3008_v9, %s2737_s22  ;;  %554 = vrot.lane.b32.xlu0 %v3008_v9, %s2734_s2 }
 0x132   :  { %709 = vrot.lane.b32.xlu1 %v3011_v10, %s2737_s22  ;;  %2642 = vrot.lane.b32.xlu0 %v2973_v48, %s2738_s23 }
 0x136   :  { %750 = vrot.lane.b32.xlu1 %v3008_v9, %s2739_s24  ;;  %652 = vrot.lane.b32.xlu0 %v3008_v9, %s2735_s4 }
 0x13a   :  { %758 = vrot.lane.b32.xlu1 %v3011_v10, %s2739_s24  ;;  %2647 = vrot.lane.b32.xlu0 %v2977_v49, %s2739_s24 }
 0x13e   :  { %807 = vrot.lane.b32.xlu1 %v3011_v10, %s2738_s23  ;;  %844 = vrot.lane.b32.xlu0 %v3002_v5, %s2740_s25  ;;  %v523_v5 = vsel %vm517_vm2, %v2589_v2, %v2590_v0  ;;  %v2610_v0 = vunpack.i.h.bf16 %v3099_v16 }
 0x142   :  { %852 = vrot.lane.b32.xlu1 %v3005_v6, %s2740_s25  ;;  %799 = vrot.lane.b32.xlu0 %v3008_v9, %s2738_s23  ;;  %v525_v6 = vsel %vm517_vm2, %v2595_v58, %v2589_v2  ;;  %v2614_v2 = vunpack.i.l.bf16 %v3105_v19 }
 0x146   :  { %856 = vrot.lane.b32.xlu1 %v3011_v10, %s2740_s25  ;;  %848 = vrot.lane.b32.xlu0 %v3008_v9, %s2740_s25  ;;  %v2615_v9 = vunpack.i.h.bf16 %v3105_v19  ;;  %v3278_v10 = vrot.slane %v3141_v34, %v3235_v33  ;;  %v3295_v19 = vmul.f32 %v3190_v53, %v570_v44 }
 0x148   :  { %4872 = vst [vmem:[#allocation31_spill] sm:$0xff] %v3278_v10  ;;  %4875 = vst [vmem:[#allocation34_spill] sm:$0xff] %v3295_v19 }
 0x14a   :  { %2662 = vrot.lane.b32.xlu0 %v2973_v48, %s2740_s25  ;;  %1159 = vperm.xlu1 %2667, %v498_v12  }
 0x14e   :  { %1150 = vperm.xlu0 %2666, %v497_v11   ;;  %v2599_v11 = vunpack.i.l.bf16 %v3101_v17  ;;  %v519_v17 = vsel %vm517_vm2, %v2594_v62, %v2595_v58 }
 0x14f   :  { %v549_v47 = vmul.f32 %v3157_v38, %v519_v17 }
 0x150   :  { %v574_v62 = vsel %vm566_vm3, %v2605_v63, %v2599_v11  ;;  %v572_v58 = vsel %vm566_vm3, %v2599_v11, %v2600_v8  ;;  %v3285_v63 = vmul.f32 %v3166_v41, %v525_v6  ;;  %v3292_v8 = vmul.f32 %v3170_v42, %v523_v5 }
 0x151   :  { %v3298_v11 = vmul.f32 %v3184_v51, %v574_v62  ;;  %v3307_v46 = vmul.f32 %v3187_v52, %v572_v58  ;;  %v668_v5 = vsel %vm664_vm4, %v2610_v0, %v2614_v2  ;;  %v2630_v62 = vunpack.i.h.bf16 %v3113_v23 }
 0x152   :  { %4874 = vst [vmem:[#allocation33_spill] sm:$0xff] %v3292_v8  ;;  %v2635_v58 = vunpack.i.h.bf16 %v3107_v20  ;;  %v2624_v52 = vunpack.i.l.bf16 %v3103_v18  ;;  %v3350_v18 = vmul.f32 %v3200_v56, %v668_v5 }
 0x174   :  { %v3118_v26 = vpop.permute.xlu1 %558  ;;  %v3120_v27 = vpop.permute.xlu0 %550 }
 0x175   :  { %4853 = vst [vmem:[#allocation12_spill] sm:$0xff] %v3118_v26 }
 0x178   :  { %v3133_v31 = vpop.permute.xlu1 %656  ;;  %v3135_v32 = vpop.permute.xlu0 %499 }
 0x17c   :  { %v3176_v48 = vpop.permute.xlu1 %803  ;;  %v3178_v49 = vpop.permute.xlu0 %507 }
 0x17d   :  { %4860 = vst [vmem:[#allocation19_spill] sm:$0xff] %v3176_v48 }
 0x180   :  { %v3217_v3 = vpop.permute.xlu1 %562  ;;  %v3219_v4 = vpop.permute.xlu0 %599 }
 0x181   :  { %v567_v12 = vsel %vm566_vm3, %v3118_v26, %v3217_v3  ;;  %v2620_v26 = vunpack.i.h.bf16 %v3109_v21 }
 0x182   :  { %v3250_v39 = vmul.f32 %v3162_v40, %v567_v12  ;;  %v2609_v12 = vunpack.i.l.bf16 %v3099_v16  ;;  %v3289_v16 = vmul.f32 %v3162_v40, %v568_v1  ;;  %v2629_v40 = vunpack.i.l.bf16 %v3113_v23 }
 0x184   :  { %v3261_v45 = vpop.permute.xlu0 %607  ;;  %v3263_v57 = vpop.permute.xlu1 %503  ;;  %v670_v6 = vsel %vm664_vm4, %v2609_v12, %v2610_v0  ;;  %v672_v1 = vsel %vm664_vm4, %v2615_v9, %v2609_v12  ;;  %v4877_v8 = vrot.slane %v3250_v39, 4  ;;  %v2634_v0 = vunpack.i.l.bf16 %v3107_v20 }
 0x185   :  { %v666_v12 = vsel %vm664_vm4, %v2614_v2, %v2615_v9  ;;  %v3340_v20 = vmul.f32 %v3197_v55, %v672_v1  ;;  %v4879_v9 = vunpack.i.h.bf16 %v3111_v22  ;;  %v721_v1 = vsel %vm713_vm5, %v2635_v58, %v2629_v40 }
 0x186   :  { %v1008_v53 = vsel %vm491_vm1, %v549_v47, %v4877_v8  ;;  %v2619_v47 = vunpack.i.l.bf16 %v3109_v21  ;;  %v4880_v21 = vunpack.i.l.bf16 %v3111_v22  ;;  %v717_v5 = vsel %vm713_vm5, %v2630_v62, %v2634_v0 }
 0x188   :  { %v3300_v17 = vpop.permute.xlu0 %648  ;;  %v3302_v30 = vpop.permute.xlu1 %511  ;;  %v817_v2 = vsel %vm811_vm6, %v4880_v21, %v4879_v9 }
 0x189   :  { %4876 = vst [vmem:[#allocation35_spill] sm:$0xff] %v3300_v17  ;;  %v518_v44 = vsel %vm517_vm2, %v3178_v49, %v3302_v30  ;;  %v3383_v21 = vmul.f32 %v3278_v10, %v817_v2 }
 0x18a   :  { %v545_v48 = vmul.f32 %v3157_v38, %v518_v44  ;;  %v617_v38 = vsel %vm615_vm7, %v2624_v52, %v2625_v7 }
 0x18b   :  { %4881 = vst [vmem:[#allocation37_spill] sm:$0xff] %v3383_v21 }
 0x18c   :  { %v3329_v17 = vpop.permute.xlu0 %697  ;;  %v3331_v23 = vpop.permute.xlu1 %603  ;;  %v1024_v44 = vpack.c.bf16 %v1008_v53, %v545_v48  ;;  %v719_v48 = vsel %vm713_vm5, %v2629_v40, %v2630_v62  ;;  %v3347_v53 = vmul.f32 %v3181_v50, %v670_v6  ;;  %v619_v6 = vsel %vm615_vm7, %v2620_v26, %v2624_v52 }
 0x18d   :  { %4878 = vst [vmem:[#allocation36_spill] sm:$0xff] %v3329_v17  ;;  %v715_v17 = vsel %vm713_vm5, %v2634_v0, %v2635_v58  ;;  %v621_v40 = vsel %vm615_vm7, %v2619_v47, %v2620_v26  ;;  %v623_v58 = vsel %vm615_vm7, %v2625_v7, %v2619_v47  ;;  %v3386_v62 = vmul.f32 %v3247_v24, %v721_v1 }
 0x18e   :  { %1107 = vmatprep.subr.bf16.mxu1 %v1024_v44  ;;  %v3363_v44 = vmul.f32 %v3205_v59, %v666_v12  ;;  %v3372_v9 = vmul.f32 %v3229_v13, %v715_v17  ;;  %v3379_v12 = vmul.f32 %v3238_v14, %v719_v48  ;;  %v573_v17 = vsel %vm566_vm3, %v3217_v3, %v3120_v27 }
 0x18f   :  { %v3393_v26 = vmul.f32 %v3194_v54, %v617_v38  ;;  %v3397_v0 = vmul.f32 %v3232_v15, %v619_v6  ;;  %v3400_v47 = vmul.f32 %v3244_v37, %v717_v5  ;;  %v3403_v48 = vmul.f32 %v3208_v60, %v623_v58 }
 0x190   :  { %v3369_v8 = vpop.permute.xlu0 %705  ;;  %v612_v19 = vpop.permute.xlu1 %611  ;;  %v3406_v2 = vmul.f32 %v3211_v61, %v621_v40  ;;  %v773_v3 = vsub.s32 6, %v3116_v25  ;;  %v591_v58 = vmul.f32 %v3184_v51, %v573_v17  ;;  %v911_v40 = vrot.slane %v3289_v16, 4 }
 0x191   :  { %4882 = vst [vmem:[#allocation38_spill] sm:$0xff] %v3397_v0  ;;  %v939_v25 = vrot.slane %v3363_v44, 4  ;;  %v520_v0 = vsel %vm517_vm2, %v3263_v57, %v3178_v49  ;;  %v522_v17 = vsel %vm517_vm2, %v3135_v32, %v3263_v57  ;;  %v524_v16 = vsel %vm517_vm2, %v3302_v30, %v3135_v32 }
 0x192   :  { %v622_v52 = vsel %vm615_vm7, %v612_v19, %v3219_v4  ;;  %v3441_v7 = vrot.slane %v3151_v36, %v773_v3  ;;  %v3449_v57 = vrot.slane %v3146_v35, %v3235_v33  ;;  %v3453_v32 = vrot.slane %v3151_v36, %v3235_v33 }
 0x193   :  { %v901_v30 = vrot.slane %v591_v58, 4  ;;  %v3457_v44 = vrot.slane %v3128_v29, %v3235_v33  ;;  %v3460_v6 = vrot.slane %v3141_v34, %v773_v3  ;;  %v3463_v5 = vrot.slane %v3146_v35, %v773_v3 }
 0x194   :  { %v3408_v1 = vpop.permute.xlu0 %746  ;;  %v3411_v38 = vpop.permute.xlu1 %2652  ;;  %4884 = vst [vmem:[#allocation40_spill] sm:$0xff] %v3453_v32  ;;  %v3466_v51 = vmul.f32 %v3170_v42, %v522_v17  ;;  %v3469_v21 = vmul.f32 %v3174_v43, %v520_v0  ;;  %v3472_v36 = vmul.f32 %v3166_v41, %v524_v16  ;;  %v3475_v58 = vrot.slane %v3128_v29, %v773_v3  ;;  %v4897_v42 = vld [vmem:[#allocation22_spill] sm:$0xff] }
 0x195   :  { %4885 = vst [vmem:[#allocation41_spill] sm:$0xff] %v3457_v44  ;;  %v618_v34 = vsel %vm615_vm7, %v3331_v23, %v3261_v45  ;;  %v620_v35 = vsel %vm615_vm7, %v3219_v4, %v3331_v23  ;;  %v616_v33 = vsel %vm615_vm7, %v3261_v45, %v612_v19  ;;  %v3489_v0 = vmul.f32 %v3208_v60, %v622_v52  ;;  %v4888_v52 = vld [vmem:[#allocation35_spill] sm:$0xff] }
 0x196   :  { %4886 = vst [vmem:[#allocation42_spill] sm:$0xff] %v3475_v58  ;;  %v3499_v4 = vsel %vm491_vm1, %v3285_v63, %v901_v30  ;;  %v4887_v45 = vrot.slane %v3298_v11, 4  ;;  %v3513_v17 = vmul.f32 %v3194_v54, %v616_v33  ;;  %v4889_v11 = vrot.slane %v3250_v39, 4  ;;  %v3547_v33 = vld [vmem:[%s4771_s5 + $0x20] ss:$0 sm:$0xff] }
 0x197   :  { %v3525_v29 = vmul.f32 %v3211_v61, %v620_v35  ;;  %v4896_v61 = vld [vmem:[#allocation21_spill] sm:$0xff] }
 0x198   :  { %v3443_v49 = vpop.permute.xlu0 %754  ;;  %v3445_v10 = vpop.permute.xlu1 %2657  ;;  %v3504_v19 = vsel %vm491_vm1, %v901_v30, %v4887_v45  ;;  %v3520_v30 = vsel %vm491_vm1, %v4889_v11, %v911_v40  ;;  %v1021_v45 = vpack.c.bf16 %v3499_v4, %v3472_v36 }
 0x199   :  { %4883 = vst [vmem:[#allocation39_spill] sm:$0xff] %v3445_v10  ;;  %v4892_v40 = vunpack.i.h.bf16 %v3445_v10  ;;  %v4893_v36 = vunpack.i.l.bf16 %v3445_v10 }
 0x19b   :  { %v866_v35 = vsel %vm860_vm9, %v4893_v36, %v4892_v40 }
 0x19c   :  { %v3495_v41 = vpop.permute.xlu0 %795  ;;  %v661_v43 = vpop.permute.xlu1 %660 }
 0x19d   :  { %v665_v23 = vsel %vm664_vm4, %v3133_v31, %v661_v43  ;;  %v671_v16 = vsel %vm664_vm4, %v661_v43, %v4888_v52  ;;  %v3528_v43 = vmul.f32 %v3232_v15, %v618_v34  ;;  %v4895_v15 = vld [vmem:[#allocation12_spill] sm:$0xff] }
 0x19e   :  { %v689_v3 = vmul.f32 %v3197_v55, %v671_v16  ;;  %v692_v63 = vmul.f32 %v3205_v59, %v665_v23  ;;  %v4890_v16 = vunpack.i.h.bf16 %v3411_v38  ;;  %v4891_v23 = vunpack.i.l.bf16 %v3411_v38 }
 0x19f   :  { %v1028_v55 = vpack.c.bf16 %v3513_v17, %v3520_v30  ;;  %v4898_v17 = vrot.slane %v3340_v20, 4 }
 0x1a0   :  { %v764_v39 = vsel %vm762_vm8, %v4891_v23, %v4890_v16  ;;  %v929_v4 = vrot.slane %v689_v3, 4  ;;  %v932_v34 = vrot.slane %v692_v63, 4  ;;  %v702_v11 = vpop.permute.xlu1 %701  ;;  %v555_v54 = vpop.permute.xlu0 %554  ;;  %v4894_v23 = vld [vmem:[#allocation36_spill] sm:$0xff] }
 0x1a1   :  { %v716_v16 = vsel %vm713_vm5, %v702_v11, %v3369_v8  ;;  %v718_v60 = vsel %vm713_vm5, %v4894_v23, %v702_v11  ;;  %v569_v3 = vsel %vm566_vm3, %v555_v54, %v4895_v15  ;;  %v571_v63 = vsel %vm566_vm3, %v3120_v27, %v555_v54 }
 0x1a2   :  { %v3562_v40 = vmul.f32 %v3238_v14, %v718_v60  ;;  %v3565_v36 = vmul.f32 %v3244_v37, %v716_v16  ;;  %v592_v59 = vmul.f32 %v4896_v61, %v571_v63  ;;  %v3571_v11 = vmul.f32 %v3441_v7, %v764_v39 }
 0x1a3   :  { %v593_v15 = vmul.f32 %v4897_v42, %v569_v3  ;;  %v3575_v10 = vsel %vm491_vm1, %v932_v34, %v939_v25  ;;  %v3578_v27 = vmul.f32 %v3547_v33, %v866_v35  ;;  %v3583_v63 = vsel %vm491_vm1, %v3393_v26, %v932_v34  ;;  %v4899_v34 = vld [vmem:[#allocation33_spill] sm:$0xff] }
 0x1a4   :  { %v902_v60 = vrot.slane %v592_v59, 4  ;;  %v710_v16 = vpop.permute.xlu1 %709  ;;  %v2643_v37 = vpop.permute.xlu0 %2642  ;;  %v3588_v30 = vsel %vm491_vm1, %v929_v4, %v4898_v17  ;;  %v3604_v17 = vsel %vm491_vm1, %v3403_v48, %v929_v4  ;;  %v4902_v4 = vrot.slane %v3379_v12, 4 }
 0x1a5   :  { %v714_v25 = vsel %vm713_vm5, %v3369_v8, %v710_v16  ;;  %v720_v39 = vsel %vm713_vm5, %v710_v16, %v4894_v23  ;;  %v2645_v59 = vunpack.i.h.bf16 %v2643_v37  ;;  %v2644_v35 = vunpack.i.l.bf16 %v2643_v37 }
 0x1a6   :  { %v3598_v26 = vmul.f32 %v3229_v13, %v714_v25  ;;  %v1006_v20 = vsel %vm491_vm1, %v4899_v34, %v902_v60  ;;  %v903_v54 = vrot.slane %v593_v15, 4  ;;  %v4900_v8 = vunpack.i.l.bf16 %v3111_v22 }
 0x1a7   :  { %v4901_v37 = vunpack.i.h.bf16 %v3111_v22  ;;  %v1022_v25 = vpack.c.bf16 %v1006_v20, %v3466_v51  ;;  %v3616_v3 = vmul.f32 %v3247_v24, %v720_v39  ;;  %v813_v48 = vsel %vm811_vm6, %v2644_v35, %v2645_v59 }
 0x1a8   :  { %v819_v23 = vsel %vm811_vm6, %v2645_v59, %v4900_v8  ;;  %v4903_v15 = vrot.slane %v3562_v40, 4  ;;  %v751_v22 = vpop.permute.xlu1 %750  ;;  %v653_v13 = vpop.permute.xlu0 %652 }
 0x1a9   :  { %v815_v16 = vsel %vm811_vm6, %v4901_v37, %v2644_v35  ;;  %v3629_v37 = vmul.f32 %v3457_v44, %v819_v23  ;;  %v765_v51 = vsel %vm762_vm8, %v751_v22, %v3443_v49  ;;  %v767_v39 = vsel %vm762_vm8, %v3408_v1, %v751_v22  ;;  %1066 = vmatprep.subr.bf16.mxu0 %v1022_v25 }
 0x1aa   :  { %v3626_v8 = vsel %vm491_vm1, %v4903_v15, %v4902_v4  ;;  %v667_v12 = vsel %vm664_vm4, %v653_v13, %v3133_v31  ;;  %v3641_v59 = vmul.f32 %v3449_v57, %v815_v16  ;;  %v3644_v35 = vmul.f32 %v3460_v6, %v767_v39  ;;  %1067 = vmatpush1.bf16.msra.mxu0 %v1021_v45  ;;  %v4904_v31 = vld [vmem:[#allocation32_spill] sm:$0xff] }
 0x1ab   :  { %v669_v20 = vsel %vm664_vm4, %v4888_v52, %v653_v13  ;;  %v691_v23 = vmul.f32 %v3200_v56, %v667_v12  ;;  %v3651_v4 = vmul.f32 %v3453_v32, %v813_v48  ;;  %v1007_v25 = vsel %vm491_vm1, %v4904_v31, %v903_v54 }
 0x1ac   :  { %v690_v15 = vmul.f32 %v3181_v50, %v669_v20  ;;  %v4905_v16 = vrot.slane %v3307_v46, 4  ;;  %v3660_v39 = vmul.f32 %v3463_v5, %v765_v51  ;;  %v1037_v13 = vpack.c.bf16 %v3644_v35, %v3626_v8  ;;  %v759_v48 = vpop.permute.xlu1 %758  ;;  %v2648_v12 = vpop.permute.xlu0 %2647 }
 0x1ad   :  { %v1023_v52 = vpack.c.bf16 %v1007_v25, %v3469_v21  ;;  %v931_v34 = vrot.slane %v691_v23, 4  ;;  %v763_v46 = vsel %vm762_vm8, %v3443_v49, %v759_v48  ;;  %v4906_v51 = vrot.slane %v3372_v9, 4 }
 0x1ae   :  { %v908_v22 = vsel %vm491_vm1, %v902_v60, %v4905_v16  ;;  %v930_v20 = vrot.slane %v690_v15, 4  ;;  %v769_v60 = vsel %vm762_vm8, %v759_v48, %v3408_v1  ;;  %v4907_v21 = vrot.slane %v3598_v26, 4  ;;  %v4908_v1 = vld [vmem:[#allocation34_spill] sm:$0xff] }
 0x1af   :  { %v1026_v45 = vpack.c.bf16 %v3525_v29, %v908_v22  ;;  %1108 = vmatpush1.bf16.msra.mxu1 %v1023_v52  ;;  %v3680_v15 = vmul.f32 %v3441_v7, %v763_v46  ;;  %v2650_v23 = vunpack.i.h.bf16 %v2648_v12  ;;  %v2649_v31 = vunpack.i.l.bf16 %v2648_v12 }
 0x1b0   :  { %v3677_v29 = vsel %vm491_vm1, %v4907_v21, %v4906_v51  ;;  %v960_v49 = vrot.slane %v3616_v3, 4  ;;  %1109 = vmatprep.subr.bf16.mxu1 %v1028_v55  ;;  %v3684_v25 = vmul.f32 %v3475_v58, %v769_v60  ;;  %v4909_v16 = vrot.slane %v4908_v1, 4  ;;  %v808_v48 = vpop.permute.xlu1 %807  ;;  %v845_v12 = vpop.permute.xlu0 %844  ;;  %v4914_v21 = vld [vmem:[#allocation19_spill] sm:$0xff] }
 0x1b1   :  { %1068 = vmatprep.subr.bf16.mxu0 %v1026_v45  ;;  %v4910_v22 = vpack.c.bf16 %v3489_v0, %v3504_v19  ;;  %v1032_v52 = vpack.c.bf16 %v3575_v10, %v3583_v63  ;;  %v1039_v45 = vpack.c.bf16 %v3680_v15, %v3677_v29  ;;  %v4911_v3 = vunpack.i.l.bf16 %v3411_v38 }
 0x1b2   :  { %v910_v9 = vsel %vm491_vm1, %v903_v54, %v4909_v16  ;;  %v4912_v46 = vrot.slane %v3347_v53, 4  ;;  %v995_v0 = vrot.slane %v3629_v37, 4  ;;  %v768_v10 = vsel %vm762_vm8, %v2649_v31, %v2650_v23 }
 0x1b3   :  { %1069 = vmatpush1.bf16.msra.mxu0 %v4910_v22  ;;  %v766_v55 = vsel %vm762_vm8, %v2650_v23, %v4911_v3  ;;  %v4913_v63 = vunpack.i.h.bf16 %v3411_v38  ;;  %v1027_v51 = vpack.c.bf16 %v3528_v43, %v910_v9  ;;  %v812_v53 = vsel %vm811_vm6, %v4914_v21, %v808_v48  ;;  %v4916_v9 = vld [vmem:[#allocation38_spill] sm:$0xff] }
 0x1b4   :  { %v936_v54 = vsel %vm491_vm1, %v930_v20, %v4912_v46  ;;  %v3705_v19 = vmul.f32 %v3463_v5, %v766_v55  ;;  %v818_v37 = vsel %vm811_vm6, %v808_v48, %v3495_v41  ;;  %v1010_v1 = vsel %vm491_vm1, %v3406_v2, %v930_v20  ;;  %v4917_v2 = vld [vmem:[#allocation5_spill] sm:$0xff]  ;;  %v4919_v48 = vld [vmem:[#allocation6_spill] sm:$0xff] }
 0x1b5   :  { %v770_v60 = vsel %vm762_vm8, %v4913_v63, %v2649_v31  ;;  %v4915_v23 = vrot.slane %v3350_v18, 4  ;;  %1110 = vmatpush1.bf16.msra.mxu1 %v1027_v51  ;;  %v3726_v31 = vmul.f32 %v3453_v32, %v812_v53  ;;  %v839_v43 = vmul.f32 %v3457_v44, %v818_v37  ;;  %v853_v63 = vpop.permute.xlu1 %852  ;;  %v800_v51 = vpop.permute.xlu0 %799  ;;  %v4921_v37 = vld [vmem:[#allocation9_spill] sm:$0xff] }
 0x1b6   :  { %v1030_v16 = vpack.c.bf16 %v936_v54, %v1010_v1  ;;  %v1011_v22 = vsel %vm491_vm1, %v4916_v9, %v931_v34  ;;  %1111 = vmatprep.subr.bf16.mxu1 %v1032_v52  ;;  %v1029_v55 = vpack.c.bf16 %v3588_v30, %v3604_v17  ;;  %v1016_v18 = vsel %vm491_vm1, %v4917_v2, %v960_v49 }
 0x1b7   :  { %v938_v38 = vsel %vm491_vm1, %v931_v34, %v4915_v23  ;;  %v4918_v20 = vrot.slane %v3565_v36, 4  ;;  %v791_v54 = vmul.f32 %v3460_v6, %v768_v10  ;;  %v988_v53 = vrot.slane %v839_v43, 4  ;;  %v4920_v34 = vld [vmem:[#allocation10_spill] sm:$0xff] }
 0x1b8   :  { %v1031_v3 = vpack.c.bf16 %v938_v38, %v1011_v22  ;;  %1070 = vmatprep.subr.bf16.mxu0 %v1030_v16  ;;  %v1036_v52 = vpack.c.bf16 %v1016_v18, %v4920_v34  ;;  %v814_v30 = vsel %vm811_vm6, %v800_v51, %v4914_v21  ;;  %v816_v17 = vsel %vm811_vm6, %v3495_v41, %v800_v51  ;;  %v4923_v38 = vld [vmem:[#allocation3_spill] sm:$0xff]  ;;  %v4925_v16 = vld [vmem:[#allocation4_spill] sm:$0xff] }
 0x1b9   :  { %v1014_v46 = vsel %vm491_vm1, %v4919_v48, %v4918_v20  ;;  %1071 = vmatpush1.bf16.msra.mxu0 %v1029_v55  ;;  %v4922_v23 = vrot.slane %v3598_v26, 4  ;;  %v4924_v43 = vrot.slane %v3562_v40, 4  ;;  %v794_v22 = vmul.f32 %v3475_v58, %v770_v60  ;;  %v4926_v21 = vld [vmem:[#allocation31_spill] sm:$0xff]  ;;  %v4927_v26 = vld [vmem:[#allocation8_spill] sm:$0xff]  ;;  %v3770_v60 = vld [vmem:[%s4771_s5 + $0x38] ss:$0 sm:$0xff] }
 0x1ba   :  { %v1034_v1 = vpack.c.bf16 %v1014_v46, %v4921_v37  ;;  %v987_v55 = vrot.slane %v3726_v31, 4  ;;  %1112 = vmatpush1.bf16.msra.mxu1 %v1031_v3  ;;  %v836_v2 = vmul.f32 %v4926_v21, %v816_v17  ;;  %v837_v41 = vmul.f32 %v3449_v57, %v814_v30  ;;  %v4928_v20 = vld [vmem:[#allocation7_spill] sm:$0xff]  ;;  %v857_v31 = vpop.permute.xlu1 %856  ;;  %v849_v3 = vpop.permute.xlu0 %848 }
 0x1bb   :  { %v1015_v10 = vsel %vm491_vm1, %v4923_v38, %v4922_v23  ;;  %v1013_v9 = vsel %vm491_vm1, %v4925_v16, %v4924_v43  ;;  %1113 = vmatprep.subr.bf16.mxu1 %v1036_v52  ;;  %v4929_v40 = vrot.slane %v3400_v47, 4  ;;  %v4930_v46 = vrot.slane %v3565_v36, 4  ;;  %v3797_v43 = vld [vmem:[%s4771_s5 + $0x28] ss:$0 sm:$0xff] }
 0x1bc   :  { %1072 = vmatprep.subr.bf16.mxu0 %v1034_v1  ;;  %v1035_v18 = vpack.c.bf16 %v1015_v10, %v4927_v26  ;;  %v1033_v48 = vpack.c.bf16 %v1013_v9, %v4928_v20  ;;  %v991_v34 = vrot.slane %v3641_v59, 4  ;;  %v986_v52 = vrot.slane %v837_v41, 4  ;;  %v3802_v41 = vld [vmem:[%s4771_s5 + $0x30] ss:$0 sm:$0xff] }
 0x1bd   :  { %v964_v51 = vsel %vm491_vm1, %v4930_v46, %v4929_v40  ;;  %v4931_v37 = vrot.slane %v3386_v62, 4  ;;  %v996_v36 = vsel %vm491_vm1, %v988_v53, %v995_v0  ;;  %v985_v30 = vrot.slane %v836_v2, 4 }
 0x1be   :  { %v1038_v47 = vpack.c.bf16 %v3660_v39, %v964_v51  ;;  %1073 = vmatpush1.bf16.msra.mxu0 %v1033_v48  ;;  %v867_v23 = vsel %vm860_vm9, %v857_v31, %v845_v12  ;;  %v865_v38 = vsel %vm860_vm9, %v845_v12, %v849_v3  ;;  %v993_v59 = vrot.slane %v3651_v4, 4  ;;  %1114 = vmatpush1.bf16.msra.mxu1 %v1035_v18  ;;  %v2663_v10 = vpop.permute.xlu0 %2662  ;;  %v4934_v48 = vld [vmem:[#allocation39_spill] sm:$0xff] }
 0x1bf   :  { %v968_v1 = vsel %vm491_vm1, %v960_v49, %v4931_v37  ;;  %v861_v62 = vsel %vm860_vm9, %v853_v63, %v857_v31  ;;  %v888_v39 = vmul.f32 %v3770_v60, %v867_v23  ;;  %v863_v49 = vsel %vm860_vm9, %v849_v3, %v853_v63 }
 0x1c0   :  { %v1040_v17 = vpack.c.bf16 %v3684_v25, %v968_v1  ;;  %1074 = vmatprep.subr.bf16.mxu0 %v1038_v47  ;;  %v885_v25 = vmul.f32 %v3547_v33, %v865_v38  ;;  %v1020_v0 = vsel %vm491_vm1, %v794_v22, %v988_v53  ;;  %v992_v12 = vsel %vm491_vm1, %v986_v52, %v991_v34  ;;  %v4932_v22 = vld [vmem:[#allocation37_spill] sm:$0xff]  ;;  %v496_v47 = vld [vmem:[%s4772_s6] sm:$0x3] }
 0x1c1   :  { %v1018_v4 = vsel %vm491_vm1, %v3705_v19, %v986_v52  ;;  %v1044_v16 = vpack.c.bf16 %v996_v36, %v1020_v0  ;;  %v2665_v9 = vunpack.i.h.bf16 %v2663_v10  ;;  %v2664_v2 = vunpack.i.l.bf16 %v2663_v10 }
 0x1c2   :  { %1115 = vmatprep.subr.bf16.mxu1 %v1040_v17  ;;  %v1042_v63 = vpack.c.bf16 %v992_v12, %v1018_v4  ;;  %1075 = vmatpush1.bf16.msra.mxu0 %v1037_v13  ;;  %v994_v19 = vsel %vm491_vm1, %v987_v55, %v993_v59  ;;  %v1019_v53 = vsel %vm491_vm1, %v3571_v11, %v987_v55  ;;  %v4933_v26 = vrot.slane %v4932_v22, 4 }
 0x1c3   :  { %v1017_v20 = vsel %vm491_vm1, %v791_v54, %v985_v30  ;;  %1116 = vmatpush1.bf16.msra.mxu1 %v1039_v45  ;;  %v4935_v40 = vunpack.i.l.bf16 %v4934_v48  ;;  %v862_v35 = vsel %vm860_vm9, %v2664_v2, %v2665_v9  ;;  %v4936_v11 = vunpack.i.h.bf16 %v4934_v48 }
 0x1c4   :  { %v990_v18 = vsel %vm491_vm1, %v985_v30, %v4933_v26  ;;  %1076 = vmatprep.subr.bf16.mxu0 %v1042_v63  ;;  %v886_v54 = vmul.f32 %v3797_v43, %v863_v49  ;;  %1117 = vmatprep.subr.bf16.mxu1 %v1044_v16  ;;  %v887_v55 = vmul.f32 %v3802_v41, %v861_v62 }
 0x1c5   :  { %v868_v8 = vsel %vm860_vm9, %v2665_v9, %v4935_v40  ;;  %v864_v13 = vsel %vm860_vm9, %v4936_v11, %v2664_v2  ;;  %v1041_v45 = vpack.c.bf16 %v990_v18, %v1017_v20  ;;  %v1043_v46 = vpack.c.bf16 %v994_v19, %v1019_v53  ;;  %v1171_v18 = vld [vmem:[%s4773_s10] sm:$0xf] }
 0x1c6   :  { %v892_v29 = vmul.f32 %v3770_v60, %v868_v8  ;;  %v890_v15 = vmul.f32 %v3797_v43, %v864_v13  ;;  %v1045_v51 = vpack.c.bf16 %v3578_v27, %v885_v25  ;;  %v891_v31 = vmul.f32 %v3802_v41, %v862_v35  ;;  %v1172_v20 = vld [vmem:[%s4774_s11] sm:$0xf] }
 0x1c7   :  { %1077 = vmatpush1.bf16.msra.mxu0 %v1041_v45  ;;  %1118 = vmatpush1.bf16.msra.mxu1 %v1043_v46  ;;  %v4937_v27 = vmov 0  }
 0x1c8   :  { %v1046_v3 = vpack.c.bf16 %v890_v15, %v886_v54  ;;  %v1048_v34 = vpack.c.bf16 %v892_v29, %v888_v39  ;;  %v1047_v52 = vpack.c.bf16 %v891_v31, %v887_v55  ;;  %v1055_v37 = vsel %vm1053_vm10, %v1045_v51, 0 }
 0x1c9   :  { %v1160_v17 = vpop.permute.xlu1 %1159 }
 0x1ca   :  { %2554 = vmatprep.subr.msk.bf16.mxu0 %vm1053_vm10, %v1046_v3  ;;  %2556 = vmatprep.subr.msk.bf16.mxu1 %vm1053_vm10, %v1048_v34  ;;  %v1061_v1 = vsel %vm1053_vm10, %v1047_v52, 0 }
 0x1cb   :  { %1079 = vmatpush1.bf16.msra.mxu0 %v1055_v37  ;;  %1120 = vmatpush1.bf16.msra.mxu1 %v1061_v1 }
 0x1cd   :  { %v1151_v36 = vpop.permute.xlu0 %1150 }
 0x1ce   :  { %2555 = vmatmul.mubr.msk.bf16.vlgmr.msra.gmra.mrb[8].mxu0 %vm1049_vm11, %v496_v47  ;;  %2557 = vmatmul.mubr.msk.bf16.vlgmr.msra.gmra.mrb[8].mxu1 %vm1049_vm11, %v496_v47 }
 0x1cf   :  { %1426 = vmatprep.mubr.bf16.mxu0 %v4937_v27  ;;  %1467 = vmatprep.mubr.bf16.mxu1 %v4937_v27 }
 0x2a1   :  { %v1100_v30 = vpop.f32.mrb[8].mxu0  ;;  %v1141_v38 = vpop.f32.mrb[8].mxu1 }
 0x2a2   :  { %v1153_v23 = vmul.f32 %v1151_v36, %v1100_v30  ;;  %v1102_v59 = vpop.f32.mrb[9].mxu0  ;;  %v1155_v62 = vmul.f32 %v1151_v36, %v1141_v38  ;;  %v1143_v49 = vpop.f32.mrb[9].mxu1 }
 0x2a3   :  { %v1154_v39 = vmul.f32 %v1151_v36, %v1102_v59  ;;  %v1104_v25 = vpop.f32.mrb[10].mxu0  ;;  %v1156_v0 = vmul.f32 %v1151_v36, %v1143_v49  ;;  %v1145_v4 = vpop.f32.mrb[10].mxu1  ;;  %v4938_v36 = vld [vmem:[#allocation20_spill] sm:$0xff]  ;;  %v4940_v49 = vld [vmem:[#allocation17_spill] sm:$0xff] }
 0x2a4   :  { %v1162_v10 = vadd.f32 %v1160_v17, %v1153_v23  ;;  %v1105_v12 = vpop.f32.mrb[11].mxu0  ;;  %v1146_v9 = vpop.f32.mrb[11].mxu1  ;;  %v1164_v2 = vadd.f32 %v1160_v17, %v1155_v62 }
 0x2a5   :  { %v1163_v16 = vadd.f32 %v1160_v17, %v1154_v39  ;;  %v1165_v19 = vadd.f32 %v1160_v17, %v1156_v0  ;;  %v4939_v17 = vld [vmem:[#allocation15_spill] sm:$0xff] }
 0x2a6   :  { %v3838_v63 = vmax.f32 %v1162_v10, 0.0  ;;  %v3846_v22 = vmax.f32 %v1164_v2, 0.0 }
 0x2a7   :  { %v3840_v53 = vmax.f32 %v1163_v16, 0.0  ;;  %v3848_v26 = vmax.f32 %v1165_v19, 0.0 }
 0x2a8   :  { %1189 = vrot.lane.b32.xlu1 %v3838_v63, %s2734_s2 }
 0x2a9   :  { %1191 = vrot.lane.b32.xlu0 %v3840_v53, %s2734_s2 }
 0x2ac   :  { %1193 = vrot.lane.b32.xlu1 %v3846_v22, %s2734_s2 }
 0x2ad   :  { %1195 = vrot.lane.b32.xlu0 %v3848_v26, %s2734_s2 }
 0x2b0   :  { %1221 = vrot.lane.b32.xlu1 %v3838_v63, %s2735_s4 }
 0x2b1   :  { %1223 = vrot.lane.b32.xlu0 %v3840_v53, %s2735_s4 }
 0x2b4   :  { %1225 = vrot.lane.b32.xlu1 %v3846_v22, %s2735_s4 }
 0x2b5   :  { %1227 = vrot.lane.b32.xlu0 %v3848_v26, %s2735_s4 }
 0x2b8   :  { %1173 = vrot.lane.b32.xlu1 %v3838_v63, %s2733_s1 }
 0x2b9   :  { %1175 = vrot.lane.b32.xlu0 %v3840_v53, %s2733_s1 }
 0x2bc   :  { %1177 = vrot.lane.b32.xlu1 %v3846_v22, %s2733_s1 }
 0x2bd   :  { %1179 = vrot.lane.b32.xlu0 %v3848_v26, %s2733_s1 }
 0x2c0   :  { %1205 = vrot.lane.b32.xlu1 %v3838_v63, %s2736_s21 }
 0x2c1   :  { %1207 = vrot.lane.b32.xlu0 %v3840_v53, %s2736_s21 }
 0x2c4   :  { %1209 = vrot.lane.b32.xlu1 %v3846_v22, %s2736_s21 }
 0x2c5   :  { %1211 = vrot.lane.b32.xlu0 %v3848_v26, %s2736_s21 }
 0x2c8   :  { %1237 = vrot.lane.b32.xlu1 %v3838_v63, %s2737_s22 }
 0x2c9   :  { %1239 = vrot.lane.b32.xlu0 %v3840_v53, %s2737_s22 }
 0x2cc   :  { %1241 = vrot.lane.b32.xlu1 %v3846_v22, %s2737_s22 }
 0x2cd   :  { %1243 = vrot.lane.b32.xlu0 %v3848_v26, %s2737_s22 }
 0x2d0   :  { %1269 = vrot.lane.b32.xlu1 %v3838_v63, %s2738_s23 }
 0x2d1   :  { %1271 = vrot.lane.b32.xlu0 %v3840_v53, %s2738_s23 }
 0x2d4   :  { %1273 = vrot.lane.b32.xlu1 %v3846_v22, %s2738_s23 }
 0x2d5   :  { %1275 = vrot.lane.b32.xlu0 %v3848_v26, %s2738_s23 }
 0x2d8   :  { %1253 = vrot.lane.b32.xlu1 %v3838_v63, %s2739_s24 }
 0x2d9   :  { %1255 = vrot.lane.b32.xlu0 %v3840_v53, %s2739_s24 }
 0x2dc   :  { %1257 = vrot.lane.b32.xlu1 %v3846_v22, %s2739_s24 }
 0x2dd   :  { %1259 = vrot.lane.b32.xlu0 %v3848_v26, %s2739_s24 }
 0x2e0   :  { %1285 = vrot.lane.b32.xlu1 %v3838_v63, %s2740_s25 }
 0x2e1   :  { %1287 = vrot.lane.b32.xlu0 %v3840_v53, %s2740_s25 }
 0x2e4   :  { %1289 = vrot.lane.b32.xlu1 %v3846_v22, %s2740_s25 }
 0x2e5   :  { %1291 = vrot.lane.b32.xlu0 %v3848_v26, %s2740_s25 }
 0x2e8   :  { %1478 = vperm.xlu1 %2667, %v1171_v18  }
 0x2e9   :  { %1487 = vperm.xlu0 %2666, %v1172_v20  }
 0x31a   :  { %v1190_v48 = vpop.permute.xlu1 %1189 }
 0x31b   :  { %v1192_v40 = vpop.permute.xlu0 %1191 }
 0x31c   :  { %v1199_v55 = vsel %vm566_vm3, %v1190_v48, %v1192_v40 }
 0x31d   :  { %v1202_v34 = vmul.f32 %v1199_v55, %v4896_v61 }
 0x31e   :  { %v1194_v8 = vpop.permute.xlu1 %1193 }
 0x31f   :  { %v1196_v35 = vpop.permute.xlu0 %1195  ;;  %v1198_v47 = vsel %vm566_vm3, %v1192_v40, %v1194_v8  ;;  %v1306_v10 = vrot.slane %v1202_v34, 4 }
 0x320   :  { %v1200_v46 = vsel %vm566_vm3, %v1196_v35, %v1190_v48  ;;  %v1197_v51 = vsel %vm566_vm3, %v1194_v8, %v1196_v35  ;;  %v1203_v12 = vmul.f32 %v1198_v47, %v4897_v42  ;;  %v4941_v48 = vld [vmem:[#allocation24_spill] sm:$0xff]  ;;  %v4942_v8 = vld [vmem:[#allocation25_spill] sm:$0xff] }
 0x321   :  { %v1201_v30 = vmul.f32 %v1200_v46, %v4938_v36  ;;  %v1204_v23 = vmul.f32 %v1197_v51, %v4939_v17  ;;  %v4947_v47 = vld [vmem:[#allocation29_spill] sm:$0xff] }
 0x322   :  { %v1222_v11 = vpop.permute.xlu1 %1221 }
 0x323   :  { %v1224_v13 = vpop.permute.xlu0 %1223  ;;  %v1305_v9 = vrot.slane %v1201_v30, 4 }
 0x324   :  { %v1231_v31 = vsel %vm664_vm4, %v1222_v11, %v1224_v13 }
 0x325   :  { %v1234_v38 = vmul.f32 %v1231_v31, %v3181_v50  ;;  %v4945_v31 = vld [vmem:[#allocation16_spill] sm:$0xff] }
 0x326   :  { %v1226_v54 = vpop.permute.xlu1 %1225 }
 0x327   :  { %v1228_v29 = vpop.permute.xlu0 %1227  ;;  %v1230_v52 = vsel %vm664_vm4, %v1224_v13, %v1226_v54  ;;  %v1318_v20 = vrot.slane %v1234_v38, 4 }
 0x328   :  { %v1235_v59 = vmul.f32 %v1230_v52, %v3200_v56  ;;  %v1229_v62 = vsel %vm664_vm4, %v1226_v54, %v1228_v29  ;;  %v1232_v39 = vsel %vm664_vm4, %v1228_v29, %v1222_v11  ;;  %v4943_v11 = vld [vmem:[#allocation27_spill] sm:$0xff]  ;;  %v1308_v54 = vrot.slane %v1204_v23, 4 }
 0x329   :  { %v1233_v40 = vmul.f32 %v1232_v39, %v4941_v48  ;;  %v1236_v35 = vmul.f32 %v1229_v62, %v4942_v8 }
 0x32a   :  { %v1174_v15 = vpop.permute.xlu1 %1173  ;;  %v1319_v29 = vrot.slane %v1235_v59, 4 }
 0x32b   :  { %v1176_v45 = vpop.permute.xlu0 %1175  ;;  %v1317_v62 = vrot.slane %v1233_v40, 4  ;;  %v1320_v39 = vrot.slane %v1236_v35, 4 }
 0x32c   :  { %v1183_v37 = vsel %vm517_vm2, %v1174_v15, %v1176_v45 }
 0x32d   :  { %v1186_v25 = vmul.f32 %v1183_v37, %v4940_v49 }
 0x32e   :  { %v1178_v3 = vpop.permute.xlu1 %1177 }
 0x32f   :  { %v1180_v1 = vpop.permute.xlu0 %1179  ;;  %v1182_v4 = vsel %vm517_vm2, %v1176_v45, %v1178_v3  ;;  %v4944_v45 = vld [vmem:[#allocation18_spill] sm:$0xff]  ;;  %v1350_v51 = vsel %vm491_vm1, %v1186_v25, %v1306_v10 }
 0x330   :  { %v1181_v2 = vsel %vm517_vm2, %v1178_v3, %v1180_v1  ;;  %v1184_v19 = vsel %vm517_vm2, %v1180_v1, %v1174_v15  ;;  %v1187_v55 = vmul.f32 %v1182_v4, %v4944_v45  ;;  %v4946_v15 = vld [vmem:[#allocation14_spill] sm:$0xff]  ;;  %v4949_v4 = vld [vmem:[#allocation23_spill] sm:$0xff] }
 0x331   :  { %v1185_v3 = vmul.f32 %v1184_v19, %v4945_v31  ;;  %v1188_v34 = vmul.f32 %v1181_v2, %v4946_v15  ;;  %v4948_v25 = vld [vmem:[#allocation26_spill] sm:$0xff]  ;;  %v1307_v19 = vrot.slane %v1203_v12, 4 }
 0x332   :  { %v1206_v0 = vpop.permute.xlu1 %1205 }
 0x333   :  { %v1208_v16 = vpop.permute.xlu0 %1207 }
 0x334   :  { %v1215_v18 = vsel %vm615_vm7, %v1206_v0, %v1208_v16 }
 0x335   :  { %v1218_v13 = vmul.f32 %v1215_v18, %v4943_v11 }
 0x336   :  { %v1210_v46 = vpop.permute.xlu1 %1209 }
 0x337   :  { %v1214_v52 = vsel %vm615_vm7, %v1208_v16, %v1210_v46  ;;  %v1212_v37 = vpop.permute.xlu0 %1211  ;;  %v1354_v1 = vsel %vm491_vm1, %v1218_v13, %v1318_v20  ;;  %v1349_v13 = vsel %vm491_vm1, %v1185_v3, %v1305_v9 }
 0x338   :  { %v1219_v30 = vmul.f32 %v1214_v52, %v4947_v47  ;;  %v1213_v23 = vsel %vm615_vm7, %v1210_v46, %v1212_v37  ;;  %v1216_v38 = vsel %vm615_vm7, %v1212_v37, %v1206_v0  ;;  %v1366_v59 = vpack.c.bf16 %v1354_v1, %v1350_v51 }
 0x339   :  { %v1217_v10 = vmul.f32 %v1216_v38, %v4948_v25  ;;  %v1220_v2 = vmul.f32 %v1213_v23, %v4949_v4  ;;  %v1352_v52 = vsel %vm491_vm1, %v1188_v34, %v1308_v54  ;;  %v1351_v51 = vsel %vm491_vm1, %v1187_v55, %v1307_v19 }
 0x33a   :  { %v1238_v16 = vpop.permute.xlu1 %1237  ;;  %1394 = vmatprep.subr.bf16.mxu0 %v1366_v59  ;;  %v1355_v18 = vsel %vm491_vm1, %v1219_v30, %v1319_v29 }
 0x33b   :  { %v1240_v20 = vpop.permute.xlu0 %1239  ;;  %v1353_v46 = vsel %vm491_vm1, %v1217_v10, %v1317_v62  ;;  %v1356_v0 = vsel %vm491_vm1, %v1220_v2, %v1320_v39  ;;  %v1367_v37 = vpack.c.bf16 %v1355_v18, %v1351_v51  ;;  %v4950_v10 = vld [vmem:[#allocation30_spill] sm:$0xff] }
 0x33c   :  { %v1365_v40 = vpack.c.bf16 %v1353_v46, %v1349_v13  ;;  %v1368_v35 = vpack.c.bf16 %v1356_v0, %v1352_v52  ;;  %v1247_v9 = vsel %vm713_vm5, %v1238_v16, %v1240_v20 }
 0x33d   :  { %v1249_v39 = vmul.f32 %v1247_v9, %v3238_v14 }
 0x33e   :  { %v1242_v1 = vpop.permute.xlu1 %1241  ;;  %1395 = vmatpush1.bf16.msra.mxu0 %v1365_v40  ;;  %1435 = vmatprep.subr.bf16.mxu1 %v1368_v35 }
 0x33f   :  { %1436 = vmatpush1.bf16.msra.mxu1 %v1367_v37  ;;  %v1244_v12 = vpop.permute.xlu0 %1243  ;;  %v1246_v54 = vsel %vm713_vm5, %v1240_v20, %v1242_v1  ;;  %v4951_v20 = vld [vmem:[#allocation28_spill] sm:$0xff] }
 0x340   :  { %v1248_v3 = vsel %vm713_vm5, %v1244_v12, %v1238_v16  ;;  %v1245_v55 = vsel %vm713_vm5, %v1242_v1, %v1244_v12  ;;  %v1250_v2 = vmul.f32 %v1246_v54, %v4950_v10  ;;  %v1329_v1 = vrot.slane %v1249_v39, 4 }
 0x341   :  { %v1252_v19 = vmul.f32 %v1248_v3, %v3247_v24  ;;  %v1251_v13 = vmul.f32 %v1245_v55, %v4951_v20 }
 0x342   :  { %v1270_v29 = vpop.permute.xlu1 %1269  ;;  %v1330_v12 = vrot.slane %v1250_v2, 4 }
 0x343   :  { %v1272_v30 = vpop.permute.xlu0 %1271 }
 0x344   :  { %v1279_v38 = vsel %vm811_vm6, %v1270_v29, %v1272_v30 }
 0x345   :  { %v1281_v46 = vmul.f32 %v1279_v38, %v4926_v21 }
 0x346   :  { %v1274_v23 = vpop.permute.xlu1 %1273 }
 0x347   :  { %v1276_v34 = vpop.permute.xlu0 %1275  ;;  %v1278_v59 = vsel %vm811_vm6, %v1272_v30, %v1274_v23  ;;  %v1341_v9 = vrot.slane %v1281_v46, 4  ;;  %v1358_v46 = vsel %vm491_vm1, %v3840_v53, %v1330_v12 }
 0x348   :  { %v1277_v62 = vsel %vm811_vm6, %v1274_v23, %v1276_v34  ;;  %v1280_v16 = vsel %vm811_vm6, %v1276_v34, %v1270_v29  ;;  %v1282_v52 = vmul.f32 %v1278_v59, %v3449_v57  ;;  %v1332_v29 = vrot.slane %v1252_v19, 4 }
 0x349   :  { %v1283_v40 = vmul.f32 %v1277_v62, %v3453_v32  ;;  %v1284_v51 = vmul.f32 %v1280_v16, %v3457_v44  ;;  %v1331_v23 = vrot.slane %v1251_v13, 4 }
 0x34a   :  { %v1254_v18 = vpop.permute.xlu1 %1253  ;;  %v1342_v54 = vrot.slane %v1282_v52, 4 }
 0x34b   :  { %v1256_v0 = vpop.permute.xlu0 %1255  ;;  %v1343_v55 = vrot.slane %v1283_v40, 4  ;;  %v1344_v39 = vrot.slane %v1284_v51, 4  ;;  %v1360_v40 = vsel %vm491_vm1, %v3848_v26, %v1332_v29 }
 0x34c   :  { %v1263_v35 = vsel %vm762_vm8, %v1254_v18, %v1256_v0 }
 0x34d   :  { %v1265_v37 = vmul.f32 %v1263_v35, %v3460_v6 }
 0x34e   :  { %v1258_v30 = vpop.permute.xlu1 %1257 }
 0x34f   :  { %v1262_v3 = vsel %vm762_vm8, %v1256_v0, %v1258_v30  ;;  %v1260_v34 = vpop.permute.xlu0 %1259  ;;  %v1361_v16 = vsel %vm491_vm1, %v1265_v37, %v1341_v9  ;;  %v1357_v0 = vsel %vm491_vm1, %v3838_v63, %v1329_v1 }
 0x350   :  { %v1266_v38 = vmul.f32 %v1262_v3, %v3463_v5  ;;  %v1261_v59 = vsel %vm762_vm8, %v1258_v30, %v1260_v34  ;;  %v1264_v62 = vsel %vm762_vm8, %v1260_v34, %v1254_v18  ;;  %v1359_v30 = vsel %vm491_vm1, %v3846_v22, %v1331_v23 }
 0x351   :  { %v1267_v2 = vmul.f32 %v1261_v59, %v3441_v7  ;;  %v1268_v19 = vmul.f32 %v1264_v62, %v3475_v58  ;;  %v1369_v12 = vpack.c.bf16 %v1361_v16, %v1357_v0 }
 0x352   :  { %v1286_v13 = vpop.permute.xlu1 %1285  ;;  %v1362_v52 = vsel %vm491_vm1, %v1266_v38, %v1342_v54 }
 0x353   :  { %v1288_v18 = vpop.permute.xlu0 %1287  ;;  %v1370_v35 = vpack.c.bf16 %v1362_v52, %v1358_v46  ;;  %v1364_v51 = vsel %vm491_vm1, %v1268_v19, %v1344_v39  ;;  %v1363_v37 = vsel %vm491_vm1, %v1267_v2, %v1343_v55  ;;  %v1170_v19 = vld [vmem:[%s4775_s9] sm:$0x3] }
 0x354   :  { %v1295_v53 = vsel %vm860_vm9, %v1286_v13, %v1288_v18  ;;  %v1372_v9 = vpack.c.bf16 %v1364_v51, %v1360_v40  ;;  %v1371_v54 = vpack.c.bf16 %v1363_v37, %v1359_v30 }
 0x355   :  { %v1297_v63 = vmul.f32 %v3547_v33, %v1295_v53  ;;  %1396 = vmatprep.subr.bf16.mxu0 %v1370_v35 }
 0x356   :  { %v1290_v1 = vpop.permute.xlu1 %1289  ;;  %1397 = vmatpush1.bf16.msra.mxu0 %v1369_v12  ;;  %1437 = vmatprep.subr.bf16.mxu1 %v1372_v9 }
 0x357   :  { %v1294_v26 = vsel %vm860_vm9, %v1288_v18, %v1290_v1  ;;  %1438 = vmatpush1.bf16.msra.mxu1 %v1371_v54  ;;  %v1292_v29 = vpop.permute.xlu0 %1291  ;;  %v1373_v22 = vpack.c.bf16 %v1297_v63, %v1297_v63 }
 0x358   :  { %v1298_v23 = vmul.f32 %v3797_v43, %v1294_v26  ;;  %v1293_v3 = vsel %vm860_vm9, %v1290_v1, %v1292_v29  ;;  %v1296_v34 = vsel %vm860_vm9, %v1292_v29, %v1286_v13 }
 0x359   :  { %v1299_v33 = vmul.f32 %v3802_v41, %v1293_v3  ;;  %v1300_v55 = vmul.f32 %v3770_v60, %v1296_v34  ;;  %v1383_v39 = vsel %vm1381_vm12, %v1373_v22, 0  ;;  %v2563_v34 = vld [vmem:[%s4773_s10 + $0x4] sm:$0xf] }
 0x35a   :  { %v1374_v38 = vpack.c.bf16 %v1298_v23, %v1298_v23 }
 0x35b   :  { %v1375_v59 = vpack.c.bf16 %v1299_v33, %v1299_v33  ;;  %v1376_v62 = vpack.c.bf16 %v1300_v55, %v1300_v55  ;;  %v2564_v33 = vld [vmem:[%s4774_s11 + $0x4] sm:$0xf] }
 0x35c   :  { %2558 = vmatprep.subr.msk.bf16.mxu0 %vm1381_vm12, %v1374_v38 }
 0x35d   :  { %1399 = vmatpush1.bf16.msra.mxu0 %v1383_v39  ;;  %2560 = vmatprep.subr.msk.bf16.mxu1 %vm1381_vm12, %v1376_v62  ;;  %v1389_v2 = vsel %vm1381_vm12, %v1375_v59, 0 }
 0x35e   :  { %1440 = vmatpush1.bf16.msra.mxu1 %v1389_v2 }
 0x360   :  { %2559 = vmatmul.mubr.msk.bf16.vlgmr.msra.gmra.mrb[12].mxu0 %vm1377_vm13, %v1170_v19 }
 0x361   :  { %2561 = vmatmul.mubr.msk.bf16.vlgmr.msra.gmra.mrb[12].mxu1 %vm1377_vm13, %v1170_v19  ;;  %1755 = vmatprep.mubr.bf16.mxu0 %v4937_v27 }
 0x362   :  { %1796 = vmatprep.mubr.bf16.mxu1 %v4937_v27 }
 0x367   :  { %v1479_v16 = vpop.permute.xlu1 %1478 }
 0x368   :  { %v1488_v13 = vpop.permute.xlu0 %1487 }
 0x433   :  { %v1428_v46 = vpop.f32.mrb[12].mxu0 }
 0x434   :  { %v1481_v52 = vmul.f32 %v1479_v16, %v1428_v46  ;;  %v1430_v0 = vpop.f32.mrb[13].mxu0  ;;  %v1469_v40 = vpop.f32.mrb[12].mxu1 }
 0x435   :  { %v1482_v18 = vmul.f32 %v1479_v16, %v1430_v0  ;;  %v1483_v35 = vmul.f32 %v1479_v16, %v1469_v40  ;;  %v1432_v51 = vpop.f32.mrb[14].mxu0  ;;  %v1471_v30 = vpop.f32.mrb[13].mxu1 }
 0x436   :  { %v1490_v37 = vadd.f32 %v1488_v13, %v1481_v52  ;;  %v1484_v53 = vmul.f32 %v1479_v16, %v1471_v30  ;;  %v1433_v12 = vpop.f32.mrb[15].mxu0  ;;  %v1473_v9 = vpop.f32.mrb[14].mxu1 }
 0x437   :  { %v1491_v54 = vadd.f32 %v1488_v13, %v1482_v18  ;;  %v1474_v63 = vpop.f32.mrb[15].mxu1  ;;  %v1492_v26 = vadd.f32 %v1488_v13, %v1483_v35 }
 0x438   :  { %v4043_v1 = vmax.f32 %v1490_v37, 0.0  ;;  %v1493_v22 = vadd.f32 %v1488_v13, %v1484_v53 }
 0x439   :  { %v4045_v29 = vmax.f32 %v1491_v54, 0.0  ;;  %v4051_v23 = vmax.f32 %v1492_v26, 0.0 }
 0x43a   :  { %1520 = vrot.lane.b32.xlu1 %v4043_v1, %s2734_s2  ;;  %v4053_v3 = vmax.f32 %v1493_v22, 0.0 }
 0x43b   :  { %1522 = vrot.lane.b32.xlu0 %v4045_v29, %s2734_s2 }
 0x43e   :  { %1524 = vrot.lane.b32.xlu1 %v4051_v23, %s2734_s2 }
 0x43f   :  { %1526 = vrot.lane.b32.xlu0 %v4053_v3, %s2734_s2 }
 0x442   :  { %1552 = vrot.lane.b32.xlu1 %v4043_v1, %s2735_s4 }
 0x443   :  { %1554 = vrot.lane.b32.xlu0 %v4045_v29, %s2735_s4 }
 0x446   :  { %1556 = vrot.lane.b32.xlu1 %v4051_v23, %s2735_s4 }
 0x447   :  { %1558 = vrot.lane.b32.xlu0 %v4053_v3, %s2735_s4 }
 0x44a   :  { %1504 = vrot.lane.b32.xlu1 %v4043_v1, %s2733_s1 }
 0x44b   :  { %1506 = vrot.lane.b32.xlu0 %v4045_v29, %s2733_s1 }
 0x44e   :  { %1508 = vrot.lane.b32.xlu1 %v4051_v23, %s2733_s1 }
 0x44f   :  { %1510 = vrot.lane.b32.xlu0 %v4053_v3, %s2733_s1 }
 0x452   :  { %1536 = vrot.lane.b32.xlu1 %v4043_v1, %s2736_s21 }
 0x453   :  { %1538 = vrot.lane.b32.xlu0 %v4045_v29, %s2736_s21 }
 0x456   :  { %1540 = vrot.lane.b32.xlu1 %v4051_v23, %s2736_s21 }
 0x457   :  { %1542 = vrot.lane.b32.xlu0 %v4053_v3, %s2736_s21 }
 0x45a   :  { %1568 = vrot.lane.b32.xlu1 %v4043_v1, %s2737_s22 }
 0x45b   :  { %1570 = vrot.lane.b32.xlu0 %v4045_v29, %s2737_s22 }
 0x45e   :  { %1572 = vrot.lane.b32.xlu1 %v4051_v23, %s2737_s22 }
 0x45f   :  { %1574 = vrot.lane.b32.xlu0 %v4053_v3, %s2737_s22 }
 0x462   :  { %1600 = vrot.lane.b32.xlu1 %v4043_v1, %s2738_s23 }
 0x463   :  { %1602 = vrot.lane.b32.xlu0 %v4045_v29, %s2738_s23 }
 0x466   :  { %1604 = vrot.lane.b32.xlu1 %v4051_v23, %s2738_s23 }
 0x467   :  { %1606 = vrot.lane.b32.xlu0 %v4053_v3, %s2738_s23 }
 0x46a   :  { %1584 = vrot.lane.b32.xlu1 %v4043_v1, %s2739_s24 }
 0x46b   :  { %1586 = vrot.lane.b32.xlu0 %v4045_v29, %s2739_s24 }
 0x46e   :  { %1588 = vrot.lane.b32.xlu1 %v4051_v23, %s2739_s24 }
 0x46f   :  { %1590 = vrot.lane.b32.xlu0 %v4053_v3, %s2739_s24 }
 0x472   :  { %1616 = vrot.lane.b32.xlu1 %v4043_v1, %s2740_s25 }
 0x473   :  { %1618 = vrot.lane.b32.xlu0 %v4045_v29, %s2740_s25 }
 0x476   :  { %1620 = vrot.lane.b32.xlu1 %v4051_v23, %s2740_s25 }
 0x477   :  { %1622 = vrot.lane.b32.xlu0 %v4053_v3, %s2740_s25 }
 0x47a   :  { %1807 = vperm.xlu1 %2667, %v2563_v34  }
 0x47b   :  { %1816 = vperm.xlu0 %2666, %v2564_v33  }
 0x4ac   :  { %v1521_v55 = vpop.permute.xlu1 %1520 }
 0x4ad   :  { %v1523_v38 = vpop.permute.xlu0 %1522 }
 0x4ae   :  { %v1530_v52 = vsel %vm566_vm3, %v1521_v55, %v1523_v38 }
 0x4af   :  { %v1533_v51 = vmul.f32 %v1530_v52, %v4896_v61 }
 0x4b0   :  { %v1525_v59 = vpop.permute.xlu1 %1524 }
 0x4b1   :  { %v1527_v62 = vpop.permute.xlu0 %1526  ;;  %v1529_v12 = vsel %vm566_vm3, %v1523_v38, %v1525_v59 }
 0x4b2   :  { %v1531_v0 = vsel %vm566_vm3, %v1527_v62, %v1521_v55  ;;  %v1528_v40 = vsel %vm566_vm3, %v1525_v59, %v1527_v62  ;;  %v1637_v62 = vrot.slane %v1533_v51, 4  ;;  %v1534_v38 = vmul.f32 %v1529_v12, %v4897_v42 }
 0x4b3   :  { %v1532_v9 = vmul.f32 %v1531_v0, %v4938_v36  ;;  %v1535_v54 = vmul.f32 %v1528_v40, %v4939_v17 }
 0x4b4   :  { %v1553_v39 = vpop.permute.xlu1 %1552 }
 0x4b5   :  { %v1555_v2 = vpop.permute.xlu0 %1554  ;;  %v1636_v52 = vrot.slane %v1532_v9, 4 }
 0x4b6   :  { %v1562_v18 = vsel %vm664_vm4, %v1553_v39, %v1555_v2 }
 0x4b7   :  { %v1565_v63 = vmul.f32 %v1562_v18, %v3181_v50 }
 0x4b8   :  { %v1557_v19 = vpop.permute.xlu1 %1556 }
 0x4b9   :  { %v1559_v16 = vpop.permute.xlu0 %1558  ;;  %v1561_v30 = vsel %vm664_vm4, %v1555_v2, %v1557_v19 }
 0x4ba   :  { %v1566_v26 = vmul.f32 %v1561_v30, %v3200_v56  ;;  %v1560_v22 = vsel %vm664_vm4, %v1557_v19, %v1559_v16  ;;  %v1563_v34 = vsel %vm664_vm4, %v1559_v16, %v1553_v39  ;;  %v1649_v16 = vrot.slane %v1565_v63, 4 }
 0x4bb   :  { %v1564_v40 = vmul.f32 %v1563_v34, %v4941_v48  ;;  %v1567_v18 = vmul.f32 %v1560_v22, %v4942_v8  ;;  %v1639_v30 = vrot.slane %v1535_v54, 4 }
 0x4bc   :  { %v1505_v13 = vpop.permute.xlu1 %1504 }
 0x4bd   :  { %v1507_v46 = vpop.permute.xlu0 %1506 }
 0x4be   :  { %v1514_v37 = vsel %vm517_vm2, %v1505_v13, %v1507_v46 }
 0x4bf   :  { %v1517_v33 = vmul.f32 %v1514_v37, %v4940_v49 }
 0x4c0   :  { %v1509_v35 = vpop.permute.xlu1 %1508 }
 0x4c1   :  { %v1511_v53 = vpop.permute.xlu0 %1510  ;;  %v1513_v59 = vsel %vm517_vm2, %v1507_v46, %v1509_v35  ;;  %v1650_v46 = vrot.slane %v1566_v26, 4 }
 0x4c2   :  { %v1512_v0 = vsel %vm517_vm2, %v1509_v35, %v1511_v53  ;;  %v1515_v19 = vsel %vm517_vm2, %v1511_v53, %v1505_v13  ;;  %v1518_v37 = vmul.f32 %v1513_v59, %v4944_v45  ;;  %v1681_v35 = vsel %vm491_vm1, %v1517_v33, %v1637_v62 }
 0x4c3   :  { %v1516_v9 = vmul.f32 %v1515_v19, %v4945_v31  ;;  %v1519_v13 = vmul.f32 %v1512_v0, %v4946_v15  ;;  %v1648_v33 = vrot.slane %v1564_v40, 4  ;;  %v1651_v62 = vrot.slane %v1567_v18, 4 }
 0x4c4   :  { %v1537_v55 = vpop.permute.xlu1 %1536 }
 0x4c5   :  { %v1539_v2 = vpop.permute.xlu0 %1538 }
 0x4c6   :  { %v1546_v39 = vsel %vm615_vm7, %v1537_v55, %v1539_v2 }
 0x4c7   :  { %v1549_v51 = vmul.f32 %v1546_v39, %v4943_v11  ;;  %v1638_v39 = vrot.slane %v1534_v38, 4 }
 0x4c8   :  { %v1541_v12 = vpop.permute.xlu1 %1540 }
 0x4c9   :  { %v1545_v53 = vsel %vm615_vm7, %v1539_v2, %v1541_v12  ;;  %v1543_v63 = vpop.permute.xlu0 %1542  ;;  %v1685_v34 = vsel %vm491_vm1, %v1549_v51, %v1649_v16  ;;  %v1680_v16 = vsel %vm491_vm1, %v1516_v9, %v1636_v52  ;;  %v1682_v40 = vsel %vm491_vm1, %v1518_v37, %v1638_v39 }
 0x4ca   :  { %v1550_v22 = vmul.f32 %v1545_v53, %v4947_v47  ;;  %v1544_v54 = vsel %vm615_vm7, %v1541_v12, %v1543_v63  ;;  %v1547_v26 = vsel %vm615_vm7, %v1543_v63, %v1537_v55  ;;  %v1697_v59 = vpack.c.bf16 %v1685_v34, %v1681_v35 }
 0x4cb   :  { %v1548_v19 = vmul.f32 %v1547_v26, %v4948_v25  ;;  %v1551_v0 = vmul.f32 %v1544_v54, %v4949_v4  ;;  %v1683_v53 = vsel %vm491_vm1, %v1519_v13, %v1639_v30 }
 0x4cc   :  { %v1686_v2 = vsel %vm491_vm1, %v1550_v22, %v1650_v46  ;;  %v1569_v15 = vpop.permute.xlu1 %1568  ;;  %1723 = vmatprep.subr.bf16.mxu0 %v1697_v59 }
 0x4cd   :  { %v1684_v51 = vsel %vm491_vm1, %v1548_v19, %v1648_v33  ;;  %v1571_v12 = vpop.permute.xlu0 %1570  ;;  %v1687_v55 = vsel %vm491_vm1, %v1551_v0, %v1651_v62  ;;  %v1698_v63 = vpack.c.bf16 %v1686_v2, %v1682_v40 }
 0x4ce   :  { %v1696_v18 = vpack.c.bf16 %v1684_v51, %v1680_v16  ;;  %v1699_v35 = vpack.c.bf16 %v1687_v55, %v1683_v53  ;;  %v1578_v9 = vsel %vm713_vm5, %v1569_v15, %v1571_v12 }
 0x4cf   :  { %v1580_v62 = vmul.f32 %v1578_v9, %v3238_v14 }
 0x4d0   :  { %v1573_v34 = vpop.permute.xlu1 %1572  ;;  %1724 = vmatpush1.bf16.msra.mxu0 %v1696_v18  ;;  %1764 = vmatprep.subr.bf16.mxu1 %v1699_v35 }
 0x4d1   :  { %1765 = vmatpush1.bf16.msra.mxu1 %v1698_v63  ;;  %v1575_v38 = vpop.permute.xlu0 %1574  ;;  %v1577_v30 = vsel %vm713_vm5, %v1571_v12, %v1573_v34  ;;  %v1660_v35 = vrot.slane %v1580_v62, 4 }
 0x4d2   :  { %v1576_v37 = vsel %vm713_vm5, %v1573_v34, %v1575_v38  ;;  %v1579_v54 = vsel %vm713_vm5, %v1575_v38, %v1569_v15  ;;  %v1581_v19 = vmul.f32 %v1577_v30, %v4950_v10 }
 0x4d3   :  { %v1582_v0 = vmul.f32 %v1576_v37, %v4951_v20  ;;  %v1583_v15 = vmul.f32 %v1579_v54, %v3247_v24 }
 0x4d4   :  { %v1601_v46 = vpop.permute.xlu1 %1600  ;;  %v1661_v63 = vrot.slane %v1581_v19, 4 }
 0x4d5   :  { %v1603_v22 = vpop.permute.xlu0 %1602  ;;  %v1662_v34 = vrot.slane %v1582_v0, 4  ;;  %v1688_v0 = vsel %vm491_vm1, %v4043_v1, %v1660_v35 }
 0x4d6   :  { %v1610_v26 = vsel %vm811_vm6, %v1601_v46, %v1603_v22 }
 0x4d7   :  { %v1612_v16 = vmul.f32 %v1610_v26, %v4926_v21 }
 0x4d8   :  { %v1605_v52 = vpop.permute.xlu1 %1604 }
 0x4d9   :  { %v1607_v13 = vpop.permute.xlu0 %1606  ;;  %v1609_v59 = vsel %vm811_vm6, %v1603_v22, %v1605_v52  ;;  %v1672_v22 = vrot.slane %v1612_v16, 4  ;;  %v1689_v16 = vsel %vm491_vm1, %v4045_v29, %v1661_v63  ;;  %v4230_v29 = vld [vmem:[%s4771_s5 + $0x20] ss:$0 sm:$0xff] }
 0x4da   :  { %v1608_v33 = vsel %vm811_vm6, %v1605_v52, %v1607_v13  ;;  %v1611_v39 = vsel %vm811_vm6, %v1607_v13, %v1601_v46  ;;  %v1613_v51 = vmul.f32 %v1609_v59, %v3449_v57  ;;  %v1663_v46 = vrot.slane %v1583_v15, 4 }
 0x4db   :  { %v1614_v53 = vmul.f32 %v1608_v33, %v3453_v32  ;;  %v1615_v40 = vmul.f32 %v1611_v39, %v3457_v44  ;;  %v1690_v39 = vsel %vm491_vm1, %v4051_v23, %v1662_v34 }
 0x4dc   :  { %v1585_v2 = vpop.permute.xlu1 %1584  ;;  %v1673_v52 = vrot.slane %v1613_v51, 4 }
 0x4dd   :  { %v1587_v12 = vpop.permute.xlu0 %1586  ;;  %v1674_v37 = vrot.slane %v1614_v53, 4  ;;  %v1675_v59 = vrot.slane %v1615_v40, 4 }
 0x4de   :  { %v1594_v55 = vsel %vm762_vm8, %v1585_v2, %v1587_v12 }
 0x4df   :  { %v1596_v18 = vmul.f32 %v1594_v55, %v3460_v6  ;;  %v1691_v55 = vsel %vm491_vm1, %v4053_v3, %v1663_v46 }
 0x4e0   :  { %v1589_v38 = vpop.permute.xlu1 %1588 }
 0x4e1   :  { %v1593_v9 = vsel %vm762_vm8, %v1587_v12, %v1589_v38  ;;  %v1591_v30 = vpop.permute.xlu0 %1590  ;;  %v1692_v33 = vsel %vm491_vm1, %v1596_v18, %v1672_v22 }
 0x4e2   :  { %v1597_v13 = vmul.f32 %v1593_v9, %v3463_v5  ;;  %v1592_v54 = vsel %vm762_vm8, %v1589_v38, %v1591_v30  ;;  %v1595_v26 = vsel %vm762_vm8, %v1591_v30, %v1585_v2  ;;  %v1700_v18 = vpack.c.bf16 %v1692_v33, %v1688_v0  ;;  %v2562_v33 = vld [vmem:[%s4775_s9 + $0x2] sm:$0x3] }
 0x4e3   :  { %v1598_v62 = vmul.f32 %v1592_v54, %v3441_v7  ;;  %v1599_v19 = vmul.f32 %v1595_v26, %v3475_v58 }
 0x4e4   :  { %v1617_v15 = vpop.permute.xlu1 %1616  ;;  %v1693_v51 = vsel %vm491_vm1, %v1597_v13, %v1673_v52 }
 0x4e5   :  { %v1694_v2 = vsel %vm491_vm1, %v1598_v62, %v1674_v37  ;;  %v1619_v12 = vpop.permute.xlu0 %1618  ;;  %v1701_v53 = vpack.c.bf16 %v1693_v51, %v1689_v16  ;;  %v1695_v40 = vsel %vm491_vm1, %v1599_v19, %v1675_v59 }
 0x4e6   :  { %v1626_v1 = vsel %vm860_vm9, %v1617_v15, %v1619_v12  ;;  %v1703_v23 = vpack.c.bf16 %v1695_v40, %v1691_v55  ;;  %v1702_v35 = vpack.c.bf16 %v1694_v2, %v1690_v39 }
 0x4e7   :  { %v1628_v63 = vmul.f32 %v4230_v29, %v1626_v1  ;;  %1725 = vmatprep.subr.bf16.mxu0 %v1701_v53 }
 0x4e8   :  { %v1621_v34 = vpop.permute.xlu1 %1620  ;;  %1726 = vmatpush1.bf16.msra.mxu0 %v1700_v18  ;;  %1766 = vmatprep.subr.bf16.mxu1 %v1703_v23 }
 0x4e9   :  { %v1625_v3 = vsel %vm860_vm9, %v1619_v12, %v1621_v34  ;;  %1767 = vmatpush1.bf16.msra.mxu1 %v1702_v35  ;;  %v1623_v38 = vpop.permute.xlu0 %1622  ;;  %v1704_v46 = vpack.c.bf16 %v1628_v63, %v1628_v63 }
 0x4ea   :  { %v1629_v22 = vmul.f32 %v3797_v43, %v1625_v3  ;;  %v1624_v52 = vsel %vm860_vm9, %v1621_v34, %v1623_v38  ;;  %v1627_v9 = vsel %vm860_vm9, %v1623_v38, %v1617_v15  ;;  %v2570_v38 = vld [vmem:[%s4773_s10 + $0x8] sm:$0xf] }
 0x4eb   :  { %v1630_v30 = vmul.f32 %v3802_v41, %v1624_v52  ;;  %v1631_v37 = vmul.f32 %v3770_v60, %v1627_v9  ;;  %v1712_v59 = vsel %vm1381_vm12, %v1704_v46, 0  ;;  %v2571_v46 = vld [vmem:[%s4774_s11 + $0x8] sm:$0xf]  ;;  %v2360_v9 = vld [vmem:[%s4776_s12 + $0x10] sm:$0xff] }
 0x4ec   :  { %v1705_v13 = vpack.c.bf16 %v1629_v22, %v1629_v22  ;;  %v2358_v22 = vld [vmem:[%s4776_s12] sm:$0xff]  ;;  %v2359_v52 = vld [vmem:[%s4776_s12 + $0x8] sm:$0xff] }
 0x4ed   :  { %v1706_v54 = vpack.c.bf16 %v1630_v30, %v1630_v30  ;;  %v1707_v26 = vpack.c.bf16 %v1631_v37, %v1631_v37  ;;  %v2361_v30 = vld [vmem:[%s4776_s12 + $0x18] sm:$0xff]  ;;  %v2362_v37 = vld [vmem:[%s4776_s12 + $0x20] sm:$0xf] }
 0x4ee   :  { %2565 = vmatprep.subr.msk.bf16.mxu0 %vm1381_vm12, %v1705_v13 }
 0x4ef   :  { %1728 = vmatpush1.bf16.msra.mxu0 %v1712_v59  ;;  %2567 = vmatprep.subr.msk.bf16.mxu1 %vm1381_vm12, %v1707_v26  ;;  %v1718_v43 = vsel %vm1381_vm12, %v1706_v54, 0 }
 0x4f0   :  { %1769 = vmatpush1.bf16.msra.mxu1 %v1718_v43 }
 0x4f2   :  { %2566 = vmatmul.mubr.msk.bf16.vlgmr.msra.gmra.mrb[16].mxu0 %vm1377_vm13, %v2562_v33 }
 0x4f3   :  { %2568 = vmatmul.mubr.msk.bf16.vlgmr.msra.gmra.mrb[16].mxu1 %vm1377_vm13, %v2562_v33  ;;  %2084 = vmatprep.mubr.bf16.mxu0 %v4937_v27 }
 0x4f4   :  { %2125 = vmatprep.mubr.bf16.mxu1 %v4937_v27 }
 0x4f9   :  { %v1808_v60 = vpop.permute.xlu1 %1807 }
 0x4fa   :  { %v1817_v41 = vpop.permute.xlu0 %1816 }
 0x5c5   :  { %v1757_v62 = vpop.f32.mrb[16].mxu0 }
 0x5c6   :  { %v1810_v19 = vmul.f32 %v1808_v60, %v1757_v62  ;;  %v1759_v0 = vpop.f32.mrb[17].mxu0  ;;  %v1798_v39 = vpop.f32.mrb[16].mxu1 }
 0x5c7   :  { %v1811_v15 = vmul.f32 %v1808_v60, %v1759_v0  ;;  %v1812_v16 = vmul.f32 %v1808_v60, %v1798_v39  ;;  %v1761_v51 = vpop.f32.mrb[18].mxu0  ;;  %v1800_v2 = vpop.f32.mrb[17].mxu1 }
 0x5c8   :  { %v1819_v12 = vadd.f32 %v1817_v41, %v1810_v19  ;;  %v1813_v53 = vmul.f32 %v1808_v60, %v1800_v2  ;;  %v1762_v55 = vpop.f32.mrb[19].mxu0  ;;  %v1802_v40 = vpop.f32.mrb[18].mxu1 }
 0x5c9   :  { %v1820_v1 = vadd.f32 %v1817_v41, %v1811_v15  ;;  %v1803_v18 = vpop.f32.mrb[19].mxu1  ;;  %v1821_v35 = vadd.f32 %v1817_v41, %v1812_v16 }
 0x5ca   :  { %v4253_v23 = vmax.f32 %v1819_v12, 0.0  ;;  %v1822_v63 = vadd.f32 %v1817_v41, %v1813_v53 }
 0x5cb   :  { %v4255_v27 = vmax.f32 %v1820_v1, 0.0  ;;  %v4261_v34 = vmax.f32 %v1821_v35, 0.0 }
 0x5cc   :  { %1849 = vrot.lane.b32.xlu1 %v4253_v23, %s2734_s2  ;;  %v4263_v3 = vmax.f32 %v1822_v63, 0.0 }
 0x5cd   :  { %1851 = vrot.lane.b32.xlu0 %v4255_v27, %s2734_s2 }
 0x5d0   :  { %1853 = vrot.lane.b32.xlu1 %v4261_v34, %s2734_s2 }
 0x5d1   :  { %1855 = vrot.lane.b32.xlu0 %v4263_v3, %s2734_s2 }
 0x5d4   :  { %1881 = vrot.lane.b32.xlu1 %v4253_v23, %s2735_s4 }
 0x5d5   :  { %1883 = vrot.lane.b32.xlu0 %v4255_v27, %s2735_s4 }
 0x5d8   :  { %1885 = vrot.lane.b32.xlu1 %v4261_v34, %s2735_s4 }
 0x5d9   :  { %1887 = vrot.lane.b32.xlu0 %v4263_v3, %s2735_s4 }
 0x5dc   :  { %1833 = vrot.lane.b32.xlu1 %v4253_v23, %s2733_s1 }
 0x5dd   :  { %1835 = vrot.lane.b32.xlu0 %v4255_v27, %s2733_s1 }
 0x5e0   :  { %1837 = vrot.lane.b32.xlu1 %v4261_v34, %s2733_s1 }
 0x5e1   :  { %1839 = vrot.lane.b32.xlu0 %v4263_v3, %s2733_s1 }
 0x5e4   :  { %1865 = vrot.lane.b32.xlu1 %v4253_v23, %s2736_s21 }
 0x5e5   :  { %1867 = vrot.lane.b32.xlu0 %v4255_v27, %s2736_s21 }
 0x5e8   :  { %1869 = vrot.lane.b32.xlu1 %v4261_v34, %s2736_s21 }
 0x5e9   :  { %1871 = vrot.lane.b32.xlu0 %v4263_v3, %s2736_s21 }
 0x5ec   :  { %1897 = vrot.lane.b32.xlu1 %v4253_v23, %s2737_s22 }
 0x5ed   :  { %1899 = vrot.lane.b32.xlu0 %v4255_v27, %s2737_s22 }
 0x5f0   :  { %1901 = vrot.lane.b32.xlu1 %v4261_v34, %s2737_s22 }
 0x5f1   :  { %1903 = vrot.lane.b32.xlu0 %v4263_v3, %s2737_s22 }
 0x5f4   :  { %1929 = vrot.lane.b32.xlu1 %v4253_v23, %s2738_s23 }
 0x5f5   :  { %1931 = vrot.lane.b32.xlu0 %v4255_v27, %s2738_s23 }
 0x5f8   :  { %1933 = vrot.lane.b32.xlu1 %v4261_v34, %s2738_s23 }
 0x5f9   :  { %1935 = vrot.lane.b32.xlu0 %v4263_v3, %s2738_s23 }
 0x5fc   :  { %1913 = vrot.lane.b32.xlu1 %v4253_v23, %s2739_s24 }
 0x5fd   :  { %1915 = vrot.lane.b32.xlu0 %v4255_v27, %s2739_s24 }
 0x600   :  { %1917 = vrot.lane.b32.xlu1 %v4261_v34, %s2739_s24 }
 0x601   :  { %1919 = vrot.lane.b32.xlu0 %v4263_v3, %s2739_s24 }
 0x604   :  { %1945 = vrot.lane.b32.xlu1 %v4253_v23, %s2740_s25 }
 0x605   :  { %1947 = vrot.lane.b32.xlu0 %v4255_v27, %s2740_s25 }
 0x608   :  { %1949 = vrot.lane.b32.xlu1 %v4261_v34, %s2740_s25 }
 0x609   :  { %1951 = vrot.lane.b32.xlu0 %v4263_v3, %s2740_s25 }
 0x60c   :  { %2136 = vperm.xlu1 %2667, %v2570_v38  }
 0x60d   :  { %2145 = vperm.xlu0 %2666, %v2571_v46  }
 0x610   :  { %2365 = vperm.xlu1 %2667, %v2358_v22  }
 0x611   :  { %2370 = vperm.xlu0 %2666, %v2359_v52  }
 0x614   :  { %2375 = vperm.xlu1 %2667, %v2360_v9  }
 0x615   :  { %2380 = vperm.xlu0 %2666, %v2361_v30  }
 0x618   :  { %2385 = vperm.xlu1 %2667, %v2362_v37  }
 0x63e   :  { %v1850_v13 = vpop.permute.xlu1 %1849 }
 0x63f   :  { %v1852_v54 = vpop.permute.xlu0 %1851 }
 0x640   :  { %v1859_v0 = vsel %vm566_vm3, %v1850_v13, %v1852_v54 }
 0x641   :  { %v1862_v2 = vmul.f32 %v1859_v0, %v4896_v61 }
 0x642   :  { %v1854_v26 = vpop.permute.xlu1 %1853 }
 0x643   :  { %v1856_v59 = vpop.permute.xlu0 %1855  ;;  %v1858_v40 = vsel %vm566_vm3, %v1852_v54, %v1854_v26  ;;  %v1966_v9 = vrot.slane %v1862_v2, 4 }
 0x644   :  { %v1860_v39 = vsel %vm566_vm3, %v1856_v59, %v1850_v13  ;;  %v1857_v15 = vsel %vm566_vm3, %v1854_v26, %v1856_v59  ;;  %v1863_v30 = vmul.f32 %v1858_v40, %v4897_v42 }
 0x645   :  { %v1861_v1 = vmul.f32 %v1860_v39, %v4938_v36  ;;  %v1864_v18 = vmul.f32 %v1857_v15, %v4939_v17 }
 0x646   :  { %v1882_v43 = vpop.permute.xlu1 %1881 }
 0x647   :  { %v1884_v33 = vpop.permute.xlu0 %1883  ;;  %v1965_v54 = vrot.slane %v1861_v1, 4  ;;  %v1968_v39 = vrot.slane %v1864_v18, 4 }
 0x648   :  { %v1891_v16 = vsel %vm664_vm4, %v1882_v43, %v1884_v33 }
 0x649   :  { %v1894_v35 = vmul.f32 %v1891_v16, %v3181_v50 }
 0x64a   :  { %v1886_v60 = vpop.permute.xlu1 %1885 }
 0x64b   :  { %v1888_v41 = vpop.permute.xlu0 %1887  ;;  %v1890_v12 = vsel %vm664_vm4, %v1884_v33, %v1886_v60  ;;  %v1978_v33 = vrot.slane %v1894_v35, 4 }
 0x64c   :  { %v1895_v63 = vmul.f32 %v1890_v12, %v3200_v56  ;;  %v1889_v38 = vsel %vm664_vm4, %v1886_v60, %v1888_v41  ;;  %v1892_v46 = vsel %vm664_vm4, %v1888_v41, %v1882_v43 }
 0x64d   :  { %v1893_v60 = vmul.f32 %v1892_v46, %v4941_v48  ;;  %v1896_v41 = vmul.f32 %v1889_v38, %v4942_v8 }
 0x64e   :  { %v1834_v62 = vpop.permute.xlu1 %1833 }
 0x64f   :  { %v1836_v19 = vpop.permute.xlu0 %1835  ;;  %v1977_v38 = vrot.slane %v1893_v60, 4  ;;  %v1980_v46 = vrot.slane %v1896_v41, 4 }
 0x650   :  { %v1843_v53 = vsel %vm517_vm2, %v1834_v62, %v1836_v19 }
 0x651   :  { %v1846_v22 = vmul.f32 %v1843_v53, %v4940_v49 }
 0x652   :  { %v1838_v51 = vpop.permute.xlu1 %1837 }
 0x653   :  { %v1840_v55 = vpop.permute.xlu0 %1839  ;;  %v1842_v37 = vsel %vm517_vm2, %v1836_v19, %v1838_v51  ;;  %v1979_v19 = vrot.slane %v1895_v63, 4 }
 0x654   :  { %v1841_v26 = vsel %vm517_vm2, %v1838_v51, %v1840_v55  ;;  %v1844_v59 = vsel %vm517_vm2, %v1840_v55, %v1834_v62  ;;  %v1847_v15 = vmul.f32 %v1842_v37, %v4944_v45  ;;  %v2010_v51 = vsel %vm491_vm1, %v1846_v22, %v1966_v9  ;;  %v4952_v62 = vld [vmem:[#allocation14_spill] sm:$0xff] }
 0x655   :  { %v1845_v2 = vmul.f32 %v1844_v59, %v4945_v31  ;;  %v1848_v12 = vmul.f32 %v1841_v26, %v4952_v62  ;;  %v1967_v37 = vrot.slane %v1863_v30, 4 }
 0x656   :  { %v1866_v52 = vpop.permute.xlu1 %1865 }
 0x657   :  { %v1868_v13 = vpop.permute.xlu0 %1867  ;;  %v2009_v59 = vsel %vm491_vm1, %v1845_v2, %v1965_v54  ;;  %v2011_v60 = vsel %vm491_vm1, %v1847_v15, %v1967_v37 }
 0x658   :  { %v1875_v43 = vsel %vm615_vm7, %v1866_v52, %v1868_v13 }
 0x659   :  { %v1878_v0 = vmul.f32 %v1875_v43, %v4943_v11 }
 0x65a   :  { %v1870_v16 = vpop.permute.xlu1 %1869 }
 0x65b   :  { %v1874_v53 = vsel %vm615_vm7, %v1868_v13, %v1870_v16  ;;  %v1872_v55 = vpop.permute.xlu0 %1871  ;;  %v2014_v40 = vsel %vm491_vm1, %v1878_v0, %v1978_v33  ;;  %v2012_v0 = vsel %vm491_vm1, %v1848_v12, %v1968_v39 }
 0x65c   :  { %v1879_v1 = vmul.f32 %v1874_v53, %v4947_v47  ;;  %v1873_v18 = vsel %vm615_vm7, %v1870_v16, %v1872_v55  ;;  %v1876_v35 = vsel %vm615_vm7, %v1872_v55, %v1866_v52  ;;  %v2026_v63 = vpack.c.bf16 %v2014_v40, %v2010_v51 }
 0x65d   :  { %v1877_v22 = vmul.f32 %v1876_v35, %v4948_v25  ;;  %v1880_v9 = vmul.f32 %v1873_v18, %v4949_v4 }
 0x65e   :  { %v2015_v13 = vsel %vm491_vm1, %v1879_v1, %v1979_v19  ;;  %v1898_v26 = vpop.permute.xlu1 %1897  ;;  %2052 = vmatprep.subr.bf16.mxu0 %v2026_v63 }
 0x65f   :  { %v2013_v43 = vsel %vm491_vm1, %v1877_v22, %v1977_v38  ;;  %v1900_v33 = vpop.permute.xlu0 %1899  ;;  %v2016_v52 = vsel %vm491_vm1, %v1880_v9, %v1980_v46  ;;  %v2027_v51 = vpack.c.bf16 %v2015_v13, %v2011_v60 }
 0x660   :  { %v2025_v41 = vpack.c.bf16 %v2013_v43, %v2009_v59  ;;  %v2028_v16 = vpack.c.bf16 %v2016_v52, %v2012_v0  ;;  %v1907_v2 = vsel %vm713_vm5, %v1898_v26, %v1900_v33 }
 0x661   :  { %v1909_v63 = vmul.f32 %v1907_v2, %v3238_v14 }
 0x662   :  { %v1902_v53 = vpop.permute.xlu1 %1901  ;;  %2053 = vmatpush1.bf16.msra.mxu0 %v2025_v41  ;;  %2093 = vmatprep.subr.bf16.mxu1 %v2028_v16 }
 0x663   :  { %2094 = vmatpush1.bf16.msra.mxu1 %v2027_v51  ;;  %v1904_v30 = vpop.permute.xlu0 %1903  ;;  %v1906_v39 = vsel %vm713_vm5, %v1900_v33, %v1902_v53  ;;  %v1989_v60 = vrot.slane %v1909_v63, 4 }
 0x664   :  { %v1905_v15 = vsel %vm713_vm5, %v1902_v53, %v1904_v30  ;;  %v1908_v40 = vsel %vm713_vm5, %v1904_v30, %v1898_v26  ;;  %v1910_v38 = vmul.f32 %v1906_v39, %v4950_v10 }
 0x665   :  { %v1911_v46 = vmul.f32 %v1905_v15, %v4951_v20  ;;  %v1912_v37 = vmul.f32 %v1908_v40, %v3247_v24  ;;  %v2017_v63 = vsel %vm491_vm1, %v4253_v23, %v1989_v60 }
 0x666   :  { %v1930_v19 = vpop.permute.xlu1 %1929  ;;  %v1990_v41 = vrot.slane %v1910_v38, 4 }
 0x667   :  { %v1932_v55 = vpop.permute.xlu0 %1931  ;;  %v1991_v16 = vrot.slane %v1911_v46, 4  ;;  %v1992_v53 = vrot.slane %v1912_v37, 4 }
 0x668   :  { %v1939_v1 = vsel %vm811_vm6, %v1930_v19, %v1932_v55 }
 0x669   :  { %v1941_v13 = vmul.f32 %v1939_v1, %v4926_v21  ;;  %v2019_v38 = vsel %vm491_vm1, %v4261_v34, %v1991_v16  ;;  %v4458_v16 = vld [vmem:[%s4771_s5 + $0x28] ss:$0 sm:$0xff] }
 0x66a   :  { %v1934_v54 = vpop.permute.xlu1 %1933  ;;  %4953 = vst [vmem:[#allocation35_spill] sm:$0xff] %v4458_v16 }
 0x66b   :  { %v1936_v12 = vpop.permute.xlu0 %1935  ;;  %v1938_v18 = vsel %vm811_vm6, %v1932_v55, %v1934_v54  ;;  %v2001_v30 = vrot.slane %v1941_v13, 4 }
 0x66c   :  { %v1937_v35 = vsel %vm811_vm6, %v1934_v54, %v1936_v12  ;;  %v1940_v22 = vsel %vm811_vm6, %v1936_v12, %v1930_v19  ;;  %v1942_v26 = vmul.f32 %v1938_v18, %v3449_v57 }
 0x66d   :  { %v1943_v43 = vmul.f32 %v1937_v35, %v3453_v32  ;;  %v1944_v0 = vmul.f32 %v1940_v22, %v3457_v44  ;;  %v2018_v22 = vsel %vm491_vm1, %v4255_v27, %v1990_v41 }
 0x66e   :  { %v1914_v9 = vpop.permute.xlu1 %1913  ;;  %v2002_v19 = vrot.slane %v1942_v26, 4 }
 0x66f   :  { %v1916_v59 = vpop.permute.xlu0 %1915  ;;  %v2003_v2 = vrot.slane %v1943_v43, 4  ;;  %v2004_v40 = vrot.slane %v1944_v0, 4 }
 0x670   :  { %v1923_v33 = vsel %vm762_vm8, %v1914_v9, %v1916_v59 }
 0x671   :  { %v1925_v52 = vmul.f32 %v1923_v33, %v3460_v6 }
 0x672   :  { %v1918_v51 = vpop.permute.xlu1 %1917 }
 0x673   :  { %v1922_v55 = vsel %vm762_vm8, %v1916_v59, %v1918_v51  ;;  %v1920_v54 = vpop.permute.xlu0 %1919  ;;  %v2021_v1 = vsel %vm491_vm1, %v1925_v52, %v2001_v30  ;;  %v2020_v59 = vsel %vm491_vm1, %v4263_v3, %v1992_v53 }
 0x674   :  { %v1926_v39 = vmul.f32 %v1922_v55, %v3463_v5  ;;  %v1921_v15 = vsel %vm762_vm8, %v1918_v51, %v1920_v54  ;;  %v1924_v12 = vsel %vm762_vm8, %v1920_v54, %v1914_v9  ;;  %v2029_v33 = vpack.c.bf16 %v2021_v1, %v2017_v63  ;;  %v4474_v54 = vld [vmem:[%s4771_s5 + $0x38] ss:$0 sm:$0xff] }
 0x675   :  { %v1927_v18 = vmul.f32 %v1921_v15, %v3441_v7  ;;  %v1928_v35 = vmul.f32 %v1924_v12, %v3475_v58  ;;  %4955 = vst [vmem:[#allocation12_spill] sm:$0xff] %v4474_v54 }
 0x676   :  { %v1946_v46 = vpop.permute.xlu1 %1945  ;;  %v2022_v37 = vsel %vm491_vm1, %v1926_v39, %v2002_v19  ;;  %v4468_v19 = vld [vmem:[%s4771_s5 + $0x30] ss:$0 sm:$0xff] }
 0x677   :  { %v2023_v9 = vsel %vm491_vm1, %v1927_v18, %v2003_v2  ;;  %v1948_v13 = vpop.permute.xlu0 %1947  ;;  %v2030_v26 = vpack.c.bf16 %v2022_v37, %v2018_v22  ;;  %v2024_v43 = vsel %vm491_vm1, %v1928_v35, %v2004_v40  ;;  %4954 = vst [vmem:[#allocation36_spill] sm:$0xff] %v4468_v19  ;;  %v2569_v18 = vld [vmem:[%s4775_s9 + $0x4] sm:$0x3]  ;;  %v21_v35 = vstv %s4777_s13 }
 0x678   :  { %v1955_v23 = vsel %vm860_vm9, %v1946_v46, %v1948_v13  ;;  %v2032_v34 = vpack.c.bf16 %v2024_v43, %v2020_v59  ;;  %v2031_v0 = vpack.c.bf16 %v2023_v9, %v2019_v38  ;;  %22 = vst [vmem:[#allocation2] sm:$0x1] %v21_v35 }
 0x679   :  { %v1957_v52 = vmul.f32 %v4230_v29, %v1955_v23  ;;  %2054 = vmatprep.subr.bf16.mxu0 %v2030_v26 }
 0x67a   :  { %v1950_v27 = vpop.permute.xlu1 %1949  ;;  %2055 = vmatpush1.bf16.msra.mxu0 %v2029_v33  ;;  %2095 = vmatprep.subr.bf16.mxu1 %v2032_v34 }
 0x67b   :  { %v1954_v60 = vsel %vm860_vm9, %v1948_v13, %v1950_v27  ;;  %2096 = vmatpush1.bf16.msra.mxu1 %v2031_v0  ;;  %v1952_v41 = vpop.permute.xlu0 %1951  ;;  %v2033_v3 = vpack.c.bf16 %v1957_v52, %v1957_v52 }
 0x67c   :  { %v1958_v51 = vmul.f32 %v4458_v16, %v1954_v60  ;;  %v1953_v53 = vsel %vm860_vm9, %v1950_v27, %v1952_v41  ;;  %v1956_v30 = vsel %vm860_vm9, %v1952_v41, %v1946_v46 }
 0x67d   :  { %v1959_v55 = vmul.f32 %v4468_v19, %v1953_v53  ;;  %v1960_v2 = vmul.f32 %v4474_v54, %v1956_v30  ;;  %v2041_v40 = vsel %vm1381_vm12, %v2033_v3, 0 }
 0x67e   :  { %v2034_v39 = vpack.c.bf16 %v1958_v51, %v1958_v51 }
 0x67f   :  { %v2035_v15 = vpack.c.bf16 %v1959_v55, %v1959_v55  ;;  %v2036_v12 = vpack.c.bf16 %v1960_v2, %v1960_v2 }
 0x680   :  { %2572 = vmatprep.subr.msk.bf16.mxu0 %vm1381_vm12, %v2034_v39  ;;  %v2452_v39 = vld [vmem:[#allocation2] sm:$0x1] }
 0x681   :  { %2057 = vmatpush1.bf16.msra.mxu0 %v2041_v40  ;;  %2574 = vmatprep.subr.msk.bf16.mxu1 %vm1381_vm12, %v2036_v12  ;;  %v2047_v1 = vsel %vm1381_vm12, %v2035_v15, 0 }
 0x682   :  { %2098 = vmatpush1.bf16.msra.mxu1 %v2047_v1 }
 0x684   :  { %2573 = vmatmul.mubr.msk.bf16.vlgmr.msra.gmra.mrb[20].mxu0 %vm1377_vm13, %v2569_v18 }
 0x685   :  { %2575 = vmatmul.mubr.msk.bf16.vlgmr.msra.gmra.mrb[20].mxu1 %vm1377_vm13, %v2569_v18 }
 0x68b   :  { %v2137_v63 = vpop.permute.xlu1 %2136 }
 0x68c   :  { %v2146_v38 = vpop.permute.xlu0 %2145 }
 0x68f   :  { %v4571_v15 = vpop.permute.xlu1 %2365 }
 0x690   :  { %v4573_v12 = vpop.permute.xlu0 %2370 }
 0x693   :  { %v4575_v40 = vpop.permute.xlu1 %2375 }
 0x694   :  { %v4577_v1 = vpop.permute.xlu0 %2380 }
 0x695   :  { %4956 = vst [vmem:[#allocation21_spill] sm:$0xff] %v4577_v1 }
 0x697   :  { %v4579_v18 = vpop.permute.xlu1 %2385 }
 0x698   :  { %4957 = vst [vmem:[#allocation22_spill] sm:$0xff] %v4579_v18 }
 0x757   :  { %v2086_v46 = vpop.f32.mrb[20].mxu0 }
 0x758   :  { %v2139_v22 = vmul.f32 %v2137_v63, %v2086_v46  ;;  %v2088_v37 = vpop.f32.mrb[21].mxu0  ;;  %v2127_v9 = vpop.f32.mrb[20].mxu1 }
 0x759   :  { %v2140_v13 = vmul.f32 %v2137_v63, %v2088_v37  ;;  %v2141_v26 = vmul.f32 %v2137_v63, %v2127_v9  ;;  %v2090_v59 = vpop.f32.mrb[22].mxu0  ;;  %v2129_v43 = vpop.f32.mrb[21].mxu1 }
 0x75a   :  { %v2148_v23 = vadd.f32 %v2146_v38, %v2139_v22  ;;  %v2142_v33 = vmul.f32 %v2137_v63, %v2129_v43  ;;  %v2091_v34 = vpop.f32.mrb[23].mxu0  ;;  %v2131_v0 = vpop.f32.mrb[22].mxu1 }
 0x75b   :  { %v2149_v52 = vadd.f32 %v2146_v38, %v2140_v13  ;;  %v2150_v27 = vadd.f32 %v2146_v38, %v2141_v26  ;;  %v2132_v60 = vpop.f32.mrb[23].mxu1 }
 0x75c   :  { %v4489_v41 = vmax.f32 %v2148_v23, 0.0  ;;  %v2151_v3 = vadd.f32 %v2146_v38, %v2142_v33 }
 0x75d   :  { %v4491_v51 = vmax.f32 %v2149_v52, 0.0  ;;  %v4493_v53 = vmax.f32 %v2150_v27, 0.0 }
 0x75e   :  { %v4495_v30 = vmax.f32 %v2151_v3, 0.0  ;;  %2166 = vrot.lane.b32.xlu0 %v4489_v41, %s2733_s1  ;;  %2182 = vrot.lane.b32.xlu1 %v4489_v41, %s2734_s2 }
 0x75f   :  { %v2160_v55 = vcombine.low %v4489_v41, %v4491_v51 }
 0x760   :  { %v2161_v2 = vcombine.low %v4493_v53, %v4495_v30 }
 0x761   :  { %2164 = vst [vmem:[%s4778_s14] sm:$0xff] %v2160_v55 }
 0x762   :  { %2165 = vst [vmem:[%s4778_s14 + $0x8] sm:$0xff] %v2161_v2  ;;  %2170 = vrot.lane.b32.xlu0 %v4493_v53, %s2733_s1  ;;  %2186 = vrot.lane.b32.xlu1 %v4493_v53, %s2734_s2 }
 0x766   :  { %2198 = vrot.lane.b32.xlu0 %v4489_v41, %s2736_s21  ;;  %2214 = vrot.lane.b32.xlu1 %v4489_v41, %s2735_s4 }
 0x76a   :  { %2202 = vrot.lane.b32.xlu0 %v4493_v53, %s2736_s21  ;;  %2218 = vrot.lane.b32.xlu1 %v4493_v53, %s2735_s4 }
 0x76e   :  { %2230 = vrot.lane.b32.xlu0 %v4489_v41, %s2737_s22  ;;  %2262 = vrot.lane.b32.xlu1 %v4489_v41, %s2738_s23 }
 0x772   :  { %2234 = vrot.lane.b32.xlu0 %v4493_v53, %s2737_s22  ;;  %2266 = vrot.lane.b32.xlu1 %v4493_v53, %s2738_s23 }
 0x776   :  { %2246 = vrot.lane.b32.xlu0 %v4489_v41, %s2739_s24  ;;  %2168 = vrot.lane.b32.xlu1 %v4491_v51, %s2733_s1 }
 0x77a   :  { %2250 = vrot.lane.b32.xlu0 %v4493_v53, %s2739_s24  ;;  %2172 = vrot.lane.b32.xlu1 %v4495_v30, %s2733_s1 }
 0x77e   :  { %2278 = vrot.lane.b32.xlu0 %v4489_v41, %s2740_s25  ;;  %2200 = vrot.lane.b32.xlu1 %v4491_v51, %s2736_s21 }
 0x782   :  { %2204 = vrot.lane.b32.xlu1 %v4495_v30, %s2736_s21  ;;  %2184 = vrot.lane.b32.xlu0 %v4491_v51, %s2734_s2 }
 0x786   :  { %2232 = vrot.lane.b32.xlu1 %v4491_v51, %s2737_s22  ;;  %2188 = vrot.lane.b32.xlu0 %v4495_v30, %s2734_s2 }
 0x78a   :  { %2236 = vrot.lane.b32.xlu1 %v4495_v30, %s2737_s22  ;;  %2216 = vrot.lane.b32.xlu0 %v4491_v51, %s2735_s4 }
 0x78e   :  { %2248 = vrot.lane.b32.xlu1 %v4491_v51, %s2739_s24  ;;  %2220 = vrot.lane.b32.xlu0 %v4495_v30, %s2735_s4 }
 0x792   :  { %2252 = vrot.lane.b32.xlu1 %v4495_v30, %s2739_s24  ;;  %2264 = vrot.lane.b32.xlu0 %v4491_v51, %s2738_s23 }
 0x796   :  { %2280 = vrot.lane.b32.xlu1 %v4491_v51, %s2740_s25  ;;  %2268 = vrot.lane.b32.xlu0 %v4495_v30, %s2738_s23 }
 0x79a   :  { %2284 = vrot.lane.b32.xlu1 %v4495_v30, %s2740_s25  ;;  %2282 = vrot.lane.b32.xlu0 %v4493_v53, %s2740_s25 }
 0x79e   :  { %2455 = vperm.xlu0 %2666, %v2452_v39  }
 0x7d0   :  { %v2167_v35 = vpop.permute.xlu0 %2166  ;;  %v2183_v63 = vpop.permute.xlu1 %2182 }
 0x7d4   :  { %v2171_v38 = vpop.permute.xlu0 %2170  ;;  %v2187_v46 = vpop.permute.xlu1 %2186 }
 0x7d8   :  { %v2199_v22 = vpop.permute.xlu0 %2198  ;;  %v4581_v37 = vpop.permute.xlu1 %2214 }
 0x7dc   :  { %v2203_v9 = vpop.permute.xlu0 %2202  ;;  %v4583_v13 = vpop.permute.xlu1 %2218 }
 0x7e0   :  { %v2231_v26 = vpop.permute.xlu0 %2230  ;;  %v4585_v59 = vpop.permute.xlu1 %2262 }
 0x7e4   :  { %v2235_v43 = vpop.permute.xlu0 %2234  ;;  %v4587_v23 = vpop.permute.xlu1 %2266 }
 0x7e8   :  { %v4589_v33 = vpop.permute.xlu0 %2246  ;;  %v2169_v34 = vpop.permute.xlu1 %2168 }
 0x7e9   :  { %v2176_v3 = vsel %vm517_vm2, %v2167_v35, %v2169_v34  ;;  %v2175_v55 = vsel %vm517_vm2, %v2169_v34, %v2171_v38 }
 0x7ea   :  { %v2179_v1 = vmul.f32 %v2176_v3, %v4940_v49  ;;  %v2180_v44 = vmul.f32 %v2175_v55, %v4944_v45 }
 0x7ec   :  { %v4591_v0 = vpop.permute.xlu0 %2250  ;;  %v2173_v52 = vpop.permute.xlu1 %2172 }
 0x7ed   :  { %v2177_v2 = vsel %vm517_vm2, %v2173_v52, %v2167_v35  ;;  %v2174_v19 = vsel %vm517_vm2, %v2171_v38, %v2173_v52 }
 0x7ee   :  { %v2178_v35 = vmul.f32 %v2177_v2, %v4945_v31  ;;  %v2181_v52 = vmul.f32 %v2174_v19, %v4952_v62 }
 0x7f0   :  { %v4593_v27 = vpop.permute.xlu0 %2278  ;;  %v2201_v60 = vpop.permute.xlu1 %2200 }
 0x7f1   :  { %v2207_v32 = vsel %vm615_vm7, %v2201_v60, %v2203_v9  ;;  %v2208_v38 = vsel %vm615_vm7, %v2199_v22, %v2201_v60 }
 0x7f2   :  { %v2211_v62 = vmul.f32 %v2208_v38, %v4943_v11  ;;  %v2212_v19 = vmul.f32 %v2207_v32, %v4947_v47 }
 0x7f4   :  { %v2205_v39 = vpop.permute.xlu1 %2204  ;;  %v2185_v16 = vpop.permute.xlu0 %2184 }
 0x7f5   :  { %v2191_v58 = vsel %vm566_vm3, %v2185_v16, %v2187_v46  ;;  %v2192_v18 = vsel %vm566_vm3, %v2183_v63, %v2185_v16  ;;  %v2209_v16 = vsel %vm615_vm7, %v2205_v39, %v2199_v22  ;;  %v2206_v60 = vsel %vm615_vm7, %v2203_v9, %v2205_v39 }
 0x7f6   :  { %v2195_v54 = vmul.f32 %v2192_v18, %v4896_v61  ;;  %v2196_v34 = vmul.f32 %v2191_v58, %v4897_v42  ;;  %v4634_v55 = vmul.f32 %v2209_v16, %v4948_v25  ;;  %v2213_v39 = vmul.f32 %v2206_v60, %v4949_v4 }
 0x7f8   :  { %v2299_v49 = vrot.slane %v2195_v54, 4  ;;  %v2300_v3 = vrot.slane %v2196_v34, 4  ;;  %v2233_v61 = vpop.permute.xlu1 %2232  ;;  %v2189_v18 = vpop.permute.xlu0 %2188 }
 0x7f9   :  { %v2239_v42 = vsel %vm713_vm5, %v2233_v61, %v2235_v43  ;;  %v2240_v58 = vsel %vm713_vm5, %v2231_v26, %v2233_v61  ;;  %v2190_v45 = vsel %vm566_vm3, %v2187_v46, %v2189_v18  ;;  %v2193_v31 = vsel %vm566_vm3, %v2189_v18, %v2183_v63 }
 0x7fa   :  { %v2242_v54 = vmul.f32 %v2240_v58, %v3238_v14  ;;  %v2243_v22 = vmul.f32 %v2239_v42, %v4950_v10  ;;  %v2194_v2 = vmul.f32 %v2193_v31, %v4938_v36  ;;  %v2197_v46 = vmul.f32 %v2190_v45, %v4939_v17 }
 0x7fb   :  { %v2343_v63 = vsel %vm491_vm1, %v2179_v1, %v2299_v49  ;;  %v2344_v11 = vsel %vm491_vm1, %v2180_v44, %v2300_v3 }
 0x7fc   :  { %v2322_v34 = vrot.slane %v2242_v54, 4  ;;  %v2323_v32 = vrot.slane %v2243_v22, 4  ;;  %v2237_v47 = vpop.permute.xlu1 %2236  ;;  %v2217_v14 = vpop.permute.xlu0 %2216  ;;  %v2298_v38 = vrot.slane %v2194_v2, 4  ;;  %v2301_v10 = vrot.slane %v2197_v46, 4 }
 0x7fd   :  { %v2238_v9 = vsel %vm713_vm5, %v2235_v43, %v2237_v47  ;;  %v2241_v25 = vsel %vm713_vm5, %v2237_v47, %v2231_v26  ;;  %v2389_v16 = vmul.f32 %v4571_v15, %v2343_v63  ;;  %v2390_v49 = vmul.f32 %v4571_v15, %v2344_v11 }
 0x7fe   :  { %v2350_v36 = vsel %vm491_vm1, %v4489_v41, %v2322_v34  ;;  %v2351_v17 = vsel %vm491_vm1, %v4491_v51, %v2323_v32  ;;  %v2244_v44 = vmul.f32 %v2238_v9, %v4951_v20  ;;  %v2245_v1 = vmul.f32 %v2241_v25, %v3247_v24 }
 0x7ff   :  { %v2342_v43 = vsel %vm491_vm1, %v2178_v35, %v2298_v38  ;;  %v4655_v26 = vmul.f32 %v4575_v40, %v2350_v36  ;;  %v2345_v41 = vsel %vm491_vm1, %v2181_v52, %v2301_v10  ;;  %v2397_v20 = vmul.f32 %v4575_v40, %v2351_v17 }
 0x800   :  { %v2324_v3 = vrot.slane %v2244_v44, 4  ;;  %v2325_v61 = vrot.slane %v2245_v1, 4  ;;  %v2249_v51 = vpop.permute.xlu1 %2248  ;;  %v2221_v18 = vpop.permute.xlu0 %2220  ;;  %v2388_v24 = vmul.f32 %v4571_v15, %v2342_v43  ;;  %v2223_v4 = vsel %vm664_vm4, %v2217_v14, %v4583_v13 }
 0x801   :  { %v2224_v35 = vsel %vm664_vm4, %v4581_v37, %v2217_v14  ;;  %v2228_v45 = vmul.f32 %v2223_v4, %v3200_v56  ;;  %v2391_v31 = vmul.f32 %v4571_v15, %v2345_v41  ;;  %v2255_v22 = vsel %vm762_vm8, %v2249_v51, %v4591_v0 }
 0x802   :  { %v2352_v42 = vsel %vm491_vm1, %v4493_v53, %v2324_v3  ;;  %v2353_v52 = vsel %vm491_vm1, %v4495_v30, %v2325_v61  ;;  %v2227_v58 = vmul.f32 %v2224_v35, %v3181_v50  ;;  %v2256_v53 = vsel %vm762_vm8, %v4589_v33, %v2249_v51  ;;  %v4958_v3 = vld [vmem:[#allocation40_spill] sm:$0xff]  ;;  %v4959_v51 = vld [vmem:[#allocation41_spill] sm:$0xff] }
 0x803   :  { %v4674_v54 = vmul.f32 %v4575_v40, %v2352_v42  ;;  %v2312_v2 = vrot.slane %v2228_v45, 4  ;;  %v2222_v50 = vsel %vm664_vm4, %v4583_v13, %v2221_v18  ;;  %v2225_v56 = vsel %vm664_vm4, %v2221_v18, %v4581_v37  ;;  %v4961_v42 = vld [vmem:[#allocation21_spill] sm:$0xff] }
 0x804   :  { %v2311_v60 = vrot.slane %v2227_v58, 4  ;;  %v2253_v30 = vpop.permute.xlu1 %2252  ;;  %v2265_v15 = vpop.permute.xlu0 %2264  ;;  %v2399_v46 = vmul.f32 %v4575_v40, %v2353_v52  ;;  %v2226_v63 = vmul.f32 %v2225_v56, %v4941_v48  ;;  %v2229_v11 = vmul.f32 %v2222_v50, %v4942_v8  ;;  %v4962_v58 = vld [vmem:[#allocation22_spill] sm:$0xff] }
 0x805   :  { %v2254_v34 = vsel %vm762_vm8, %v4591_v0, %v2253_v30  ;;  %v2348_v13 = vsel %vm491_vm1, %v2212_v19, %v2312_v2  ;;  %v2258_v47 = vmul.f32 %v2256_v53, %v3460_v6  ;;  %v2259_v37 = vmul.f32 %v2255_v22, %v3463_v5  ;;  %v4963_v53 = vld [vmem:[#allocation42_spill] sm:$0xff] }
 0x806   :  { %v2347_v32 = vsel %vm491_vm1, %v2211_v62, %v2311_v60  ;;  %v2394_v40 = vmul.f32 %v4573_v12, %v2348_v13  ;;  %v2310_v38 = vrot.slane %v2226_v63, 4  ;;  %v2313_v48 = vrot.slane %v2229_v11, 4 }
 0x807   :  { %v2393_v14 = vmul.f32 %v4573_v12, %v2347_v32  ;;  %v2257_v8 = vsel %vm762_vm8, %v2253_v30, %v4589_v33  ;;  %v2260_v0 = vmul.f32 %v2254_v34, %v3441_v7  ;;  %v2271_v62 = vsel %vm811_vm6, %v2265_v15, %v4587_v23 }
 0x808   :  { %v2272_v6 = vsel %vm811_vm6, %v4585_v59, %v2265_v15  ;;  %v2281_v5 = vpop.permute.xlu1 %2280  ;;  %v2269_v19 = vpop.permute.xlu0 %2268  ;;  %v2430_v9 = vadd.f32 %v2394_v40, %v2390_v49  ;;  %v2346_v25 = vsel %vm491_vm1, %v4634_v55, %v2310_v38  ;;  %v2349_v36 = vsel %vm491_vm1, %v2213_v39, %v2313_v48  ;;  %v4965_v48 = vld [vmem:[#allocation35_spill] sm:$0xff] }
 0x809   :  { %v2419_v10 = vadd.f32 %v2393_v14, %v2389_v16  ;;  %v2392_v33 = vmul.f32 %v4573_v12, %v2346_v25  ;;  %v2395_v7 = vmul.f32 %v4573_v12, %v2349_v36  ;;  %v2274_v17 = vmul.f32 %v2272_v6, %v4926_v21 }
 0x80a   :  { %v2275_v44 = vmul.f32 %v2271_v62, %v3449_v57  ;;  %v2288_v1 = vsel %vm860_vm9, %v4593_v27, %v2281_v5  ;;  %v2270_v16 = vsel %vm811_vm6, %v4587_v23, %v2269_v19  ;;  %v2273_v55 = vsel %vm811_vm6, %v2269_v19, %v4585_v59 }
 0x80b   :  { %v2420_v39 = vadd.f32 %v2419_v10, %v2397_v20  ;;  %v2408_v49 = vadd.f32 %v2392_v33, %v2388_v24  ;;  %v2441_v43 = vadd.f32 %v2395_v7, %v2391_v31  ;;  %v2334_v12 = vrot.slane %v2274_v17, 4  ;;  %v4960_v24 = vld [vmem:[#allocation12_spill] sm:$0xff] }
 0x80c   :  { %v2335_v41 = vrot.slane %v2275_v44, 4  ;;  %v2285_v21 = vpop.permute.xlu1 %2284  ;;  %v2290_v57 = vmul.f32 %v4230_v29, %v2288_v1  ;;  %v2276_v61 = vmul.f32 %v2270_v16, %v4958_v3  ;;  %v2277_v18 = vmul.f32 %v2273_v55, %v4959_v51  ;;  %v2283_v22 = vpop.permute.xlu0 %2282 }
 0x80d   :  { %v2289_v23 = vsel %vm860_vm9, %v2285_v21, %v4593_v27  ;;  %v2354_v4 = vsel %vm491_vm1, %v2258_v47, %v2334_v12  ;;  %v2409_v20 = vadd.f32 %v2408_v49, %v4655_v26  ;;  %v2261_v60 = vmul.f32 %v2257_v8, %v4963_v53 }
 0x80e   :  { %v2355_v59 = vsel %vm491_vm1, %v2259_v37, %v2335_v41  ;;  %v2293_v35 = vmul.f32 %v4960_v24, %v2289_v23  ;;  %v2400_v52 = vmul.f32 %v4961_v42, %v2354_v4  ;;  %v2404_v45 = vmul.f32 %v4962_v58, %v2290_v57  ;;  %v4964_v37 = vld [vmem:[#allocation36_spill] sm:$0xff]  ;;  %v4966_v23 = vld [vmem:[#allocation13_spill] sm:$0xff] }
 0x80f   :  { %v2401_v29 = vmul.f32 %v4961_v42, %v2355_v59  ;;  %v2336_v31 = vrot.slane %v2276_v61, 4  ;;  %v2337_v2 = vrot.slane %v2277_v18, 4  ;;  %v2442_v50 = vadd.f32 %v2441_v43, %v2399_v46 }
 0x810   :  { %v2407_v27 = vmul.f32 %v4962_v58, %v2293_v35  ;;  %v2410_v56 = vadd.f32 %v2409_v20, %v2400_v52  ;;  %v2411_v30 = vsel %vm491_vm1, %v2404_v45, 0.0  ;;  %v2431_v34 = vadd.f32 %v2430_v9, %v4674_v54 }
 0x811   :  { %v2356_v26 = vsel %vm491_vm1, %v2260_v0, %v2336_v31  ;;  %v2421_v15 = vadd.f32 %v2420_v39, %v2401_v29  ;;  %v2357_v63 = vsel %vm491_vm1, %v2261_v60, %v2337_v2  ;;  %v2286_v32 = vsel %vm860_vm9, %v2283_v22, %v2285_v21  ;;  %v4967_v31 = vld [vmem:[#allocation11_spill] sm:$0xff] }
 0x812   :  { %v2402_v11 = vmul.f32 %v4961_v42, %v2356_v26  ;;  %v2412_v13 = vadd.f32 %v2411_v30, %v2410_v56  ;;  %v2403_v47 = vmul.f32 %v4961_v42, %v2357_v63  ;;  %v2287_v46 = vsel %vm860_vm9, %v2281_v5, %v2283_v22 }
 0x813   :  { %v2292_v14 = vmul.f32 %v4964_v37, %v2286_v32  ;;  %v2444_v40 = vsel %vm491_vm1, %v2407_v27, 0.0  ;;  %v2291_v8 = vmul.f32 %v4965_v48, %v2287_v46  ;;  %v2741_v43 = vmov 1966171168  }
 0x814   :  { %v2432_v38 = vadd.f32 %v2431_v34, %v2402_v11  ;;  %v2413_v0 = vrot.slane %v2412_v13, 4  ;;  %v2443_v62 = vadd.f32 %v2442_v50, %v2403_v47  ;;  %v2473_v12 = vunpack.c.l.s4 %v2741_v43 }
 0x815   :  { %v2406_v54 = vmul.f32 %v4962_v58, %v2292_v14  ;;  %v2405_v6 = vmul.f32 %v4962_v58, %v2291_v8  ;;  %v4968_v26 = vlaneseq }
 0x816   :  { %v2414_v19 = vadd.f32 %v2413_v0, %v2412_v13  ;;  %v2445_v10 = vadd.f32 %v2444_v40, %v2443_v62  ;;  %v2474_v20 = vunpack.c.0.s8 %v2473_v12 }
 0x817   :  { %v2433_v9 = vsel %vm491_vm1, %v2406_v54, 0.0  ;;  %v2422_v28 = vsel %vm491_vm1, %v2405_v6, 0.0  ;;  %vm2497_vm14 = vcmp.lt.s32.totalorder %v4968_v26, 512 }
 0x818   :  { %v2434_v5 = vadd.f32 %v2433_v9, %v2432_v38  ;;  %v2415_v25 = vrot.slane %v2414_v19, 2  ;;  %v2446_v36 = vrot.slane %v2445_v10, 4  ;;  %v2423_v33 = vadd.f32 %v2422_v28, %v2421_v15 }
 0x819   :  { %v2477_v22 = vsub.s32 %v2474_v20, %v4967_v31 }
 0x81a   :  { %v2435_v7 = vrot.slane %v2434_v5, 4  ;;  %v2416_v17 = vadd.f32 %v2415_v25, %v2414_v19  ;;  %v2447_v44 = vadd.f32 %v2446_v36, %v2445_v10  ;;  %v2424_v1 = vrot.slane %v2423_v33, 4 }
 0x81c   :  { %v2436_v16 = vadd.f32 %v2435_v7, %v2434_v5  ;;  %v2448_v55 = vrot.slane %v2447_v44, 2  ;;  %v2425_v39 = vadd.f32 %v2424_v1, %v2423_v33  ;;  %v2417_v3 = vrot.slane %v2416_v17, 1 }
 0x81d   :  { %v2456_v41 = vpop.permute.xlu0 %2455 }
 0x81e   :  { %v2437_v49 = vrot.slane %v2436_v16, 2  ;;  %v2449_v21 = vadd.f32 %v2448_v55, %v2447_v44  ;;  %v2426_v57 = vrot.slane %v2425_v39, 2  ;;  %v2461_v4 = vrot.slane %v2456_v41, %v4966_v23 }
 0x81f   :  { %v2418_v24 = vadd.f32 %v2417_v3, %v2416_v17 }
 0x820   :  { %v2438_v61 = vadd.f32 %v2437_v49, %v2436_v16  ;;  %v2427_v51 = vadd.f32 %v2426_v57, %v2425_v39  ;;  %v2450_v18 = vrot.slane %v2449_v21, 1 }
 0x821   :  { %v2462_v58 = vadd.f32 %v2461_v4, %v2418_v24 }
 0x822   :  { %v2439_v59 = vrot.slane %v2438_v61, 1  ;;  %v2428_v35 = vrot.slane %v2427_v51, 1  ;;  %v2451_v42 = vadd.f32 %v2450_v18, %v2449_v21 }
 0x824   :  { %v2440_v52 = vadd.f32 %v2439_v59, %v2438_v61  ;;  %v2429_v29 = vadd.f32 %v2428_v35, %v2427_v51  ;;  %v2465_v45 = vadd.f32 %v2461_v4, %v2451_v42 }
 0x826   :  { %v2464_v53 = vadd.f32 %v2461_v4, %v2440_v52  ;;  %v2463_v60 = vadd.f32 %v2461_v4, %v2429_v29 }
 0x828   :  { %v2471_v2 = vcombine.low %v2464_v53, %v2465_v45  ;;  %v2470_v27 = vcombine.low %v2462_v58, %v2463_v60 }
 0x82a   :  { %v2485_v50 = vrot.slane %v2471_v2, %v2477_v22  ;;  %v2478_v56 = vrot.slane %v2470_v27, %v2477_v22 }
 0x82c   :  { %v2486_v30 = vcombine.low %v2478_v56, %v2485_v50 }
 0x82e   :  { %v2493_v15 = vrot.slane %v2486_v30, %v2477_v22 }
 0x830   :  { %2499 = vst.msk [vmem:[%s4779_s15] sm:$0xf] %vm2497_vm14, %v2493_v15 }

</bundles_post_ra>
